<compile_context>
chip_gen: v5e
topology: v5e:2x2
jax: 0.10.0
libtpu: 0.0.40
codegen_flags: <defaults>
</compile_context>

<pallas_src>
import jax
import jax.numpy as jnp
from jax import lax
from jax.experimental import pallas as pl
from jax.experimental.pallas import tpu as pltpu

# ----------------------- small synthetic shapes -----------------------
B = 2          # batch
C_IN = 3       # RGB channels
H = W = 16     # spatial (stands in for 224)
KS = 3         # conv kernel size
P = H * W      # spatial positions
K = C_IN * KS * KS          # 27 conv taps
K_PAD = 32                  # 27 taps + 1 bias column, padded to 32 rows
FEAT = 64      # image feature dim (stands in for ResNet-50's 2048)
HID = 32       # decoder hidden size
EMB = 32       # token embedding dim
VOCAB = 64     # vocabulary size
LIMIT = 20     # max caption length (limit=20 in top_k_predict)
TOP_K = 3      # k=3 (deterministic decode: best of the top-k == argmax)
LANE = 128     # TPU lane width; all slab blocks are 128 lanes wide

# weight-slab row layout (all offsets/sizes are multiples of 16 -> bf16 tile aligned)
ROW_CONV = 0                    # [K_PAD, LANE]  conv weight rows + bias row (cols :FEAT)
ROW_WIMG = ROW_CONV + K_PAD     # [LANE,  LANE]  w_img   (rows :FEAT, cols :HID)
ROW_EMB = ROW_WIMG + LANE       # [LANE,  LANE]  emb@W_e (rows :VOCAB, cols :HID)
ROW_WCAT = ROW_EMB + LANE       # [LANE,  LANE]  [w_h | 0 | w_out] (rows :HID)
SLAB_ROWS = ROW_WCAT + LANE     # 416


# ----------------------- fused Pallas kernel -----------------------
def caption_kernel(
    patches_ref,   # [B*P, K_PAD]      bf16  im2col patches + ones bias column
    wslab_ref,     # [SLAB_ROWS, LANE] bf16  packed weight slab
    bslab_ref,     # [8, LANE]         f32   row0: b_img | row1: [b_h | 0 | b_out]
    tok_ref,       # [B, LIMIT]        int32 output token ids
):
    batch = tok_ref.shape[0]
    limit = tok_ref.shape[1]
    spatial = patches_ref.shape[0] // batch

    # -------- encoder: conv (+bias via ones column) -> ReLU -> f32 global avg pool ----
    conv = jnp.dot(patches_ref[...], wslab_ref[ROW_CONV:ROW_CONV + K_PAD, :],
                   preferred_element_type=jnp.float32)              # [B*P, 128]
    conv = jnp.maximum(conv, 0.0)
    feat_rows = [
        jnp.mean(conv[b * spatial:(b + 1) * spatial, :], axis=0, keepdims=True)
        for b in range(batch)
    ]
    feat = jnp.concatenate(feat_rows, axis=0)                       # [B, 128] f32

    # -------- decoder init: h0 = tanh(feat @ w_img + b_img) --------
    h = jnp.tanh(
        jnp.dot(feat.astype(jnp.bfloat16), wslab_ref[ROW_WIMG:ROW_WIMG + LANE, :],
                preferred_element_type=jnp.float32)
        + bslab_ref[0:1, :])                                        # [B, 128] f32
    # cols >= HID of h are ignored downstream (w_cat rows >= HID are zero).

    # -------- loop invariants hoisted out of the unrolled decode loop --------
    emb_pad = wslab_ref[ROW_EMB:ROW_EMB + LANE, :]                  # [128,128] bf16
    w_cat = wslab_ref[ROW_WCAT:ROW_WCAT + LANE, :]                  # [128,128] bf16
    b_cat = bslab_ref[1:2, :]                                       # [1,128]   f32
    ids = lax.broadcasted_iota(jnp.int32, (batch, LANE), 1)         # lane ids 0..127
    is_logit_col = ids >= (LANE - VOCAB)                            # logits in cols 64..127
    rev_ids = (LANE - 1) - ids                                      # 127-col (fits in 8 bits)
    col_t = lax.broadcasted_iota(jnp.int32, (batch, limit), 1)
    int_min = jnp.int32(jnp.iinfo(jnp.int32).min)
    tok_acc = jnp.zeros((batch, limit), jnp.int32)

    # -------- greedy decode, LIMIT static -> fully unrolled --------
    # TODO(synk): Predictor.top_k_predict samples among the top-k=3 tokens; here we
    # deterministically take the best of the top-k (== argmax), no <end>-token early stop.
    for t in range(limit):
        # one fused matmul: cols 0..31 = h@w_h (+b_h), cols 64..127 = logits (+b_out)
        combined = jnp.dot(h.astype(jnp.bfloat16), w_cat,
                           preferred_element_type=jnp.float32) + b_cat      # [B,128]

        # single packed argmax reduce: monotone int32 key from the f32 bits, reversed
        # token index in the low 8 bits, one lane max, then unpack the index.
        bits = pltpu.bitcast(combined, jnp.int32)
        mono = jnp.where(bits < 0, bits ^ jnp.int32(0x7FFFFFFF), bits)
        key = jnp.where(is_logit_col,
                        (mono & jnp.int32(-256)) | rev_ids, int_min)
        best = jnp.max(key, axis=-1, keepdims=True)                         # [B,1]
        token = (VOCAB - 1) - (best & jnp.int32(0xFF))                      # [B,1] in [0,VOCAB)

        tok_acc = jnp.where(col_t == t, token, tok_acc)

        # embedding lookup (onehot @ (emb @ W_e)) fused with the recurrent partial;
        # cols >= HID of the sum are junk but are killed by w_cat's zero rows next step.
        onehot = (ids == token).astype(jnp.bfloat16)                        # [B,128]
        emb_proj = jnp.dot(onehot, emb_pad, preferred_element_type=jnp.float32)
        h = jnp.tanh(emb_proj + combined)

    tok_ref[...] = tok_acc   # single bulk store of all token ids


# ----------------------- glue (plain JAX) -----------------------
def im2col(x, ksize=KS, pad=1):
    """x: [B, C, H, W] NCHW -> patches [B*H*W, C*ksize*ksize] (c-major tap order)."""
    b, c, h, w = x.shape
    xp = jnp.pad(x, ((0, 0), (0, 0), (pad, pad), (pad, pad)))
    cols = []
    for dy in range(ksize):
        for dx in range(ksize):
            cols.append(xp[:, :, dy:dy + h, dx:dx + w])             # [B, C, H, W]
    p = jnp.stack(cols, axis=2)                                     # [B, C, k*k, H, W]
    p = p.transpose(0, 3, 4, 1, 2).reshape(b * h * w, c * ksize * ksize)
    return p


def build_patches(img):
    p = im2col(img)                                                 # [B*P, K] f32
    ones = jnp.ones((p.shape[0], 1), p.dtype)                       # conv bias folded in
    p = jnp.concatenate([p, ones], axis=1)                          # [B*P, K+1]
    p = jnp.pad(p, ((0, 0), (0, K_PAD - (K + 1))))                  # [B*P, K_PAD]
    return p.astype(jnp.bfloat16)


def pack_params(params):
    """Pack all weights into one bf16 slab and all biases into one f32 slab."""
    wslab = jnp.zeros((SLAB_ROWS, LANE), jnp.float32)
    wslab = wslab.at[ROW_CONV:ROW_CONV + K, :FEAT].set(params["w_conv"])
    wslab = wslab.at[ROW_CONV + K, :FEAT].set(params["b_conv"][0])      # conv bias row
    wslab = wslab.at[ROW_WIMG:ROW_WIMG + FEAT, :HID].set(params["w_img"])
    wslab = wslab.at[ROW_EMB:ROW_EMB + VOCAB, :HID].set(params["emb_we"])
    wslab = wslab.at[ROW_WCAT:ROW_WCAT + HID, :HID].set(params["w_h"])
    wslab = wslab.at[ROW_WCAT:ROW_WCAT + HID, LANE - VOCAB:].set(params["w_out"])
    wslab = wslab.astype(jnp.bfloat16)

    bslab = jnp.zeros((8, LANE), jnp.float32)
    bslab = bslab.at[0, :HID].set(params["b_img"][0])
    bslab = bslab.at[1, :HID].set(params["b_h"][0])
    bslab = bslab.at[1, LANE - VOCAB:].set(params["b_out"][0])
    return wslab, bslab


def image_caption_forward(img, wslab, bslab):
    """Mirrors ImageCaptionModel.forward: encode -> [:, :, 0, 0] -> top-k decode."""
    patches = build_patches(img)                                    # [B*P, K_PAD] bf16
    token_ids = pl.pallas_call(
        caption_kernel,
        out_shape=jax.ShapeDtypeStruct((B, LIMIT), jnp.int32),
        in_specs=[pl.BlockSpec(memory_space=pltpu.MemorySpace.VMEM)] * 3,
        out_specs=pl.BlockSpec(memory_space=pltpu.MemorySpace.VMEM),
    )(patches, wslab, bslab)
    return token_ids                                                # [B, LIMIT]


def init_params(key):
    # TODO(synk): pretrained ResNet-50 + CaptionModel checkpoint weights unavailable;
    # deterministic random stand-in weights with the same structural roles.
    ks = jax.random.split(key, 9)
    w_conv = 0.1 * jax.random.normal(ks[0], (FEAT, C_IN, KS, KS), jnp.float32)
    w_conv_flat = w_conv.reshape(FEAT, C_IN * KS * KS).T            # [K, FEAT]
    emb = 0.1 * jax.random.normal(ks[4], (VOCAB, EMB), jnp.float32)
    w_e = 0.1 * jax.random.normal(ks[5], (EMB, HID), jnp.float32)
    return {
        "w_conv": w_conv_flat,
        "b_conv": 0.1 * jax.random.normal(ks[1], (1, FEAT), jnp.float32),
        "w_img": 0.1 * jax.random.normal(ks[2], (FEAT, HID), jnp.float32),
        "b_img": 0.1 * jax.random.normal(ks[3], (1, HID), jnp.float32),
        "emb_we": emb @ w_e,                                        # embedding folded with W_e
        "w_h": 0.1 * jax.random.normal(ks[6], (HID, HID), jnp.float32),
        "b_h": 0.1 * jax.random.normal(ks[7], (1, HID), jnp.float32),
        "w_out": 0.1 * jax.random.normal(ks[8], (HID, VOCAB), jnp.float32),
        "b_out": jnp.zeros((1, VOCAB), jnp.float32),
    }


if __name__ == "__main__":
    key = jax.random.PRNGKey(0)
    k_img, k_par = jax.random.split(key)
    img = jax.random.normal(k_img, (B, C_IN, H, W), jnp.float32)    # NCHW
    params = init_params(k_par)
    wslab, bslab = pack_params(params)

    fwd = jax.jit(image_caption_forward)
    token_ids = jax.block_until_ready(fwd(img, wslab, bslab))
    assert token_ids.shape == (B, LIMIT) and token_ids.dtype == jnp.int32
    assert bool(jnp.all((token_ids >= 0) & (token_ids < VOCAB)))

    # "caption" string for the first image (host-side detokenization, glue only)
    caption = " ".join(f"tok{int(t)}" for t in token_ids[0])
    _ = caption
    print("KERNEL_OK")
</pallas_src>

<mosaic_0001>
module attributes {stable_mosaic.version = 11 : i64} {
  func.func @caption_kernel(%arg0: memref<512x32xbf16, #tpu.memory_space<vmem>>, %arg1: memref<416x128xbf16, #tpu.memory_space<vmem>>, %arg2: memref<8x128xf32, #tpu.memory_space<vmem>>, %arg3: memref<2x20xi32, #tpu.memory_space<vmem>>) attributes {dimension_semantics = [], scalar_prefetch = 0 : i64, scratch_operands = 0 : i64, tpu.core_type = #tpu.core_type<tc>} {
    %c0 = arith.constant 0 : index
    %c0_0 = arith.constant 0 : index
    %0 = vector.load %arg0[%c0, %c0_0] : memref<512x32xbf16, #tpu.memory_space<vmem>>, vector<512x32xbf16>
    %c0_1 = arith.constant 0 : index
    %c0_2 = arith.constant 0 : index
    %1 = vector.load %arg1[%c0_1, %c0_2] : memref<416x128xbf16, #tpu.memory_space<vmem>>, vector<32x128xbf16>
    %cst = arith.constant dense<0.000000e+00> : vector<512x128xf32>
    %2 = tpu.matmul %0, %1, %cst {dimension_numbers = #tpu.dot_dimension_numbers<[1], [0], [0], [1], [0, 0, 1, 1], [], []>} : vector<512x32xbf16>, vector<32x128xbf16>, vector<512x128xf32> -> vector<512x128xf32>
    %cst_3 = arith.constant 0.000000e+00 : f32
    %3 = vector.broadcast %cst_3 : f32 to vector<512x128xf32>
    %4 = arith.maximumf %2, %3 : vector<512x128xf32>
    %5 = vector.extract_strided_slice %4 {offsets = [0, 0], sizes = [256, 128], strides = [1, 1]} : vector<512x128xf32> to vector<256x128xf32>
    %cst_4 = arith.constant dense<0.000000e+00> : vector<128xf32>
    %6 = vector.multi_reduction <add>, %5, %cst_4 [0] : vector<256x128xf32> to vector<128xf32>
    %7 = vector.shape_cast %6 : vector<128xf32> to vector<1x128xf32>
    %cst_5 = arith.constant 2.560000e+02 : f32
    %8 = vector.broadcast %cst_5 : f32 to vector<1x128xf32>
    %9 = arith.divf %7, %8 : vector<1x128xf32>
    %10 = vector.extract_strided_slice %4 {offsets = [256, 0], sizes = [256, 128], strides = [1, 1]} : vector<512x128xf32> to vector<256x128xf32>
    %cst_6 = arith.constant dense<0.000000e+00> : vector<128xf32>
    %11 = vector.multi_reduction <add>, %10, %cst_6 [0] : vector<256x128xf32> to vector<128xf32>
    %12 = vector.shape_cast %11 : vector<128xf32> to vector<1x128xf32>
    %cst_7 = arith.constant 2.560000e+02 : f32
    %13 = vector.broadcast %cst_7 : f32 to vector<1x128xf32>
    %14 = arith.divf %12, %13 : vector<1x128xf32>
    %15 = tpu.concatenate %9, %14 in 0 : vector<1x128xf32>, vector<1x128xf32> -> vector<2x128xf32>
    %16 = arith.truncf %15 : vector<2x128xf32> to vector<2x128xbf16>
    %c32 = arith.constant 32 : index
    %c0_8 = arith.constant 0 : index
    %17 = vector.load %arg1[%c32, %c0_8] : memref<416x128xbf16, #tpu.memory_space<vmem>>, vector<128x128xbf16>
    %cst_9 = arith.constant dense<0.000000e+00> : vector<2x128xf32>
    %18 = tpu.matmul %16, %17, %cst_9 {dimension_numbers = #tpu.dot_dimension_numbers<[1], [0], [0], [1], [0, 0, 1, 1], [], []>} : vector<2x128xbf16>, vector<128x128xbf16>, vector<2x128xf32> -> vector<2x128xf32>
    %c0_10 = arith.constant 0 : index
    %c0_11 = arith.constant 0 : index
    %19 = vector.load %arg2[%c0_10, %c0_11] : memref<8x128xf32, #tpu.memory_space<vmem>>, vector<1x128xf32>
    %20 = vector.broadcast %19 : vector<1x128xf32> to vector<2x128xf32>
    %21 = arith.addf %18, %20 : vector<2x128xf32>
    %22 = math.tanh %21 : vector<2x128xf32>
    %c160 = arith.constant 160 : index
    %c0_12 = arith.constant 0 : index
    %23 = vector.load %arg1[%c160, %c0_12] : memref<416x128xbf16, #tpu.memory_space<vmem>>, vector<128x128xbf16>
    %c288 = arith.constant 288 : index
    %c0_13 = arith.constant 0 : index
    %24 = vector.load %arg1[%c288, %c0_13] : memref<416x128xbf16, #tpu.memory_space<vmem>>, vector<128x128xbf16>
    %c1 = arith.constant 1 : index
    %c0_14 = arith.constant 0 : index
    %25 = vector.load %arg2[%c1, %c0_14] : memref<8x128xf32, #tpu.memory_space<vmem>>, vector<1x128xf32>
    %26 = tpu.iota {dimensions = array<i32: 1>} : vector<2x128xi32>
    %c64_i32 = arith.constant 64 : i32
    %27 = vector.broadcast %c64_i32 : i32 to vector<2x128xi32>
    %28 = arith.cmpi sge, %26, %27 : vector<2x128xi32>
    %c127_i32 = arith.constant 127 : i32
    %29 = vector.broadcast %c127_i32 : i32 to vector<2x128xi32>
    %30 = arith.subi %29, %26 : vector<2x128xi32>
    %31 = tpu.iota {dimensions = array<i32: 1>} : vector<2x20xi32>
    %c0_i32 = arith.constant 0 : i32
    %32 = vector.broadcast %c0_i32 : i32 to vector<2x20xi32>
    %33 = arith.truncf %22 : vector<2x128xf32> to vector<2x128xbf16>
    %cst_15 = arith.constant dense<0.000000e+00> : vector<2x128xf32>
    %34 = tpu.matmul %33, %24, %cst_15 {dimension_numbers = #tpu.dot_dimension_numbers<[1], [0], [0], [1], [0, 0, 1, 1], [], []>} : vector<2x128xbf16>, vector<128x128xbf16>, vector<2x128xf32> -> vector<2x128xf32>
    %35 = vector.broadcast %25 : vector<1x128xf32> to vector<2x128xf32>
    %36 = arith.addf %34, %35 : vector<2x128xf32>
    %37 = tpu.bitcast %36 : vector<2x128xf32> -> vector<2x128xi32>
    %c0_i32_16 = arith.constant 0 : i32
    %38 = vector.broadcast %c0_i32_16 : i32 to vector<2x128xi32>
    %39 = arith.cmpi slt, %37, %38 : vector<2x128xi32>
    %c2147483647_i32 = arith.constant 2147483647 : i32
    %40 = vector.broadcast %c2147483647_i32 : i32 to vector<2x128xi32>
    %41 = arith.xori %37, %40 : vector<2x128xi32>
    %42 = arith.select %39, %41, %37 : vector<2x128xi1>, vector<2x128xi32>
    %c-256_i32 = arith.constant -256 : i32
    %43 = vector.broadcast %c-256_i32 : i32 to vector<2x128xi32>
    %44 = arith.andi %42, %43 : vector<2x128xi32>
    %45 = arith.ori %44, %30 : vector<2x128xi32>
    %c-2147483648_i32 = arith.constant -2147483648 : i32
    %46 = vector.broadcast %c-2147483648_i32 : i32 to vector<2x128xi32>
    %47 = arith.select %28, %45, %46 : vector<2x128xi1>, vector<2x128xi32>
    %cst_17 = arith.constant dense<-2147483648> : vector<2xi32>
    %48 = vector.multi_reduction <maxsi>, %47, %cst_17 [1] : vector<2x128xi32> to vector<2xi32>
    %49 = vector.shape_cast %48 : vector<2xi32> to vector<2x1xi32>
    %c255_i32 = arith.constant 255 : i32
    %50 = vector.broadcast %c255_i32 : i32 to vector<2x1xi32>
    %51 = arith.andi %49, %50 : vector<2x1xi32>
    %c63_i32 = arith.constant 63 : i32
    %52 = vector.broadcast %c63_i32 : i32 to vector<2x1xi32>
    %53 = arith.subi %52, %51 : vector<2x1xi32>
    %c0_i32_18 = arith.constant 0 : i32
    %54 = vector.broadcast %c0_i32_18 : i32 to vector<2x20xi32>
    %55 = arith.cmpi eq, %31, %54 : vector<2x20xi32>
    %56 = vector.shape_cast %53 : vector<2x1xi32> to vector<2x1xi32>
    %57 = vector.broadcast %56 : vector<2x1xi32> to vector<2x20xi32>
    %58 = arith.select %55, %57, %32 : vector<2x20xi1>, vector<2x20xi32>
    %59 = vector.broadcast %53 : vector<2x1xi32> to vector<2x128xi32>
    %60 = arith.cmpi eq, %26, %59 : vector<2x128xi32>
    %61 = arith.extui %60 : vector<2x128xi1> to vector<2x128xi32>
    %62 = arith.sitofp %61 : vector<2x128xi32> to vector<2x128xf32>
    %63 = arith.truncf %62 : vector<2x128xf32> to vector<2x128xbf16>
    %cst_19 = arith.constant dense<0.000000e+00> : vector<2x128xf32>
    %64 = tpu.matmul %63, %23, %cst_19 {dimension_numbers = #tpu.dot_dimension_numbers<[1], [0], [0], [1], [0, 0, 1, 1], [], []>} : vector<2x128xbf16>, vector<128x128xbf16>, vector<2x128xf32> -> vector<2x128xf32>
    %65 = arith.addf %64, %36 : vector<2x128xf32>
    %66 = math.tanh %65 : vector<2x128xf32>
    %67 = arith.truncf %66 : vector<2x128xf32> to vector<2x128xbf16>
    %cst_20 = arith.constant dense<0.000000e+00> : vector<2x128xf32>
    %68 = tpu.matmul %67, %24, %cst_20 {dimension_numbers = #tpu.dot_dimension_numbers<[1], [0], [0], [1], [0, 0, 1, 1], [], []>} : vector<2x128xbf16>, vector<128x128xbf16>, vector<2x128xf32> -> vector<2x128xf32>
    %69 = vector.broadcast %25 : vector<1x128xf32> to vector<2x128xf32>
    %70 = arith.addf %68, %69 : vector<2x128xf32>
    %71 = tpu.bitcast %70 : vector<2x128xf32> -> vector<2x128xi32>
    %c0_i32_21 = arith.constant 0 : i32
    %72 = vector.broadcast %c0_i32_21 : i32 to vector<2x128xi32>
    %73 = arith.cmpi slt, %71, %72 : vector<2x128xi32>
    %c2147483647_i32_22 = arith.constant 2147483647 : i32
    %74 = vector.broadcast %c2147483647_i32_22 : i32 to vector<2x128xi32>
    %75 = arith.xori %71, %74 : vector<2x128xi32>
    %76 = arith.select %73, %75, %71 : vector<2x128xi1>, vector<2x128xi32>
    %c-256_i32_23 = arith.constant -256 : i32
    %77 = vector.broadcast %c-256_i32_23 : i32 to vector<2x128xi32>
    %78 = arith.andi %76, %77 : vector<2x128xi32>
    %79 = arith.ori %78, %30 : vector<2x128xi32>
    %c-2147483648_i32_24 = arith.constant -2147483648 : i32
    %80 = vector.broadcast %c-2147483648_i32_24 : i32 to vector<2x128xi32>
    %81 = arith.select %28, %79, %80 : vector<2x128xi1>, vector<2x128xi32>
    %cst_25 = arith.constant dense<-2147483648> : vector<2xi32>
    %82 = vector.multi_reduction <maxsi>, %81, %cst_25 [1] : vector<2x128xi32> to vector<2xi32>
    %83 = vector.shape_cast %82 : vector<2xi32> to vector<2x1xi32>
    %c255_i32_26 = arith.constant 255 : i32
    %84 = vector.broadcast %c255_i32_26 : i32 to vector<2x1xi32>
    %85 = arith.andi %83, %84 : vector<2x1xi32>
    %c63_i32_27 = arith.constant 63 : i32
    %86 = vector.broadcast %c63_i32_27 : i32 to vector<2x1xi32>
    %87 = arith.subi %86, %85 : vector<2x1xi32>
    %c1_i32 = arith.constant 1 : i32
    %88 = vector.broadcast %c1_i32 : i32 to vector<2x20xi32>
    %89 = arith.cmpi eq, %31, %88 : vector<2x20xi32>
    %90 = vector.shape_cast %87 : vector<2x1xi32> to vector<2x1xi32>
    %91 = vector.broadcast %90 : vector<2x1xi32> to vector<2x20xi32>
    %92 = arith.select %89, %91, %58 : vector<2x20xi1>, vector<2x20xi32>
    %93 = vector.broadcast %87 : vector<2x1xi32> to vector<2x128xi32>
    %94 = arith.cmpi eq, %26, %93 : vector<2x128xi32>
    %95 = arith.extui %94 : vector<2x128xi1> to vector<2x128xi32>
    %96 = arith.sitofp %95 : vector<2x128xi32> to vector<2x128xf32>
    %97 = arith.truncf %96 : vector<2x128xf32> to vector<2x128xbf16>
    %cst_28 = arith.constant dense<0.000000e+00> : vector<2x128xf32>
    %98 = tpu.matmul %97, %23, %cst_28 {dimension_numbers = #tpu.dot_dimension_numbers<[1], [0], [0], [1], [0, 0, 1, 1], [], []>} : vector<2x128xbf16>, vector<128x128xbf16>, vector<2x128xf32> -> vector<2x128xf32>
    %99 = arith.addf %98, %70 : vector<2x128xf32>
    %100 = math.tanh %99 : vector<2x128xf32>
    %101 = arith.truncf %100 : vector<2x128xf32> to vector<2x128xbf16>
    %cst_29 = arith.constant dense<0.000000e+00> : vector<2x128xf32>
    %102 = tpu.matmul %101, %24, %cst_29 {dimension_numbers = #tpu.dot_dimension_numbers<[1], [0], [0], [1], [0, 0, 1, 1], [], []>} : vector<2x128xbf16>, vector<128x128xbf16>, vector<2x128xf32> -> vector<2x128xf32>
    %103 = vector.broadcast %25 : vector<1x128xf32> to vector<2x128xf32>
    %104 = arith.addf %102, %103 : vector<2x128xf32>
    %105 = tpu.bitcast %104 : vector<2x128xf32> -> vector<2x128xi32>
    %c0_i32_30 = arith.constant 0 : i32
    %106 = vector.broadcast %c0_i32_30 : i32 to vector<2x128xi32>
    %107 = arith.cmpi slt, %105, %106 : vector<2x128xi32>
    %c2147483647_i32_31 = arith.constant 2147483647 : i32
    %108 = vector.broadcast %c2147483647_i32_31 : i32 to vector<2x128xi32>
    %109 = arith.xori %105, %108 : vector<2x128xi32>
    %110 = arith.select %107, %109, %105 : vector<2x128xi1>, vector<2x128xi32>
    %c-256_i32_32 = arith.constant -256 : i32
    %111 = vector.broadcast %c-256_i32_32 : i32 to vector<2x128xi32>
    %112 = arith.andi %110, %111 : vector<2x128xi32>
    %113 = arith.ori %112, %30 : vector<2x128xi32>
    %c-2147483648_i32_33 = arith.constant -2147483648 : i32
    %114 = vector.broadcast %c-2147483648_i32_33 : i32 to vector<2x128xi32>
    %115 = arith.select %28, %113, %114 : vector<2x128xi1>, vector<2x128xi32>
    %cst_34 = arith.constant dense<-2147483648> : vector<2xi32>
    %116 = vector.multi_reduction <maxsi>, %115, %cst_34 [1] : vector<2x128xi32> to vector<2xi32>
    %117 = vector.shape_cast %116 : vector<2xi32> to vector<2x1xi32>
    %c255_i32_35 = arith.constant 255 : i32
    %118 = vector.broadcast %c255_i32_35 : i32 to vector<2x1xi32>
    %119 = arith.andi %117, %118 : vector<2x1xi32>
    %c63_i32_36 = arith.constant 63 : i32
    %120 = vector.broadcast %c63_i32_36 : i32 to vector<2x1xi32>
    %121 = arith.subi %120, %119 : vector<2x1xi32>
    %c2_i32 = arith.constant 2 : i32
    %122 = vector.broadcast %c2_i32 : i32 to vector<2x20xi32>
    %123 = arith.cmpi eq, %31, %122 : vector<2x20xi32>
    %124 = vector.shape_cast %121 : vector<2x1xi32> to vector<2x1xi32>
    %125 = vector.broadcast %124 : vector<2x1xi32> to vector<2x20xi32>
    %126 = arith.select %123, %125, %92 : vector<2x20xi1>, vector<2x20xi32>
    %127 = vector.broadcast %121 : vector<2x1xi32> to vector<2x128xi32>
    %128 = arith.cmpi eq, %26, %127 : vector<2x128xi32>
    %129 = arith.extui %128 : vector<2x128xi1> to vector<2x128xi32>
    %130 = arith.sitofp %129 : vector<2x128xi32> to vector<2x128xf32>
    %131 = arith.truncf %130 : vector<2x128xf32> to vector<2x128xbf16>
    %cst_37 = arith.constant dense<0.000000e+00> : vector<2x128xf32>
    %132 = tpu.matmul %131, %23, %cst_37 {dimension_numbers = #tpu.dot_dimension_numbers<[1], [0], [0], [1], [0, 0, 1, 1], [], []>} : vector<2x128xbf16>, vector<128x128xbf16>, vector<2x128xf32> -> vector<2x128xf32>
    %133 = arith.addf %132, %104 : vector<2x128xf32>
    %134 = math.tanh %133 : vector<2x128xf32>
    %135 = arith.truncf %134 : vector<2x128xf32> to vector<2x128xbf16>
    %cst_38 = arith.constant dense<0.000000e+00> : vector<2x128xf32>
    %136 = tpu.matmul %135, %24, %cst_38 {dimension_numbers = #tpu.dot_dimension_numbers<[1], [0], [0], [1], [0, 0, 1, 1], [], []>} : vector<2x128xbf16>, vector<128x128xbf16>, vector<2x128xf32> -> vector<2x128xf32>
    %137 = vector.broadcast %25 : vector<1x128xf32> to vector<2x128xf32>
    %138 = arith.addf %136, %137 : vector<2x128xf32>
    %139 = tpu.bitcast %138 : vector<2x128xf32> -> vector<2x128xi32>
    %c0_i32_39 = arith.constant 0 : i32
    %140 = vector.broadcast %c0_i32_39 : i32 to vector<2x128xi32>
    %141 = arith.cmpi slt, %139, %140 : vector<2x128xi32>
    %c2147483647_i32_40 = arith.constant 2147483647 : i32
    %142 = vector.broadcast %c2147483647_i32_40 : i32 to vector<2x128xi32>
    %143 = arith.xori %139, %142 : vector<2x128xi32>
    %144 = arith.select %141, %143, %139 : vector<2x128xi1>, vector<2x128xi32>
    %c-256_i32_41 = arith.constant -256 : i32
    %145 = vector.broadcast %c-256_i32_41 : i32 to vector<2x128xi32>
    %146 = arith.andi %144, %145 : vector<2x128xi32>
    %147 = arith.ori %146, %30 : vector<2x128xi32>
    %c-2147483648_i32_42 = arith.constant -2147483648 : i32
    %148 = vector.broadcast %c-2147483648_i32_42 : i32 to vector<2x128xi32>
    %149 = arith.select %28, %147, %148 : vector<2x128xi1>, vector<2x128xi32>
    %cst_43 = arith.constant dense<-2147483648> : vector<2xi32>
    %150 = vector.multi_reduction <maxsi>, %149, %cst_43 [1] : vector<2x128xi32> to vector<2xi32>
    %151 = vector.shape_cast %150 : vector<2xi32> to vector<2x1xi32>
    %c255_i32_44 = arith.constant 255 : i32
    %152 = vector.broadcast %c255_i32_44 : i32 to vector<2x1xi32>
    %153 = arith.andi %151, %152 : vector<2x1xi32>
    %c63_i32_45 = arith.constant 63 : i32
    %154 = vector.broadcast %c63_i32_45 : i32 to vector<2x1xi32>
    %155 = arith.subi %154, %153 : vector<2x1xi32>
    %c3_i32 = arith.constant 3 : i32
    %156 = vector.broadcast %c3_i32 : i32 to vector<2x20xi32>
    %157 = arith.cmpi eq, %31, %156 : vector<2x20xi32>
    %158 = vector.shape_cast %155 : vector<2x1xi32> to vector<2x1xi32>
    %159 = vector.broadcast %158 : vector<2x1xi32> to vector<2x20xi32>
    %160 = arith.select %157, %159, %126 : vector<2x20xi1>, vector<2x20xi32>
    %161 = vector.broadcast %155 : vector<2x1xi32> to vector<2x128xi32>
    %162 = arith.cmpi eq, %26, %161 : vector<2x128xi32>
    %163 = arith.extui %162 : vector<2x128xi1> to vector<2x128xi32>
    %164 = arith.sitofp %163 : vector<2x128xi32> to vector<2x128xf32>
    %165 = arith.truncf %164 : vector<2x128xf32> to vector<2x128xbf16>
    %cst_46 = arith.constant dense<0.000000e+00> : vector<2x128xf32>
    %166 = tpu.matmul %165, %23, %cst_46 {dimension_numbers = #tpu.dot_dimension_numbers<[1], [0], [0], [1], [0, 0, 1, 1], [], []>} : vector<2x128xbf16>, vector<128x128xbf16>, vector<2x128xf32> -> vector<2x128xf32>
    %167 = arith.addf %166, %138 : vector<2x128xf32>
    %168 = math.tanh %167 : vector<2x128xf32>
    %169 = arith.truncf %168 : vector<2x128xf32> to vector<2x128xbf16>
    %cst_47 = arith.constant dense<0.000000e+00> : vector<2x128xf32>
    %170 = tpu.matmul %169, %24, %cst_47 {dimension_numbers = #tpu.dot_dimension_numbers<[1], [0], [0], [1], [0, 0, 1, 1], [], []>} : vector<2x128xbf16>, vector<128x128xbf16>, vector<2x128xf32> -> vector<2x128xf32>
    %171 = vector.broadcast %25 : vector<1x128xf32> to vector<2x128xf32>
    %172 = arith.addf %170, %171 : vector<2x128xf32>
    %173 = tpu.bitcast %172 : vector<2x128xf32> -> vector<2x128xi32>
    %c0_i32_48 = arith.constant 0 : i32
    %174 = vector.broadcast %c0_i32_48 : i32 to vector<2x128xi32>
    %175 = arith.cmpi slt, %173, %174 : vector<2x128xi32>
    %c2147483647_i32_49 = arith.constant 2147483647 : i32
    %176 = vector.broadcast %c2147483647_i32_49 : i32 to vector<2x128xi32>
    %177 = arith.xori %173, %176 : vector<2x128xi32>
    %178 = arith.select %175, %177, %173 : vector<2x128xi1>, vector<2x128xi32>
    %c-256_i32_50 = arith.constant -256 : i32
    %179 = vector.broadcast %c-256_i32_50 : i32 to vector<2x128xi32>
    %180 = arith.andi %178, %179 : vector<2x128xi32>
    %181 = arith.ori %180, %30 : vector<2x128xi32>
    %c-2147483648_i32_51 = arith.constant -2147483648 : i32
    %182 = vector.broadcast %c-2147483648_i32_51 : i32 to vector<2x128xi32>
    %183 = arith.select %28, %181, %182 : vector<2x128xi1>, vector<2x128xi32>
    %cst_52 = arith.constant dense<-2147483648> : vector<2xi32>
    %184 = vector.multi_reduction <maxsi>, %183, %cst_52 [1] : vector<2x128xi32> to vector<2xi32>
    %185 = vector.shape_cast %184 : vector<2xi32> to vector<2x1xi32>
    %c255_i32_53 = arith.constant 255 : i32
    %186 = vector.broadcast %c255_i32_53 : i32 to vector<2x1xi32>
    %187 = arith.andi %185, %186 : vector<2x1xi32>
    %c63_i32_54 = arith.constant 63 : i32
    %188 = vector.broadcast %c63_i32_54 : i32 to vector<2x1xi32>
    %189 = arith.subi %188, %187 : vector<2x1xi32>
    %c4_i32 = arith.constant 4 : i32
    %190 = vector.broadcast %c4_i32 : i32 to vector<2x20xi32>
    %191 = arith.cmpi eq, %31, %190 : vector<2x20xi32>
    %192 = vector.shape_cast %189 : vector<2x1xi32> to vector<2x1xi32>
    %193 = vector.broadcast %192 : vector<2x1xi32> to vector<2x20xi32>
    %194 = arith.select %191, %193, %160 : vector<2x20xi1>, vector<2x20xi32>
    %195 = vector.broadcast %189 : vector<2x1xi32> to vector<2x128xi32>
    %196 = arith.cmpi eq, %26, %195 : vector<2x128xi32>
    %197 = arith.extui %196 : vector<2x128xi1> to vector<2x128xi32>
    %198 = arith.sitofp %197 : vector<2x128xi32> to vector<2x128xf32>
    %199 = arith.truncf %198 : vector<2x128xf32> to vector<2x128xbf16>
    %cst_55 = arith.constant dense<0.000000e+00> : vector<2x128xf32>
    %200 = tpu.matmul %199, %23, %cst_55 {dimension_numbers = #tpu.dot_dimension_numbers<[1], [0], [0], [1], [0, 0, 1, 1], [], []>} : vector<2x128xbf16>, vector<128x128xbf16>, vector<2x128xf32> -> vector<2x128xf32>
    %201 = arith.addf %200, %172 : vector<2x128xf32>
    %202 = math.tanh %201 : vector<2x128xf32>
    %203 = arith.truncf %202 : vector<2x128xf32> to vector<2x128xbf16>
    %cst_56 = arith.constant dense<0.000000e+00> : vector<2x128xf32>
    %204 = tpu.matmul %203, %24, %cst_56 {dimension_numbers = #tpu.dot_dimension_numbers<[1], [0], [0], [1], [0, 0, 1, 1], [], []>} : vector<2x128xbf16>, vector<128x128xbf16>, vector<2x128xf32> -> vector<2x128xf32>
    %205 = vector.broadcast %25 : vector<1x128xf32> to vector<2x128xf32>
    %206 = arith.addf %204, %205 : vector<2x128xf32>
    %207 = tpu.bitcast %206 : vector<2x128xf32> -> vector<2x128xi32>
    %c0_i32_57 = arith.constant 0 : i32
    %208 = vector.broadcast %c0_i32_57 : i32 to vector<2x128xi32>
    %209 = arith.cmpi slt, %207, %208 : vector<2x128xi32>
    %c2147483647_i32_58 = arith.constant 2147483647 : i32
    %210 = vector.broadcast %c2147483647_i32_58 : i32 to vector<2x128xi32>
    %211 = arith.xori %207, %210 : vector<2x128xi32>
    %212 = arith.select %209, %211, %207 : vector<2x128xi1>, vector<2x128xi32>
    %c-256_i32_59 = arith.constant -256 : i32
    %213 = vector.broadcast %c-256_i32_59 : i32 to vector<2x128xi32>
    %214 = arith.andi %212, %213 : vector<2x128xi32>
    %215 = arith.ori %214, %30 : vector<2x128xi32>
    %c-2147483648_i32_60 = arith.constant -2147483648 : i32
    %216 = vector.broadcast %c-2147483648_i32_60 : i32 to vector<2x128xi32>
    %217 = arith.select %28, %215, %216 : vector<2x128xi1>, vector<2x128xi32>
    %cst_61 = arith.constant dense<-2147483648> : vector<2xi32>
    %218 = vector.multi_reduction <maxsi>, %217, %cst_61 [1] : vector<2x128xi32> to vector<2xi32>
    %219 = vector.shape_cast %218 : vector<2xi32> to vector<2x1xi32>
    %c255_i32_62 = arith.constant 255 : i32
    %220 = vector.broadcast %c255_i32_62 : i32 to vector<2x1xi32>
    %221 = arith.andi %219, %220 : vector<2x1xi32>
    %c63_i32_63 = arith.constant 63 : i32
    %222 = vector.broadcast %c63_i32_63 : i32 to vector<2x1xi32>
    %223 = arith.subi %222, %221 : vector<2x1xi32>
    %c5_i32 = arith.constant 5 : i32
    %224 = vector.broadcast %c5_i32 : i32 to vector<2x20xi32>
    %225 = arith.cmpi eq, %31, %224 : vector<2x20xi32>
    %226 = vector.shape_cast %223 : vector<2x1xi32> to vector<2x1xi32>
    %227 = vector.broadcast %226 : vector<2x1xi32> to vector<2x20xi32>
    %228 = arith.select %225, %227, %194 : vector<2x20xi1>, vector<2x20xi32>
    %229 = vector.broadcast %223 : vector<2x1xi32> to vector<2x128xi32>
    %230 = arith.cmpi eq, %26, %229 : vector<2x128xi32>
    %231 = arith.extui %230 : vector<2x128xi1> to vector<2x128xi32>
    %232 = arith.sitofp %231 : vector<2x128xi32> to vector<2x128xf32>
    %233 = arith.truncf %232 : vector<2x128xf32> to vector<2x128xbf16>
    %cst_64 = arith.constant dense<0.000000e+00> : vector<2x128xf32>
    %234 = tpu.matmul %233, %23, %cst_64 {dimension_numbers = #tpu.dot_dimension_numbers<[1], [0], [0], [1], [0, 0, 1, 1], [], []>} : vector<2x128xbf16>, vector<128x128xbf16>, vector<2x128xf32> -> vector<2x128xf32>
    %235 = arith.addf %234, %206 : vector<2x128xf32>
    %236 = math.tanh %235 : vector<2x128xf32>
    %237 = arith.truncf %236 : vector<2x128xf32> to vector<2x128xbf16>
    %cst_65 = arith.constant dense<0.000000e+00> : vector<2x128xf32>
    %238 = tpu.matmul %237, %24, %cst_65 {dimension_numbers = #tpu.dot_dimension_numbers<[1], [0], [0], [1], [0, 0, 1, 1], [], []>} : vector<2x128xbf16>, vector<128x128xbf16>, vector<2x128xf32> -> vector<2x128xf32>
    %239 = vector.broadcast %25 : vector<1x128xf32> to vector<2x128xf32>
    %240 = arith.addf %238, %239 : vector<2x128xf32>
    %241 = tpu.bitcast %240 : vector<2x128xf32> -> vector<2x128xi32>
    %c0_i32_66 = arith.constant 0 : i32
    %242 = vector.broadcast %c0_i32_66 : i32 to vector<2x128xi32>
    %243 = arith.cmpi slt, %241, %242 : vector<2x128xi32>
    %c2147483647_i32_67 = arith.constant 2147483647 : i32
    %244 = vector.broadcast %c2147483647_i32_67 : i32 to vector<2x128xi32>
    %245 = arith.xori %241, %244 : vector<2x128xi32>
    %246 = arith.select %243, %245, %241 : vector<2x128xi1>, vector<2x128xi32>
    %c-256_i32_68 = arith.constant -256 : i32
    %247 = vector.broadcast %c-256_i32_68 : i32 to vector<2x128xi32>
    %248 = arith.andi %246, %247 : vector<2x128xi32>
    %249 = arith.ori %248, %30 : vector<2x128xi32>
    %c-2147483648_i32_69 = arith.constant -2147483648 : i32
    %250 = vector.broadcast %c-2147483648_i32_69 : i32 to vector<2x128xi32>
    %251 = arith.select %28, %249, %250 : vector<2x128xi1>, vector<2x128xi32>
    %cst_70 = arith.constant dense<-2147483648> : vector<2xi32>
    %252 = vector.multi_reduction <maxsi>, %251, %cst_70 [1] : vector<2x128xi32> to vector<2xi32>
    %253 = vector.shape_cast %252 : vector<2xi32> to vector<2x1xi32>
    %c255_i32_71 = arith.constant 255 : i32
    %254 = vector.broadcast %c255_i32_71 : i32 to vector<2x1xi32>
    %255 = arith.andi %253, %254 : vector<2x1xi32>
    %c63_i32_72 = arith.constant 63 : i32
    %256 = vector.broadcast %c63_i32_72 : i32 to vector<2x1xi32>
    %257 = arith.subi %256, %255 : vector<2x1xi32>
    %c6_i32 = arith.constant 6 : i32
    %258 = vector.broadcast %c6_i32 : i32 to vector<2x20xi32>
    %259 = arith.cmpi eq, %31, %258 : vector<2x20xi32>
    %260 = vector.shape_cast %257 : vector<2x1xi32> to vector<2x1xi32>
    %261 = vector.broadcast %260 : vector<2x1xi32> to vector<2x20xi32>
    %262 = arith.select %259, %261, %228 : vector<2x20xi1>, vector<2x20xi32>
    %263 = vector.broadcast %257 : vector<2x1xi32> to vector<2x128xi32>
    %264 = arith.cmpi eq, %26, %263 : vector<2x128xi32>
    %265 = arith.extui %264 : vector<2x128xi1> to vector<2x128xi32>
    %266 = arith.sitofp %265 : vector<2x128xi32> to vector<2x128xf32>
    %267 = arith.truncf %266 : vector<2x128xf32> to vector<2x128xbf16>
    %cst_73 = arith.constant dense<0.000000e+00> : vector<2x128xf32>
    %268 = tpu.matmul %267, %23, %cst_73 {dimension_numbers = #tpu.dot_dimension_numbers<[1], [0], [0], [1], [0, 0, 1, 1], [], []>} : vector<2x128xbf16>, vector<128x128xbf16>, vector<2x128xf32> -> vector<2x128xf32>
    %269 = arith.addf %268, %240 : vector<2x128xf32>
    %270 = math.tanh %269 : vector<2x128xf32>
    %271 = arith.truncf %270 : vector<2x128xf32> to vector<2x128xbf16>
    %cst_74 = arith.constant dense<0.000000e+00> : vector<2x128xf32>
    %272 = tpu.matmul %271, %24, %cst_74 {dimension_numbers = #tpu.dot_dimension_numbers<[1], [0], [0], [1], [0, 0, 1, 1], [], []>} : vector<2x128xbf16>, vector<128x128xbf16>, vector<2x128xf32> -> vector<2x128xf32>
    %273 = vector.broadcast %25 : vector<1x128xf32> to vector<2x128xf32>
    %274 = arith.addf %272, %273 : vector<2x128xf32>
    %275 = tpu.bitcast %274 : vector<2x128xf32> -> vector<2x128xi32>
    %c0_i32_75 = arith.constant 0 : i32
    %276 = vector.broadcast %c0_i32_75 : i32 to vector<2x128xi32>
    %277 = arith.cmpi slt, %275, %276 : vector<2x128xi32>
    %c2147483647_i32_76 = arith.constant 2147483647 : i32
    %278 = vector.broadcast %c2147483647_i32_76 : i32 to vector<2x128xi32>
    %279 = arith.xori %275, %278 : vector<2x128xi32>
    %280 = arith.select %277, %279, %275 : vector<2x128xi1>, vector<2x128xi32>
    %c-256_i32_77 = arith.constant -256 : i32
    %281 = vector.broadcast %c-256_i32_77 : i32 to vector<2x128xi32>
    %282 = arith.andi %280, %281 : vector<2x128xi32>
    %283 = arith.ori %282, %30 : vector<2x128xi32>
    %c-2147483648_i32_78 = arith.constant -2147483648 : i32
    %284 = vector.broadcast %c-2147483648_i32_78 : i32 to vector<2x128xi32>
    %285 = arith.select %28, %283, %284 : vector<2x128xi1>, vector<2x128xi32>
    %cst_79 = arith.constant dense<-2147483648> : vector<2xi32>
    %286 = vector.multi_reduction <maxsi>, %285, %cst_79 [1] : vector<2x128xi32> to vector<2xi32>
    %287 = vector.shape_cast %286 : vector<2xi32> to vector<2x1xi32>
    %c255_i32_80 = arith.constant 255 : i32
    %288 = vector.broadcast %c255_i32_80 : i32 to vector<2x1xi32>
    %289 = arith.andi %287, %288 : vector<2x1xi32>
    %c63_i32_81 = arith.constant 63 : i32
    %290 = vector.broadcast %c63_i32_81 : i32 to vector<2x1xi32>
    %291 = arith.subi %290, %289 : vector<2x1xi32>
    %c7_i32 = arith.constant 7 : i32
    %292 = vector.broadcast %c7_i32 : i32 to vector<2x20xi32>
    %293 = arith.cmpi eq, %31, %292 : vector<2x20xi32>
    %294 = vector.shape_cast %291 : vector<2x1xi32> to vector<2x1xi32>
    %295 = vector.broadcast %294 : vector<2x1xi32> to vector<2x20xi32>
    %296 = arith.select %293, %295, %262 : vector<2x20xi1>, vector<2x20xi32>
    %297 = vector.broadcast %291 : vector<2x1xi32> to vector<2x128xi32>
    %298 = arith.cmpi eq, %26, %297 : vector<2x128xi32>
    %299 = arith.extui %298 : vector<2x128xi1> to vector<2x128xi32>
    %300 = arith.sitofp %299 : vector<2x128xi32> to vector<2x128xf32>
    %301 = arith.truncf %300 : vector<2x128xf32> to vector<2x128xbf16>
    %cst_82 = arith.constant dense<0.000000e+00> : vector<2x128xf32>
    %302 = tpu.matmul %301, %23, %cst_82 {dimension_numbers = #tpu.dot_dimension_numbers<[1], [0], [0], [1], [0, 0, 1, 1], [], []>} : vector<2x128xbf16>, vector<128x128xbf16>, vector<2x128xf32> -> vector<2x128xf32>
    %303 = arith.addf %302, %274 : vector<2x128xf32>
    %304 = math.tanh %303 : vector<2x128xf32>
    %305 = arith.truncf %304 : vector<2x128xf32> to vector<2x128xbf16>
    %cst_83 = arith.constant dense<0.000000e+00> : vector<2x128xf32>
    %306 = tpu.matmul %305, %24, %cst_83 {dimension_numbers = #tpu.dot_dimension_numbers<[1], [0], [0], [1], [0, 0, 1, 1], [], []>} : vector<2x128xbf16>, vector<128x128xbf16>, vector<2x128xf32> -> vector<2x128xf32>
    %307 = vector.broadcast %25 : vector<1x128xf32> to vector<2x128xf32>
    %308 = arith.addf %306, %307 : vector<2x128xf32>
    %309 = tpu.bitcast %308 : vector<2x128xf32> -> vector<2x128xi32>
    %c0_i32_84 = arith.constant 0 : i32
    %310 = vector.broadcast %c0_i32_84 : i32 to vector<2x128xi32>
    %311 = arith.cmpi slt, %309, %310 : vector<2x128xi32>
    %c2147483647_i32_85 = arith.constant 2147483647 : i32
    %312 = vector.broadcast %c2147483647_i32_85 : i32 to vector<2x128xi32>
    %313 = arith.xori %309, %312 : vector<2x128xi32>
    %314 = arith.select %311, %313, %309 : vector<2x128xi1>, vector<2x128xi32>
    %c-256_i32_86 = arith.constant -256 : i32
    %315 = vector.broadcast %c-256_i32_86 : i32 to vector<2x128xi32>
    %316 = arith.andi %314, %315 : vector<2x128xi32>
    %317 = arith.ori %316, %30 : vector<2x128xi32>
    %c-2147483648_i32_87 = arith.constant -2147483648 : i32
    %318 = vector.broadcast %c-2147483648_i32_87 : i32 to vector<2x128xi32>
    %319 = arith.select %28, %317, %318 : vector<2x128xi1>, vector<2x128xi32>
    %cst_88 = arith.constant dense<-2147483648> : vector<2xi32>
    %320 = vector.multi_reduction <maxsi>, %319, %cst_88 [1] : vector<2x128xi32> to vector<2xi32>
    %321 = vector.shape_cast %320 : vector<2xi32> to vector<2x1xi32>
    %c255_i32_89 = arith.constant 255 : i32
    %322 = vector.broadcast %c255_i32_89 : i32 to vector<2x1xi32>
    %323 = arith.andi %321, %322 : vector<2x1xi32>
    %c63_i32_90 = arith.constant 63 : i32
    %324 = vector.broadcast %c63_i32_90 : i32 to vector<2x1xi32>
    %325 = arith.subi %324, %323 : vector<2x1xi32>
    %c8_i32 = arith.constant 8 : i32
    %326 = vector.broadcast %c8_i32 : i32 to vector<2x20xi32>
    %327 = arith.cmpi eq, %31, %326 : vector<2x20xi32>
    %328 = vector.shape_cast %325 : vector<2x1xi32> to vector<2x1xi32>
    %329 = vector.broadcast %328 : vector<2x1xi32> to vector<2x20xi32>
    %330 = arith.select %327, %329, %296 : vector<2x20xi1>, vector<2x20xi32>
    %331 = vector.broadcast %325 : vector<2x1xi32> to vector<2x128xi32>
    %332 = arith.cmpi eq, %26, %331 : vector<2x128xi32>
    %333 = arith.extui %332 : vector<2x128xi1> to vector<2x128xi32>
    %334 = arith.sitofp %333 : vector<2x128xi32> to vector<2x128xf32>
    %335 = arith.truncf %334 : vector<2x128xf32> to vector<2x128xbf16>
    %cst_91 = arith.constant dense<0.000000e+00> : vector<2x128xf32>
    %336 = tpu.matmul %335, %23, %cst_91 {dimension_numbers = #tpu.dot_dimension_numbers<[1], [0], [0], [1], [0, 0, 1, 1], [], []>} : vector<2x128xbf16>, vector<128x128xbf16>, vector<2x128xf32> -> vector<2x128xf32>
    %337 = arith.addf %336, %308 : vector<2x128xf32>
    %338 = math.tanh %337 : vector<2x128xf32>
    %339 = arith.truncf %338 : vector<2x128xf32> to vector<2x128xbf16>
    %cst_92 = arith.constant dense<0.000000e+00> : vector<2x128xf32>
    %340 = tpu.matmul %339, %24, %cst_92 {dimension_numbers = #tpu.dot_dimension_numbers<[1], [0], [0], [1], [0, 0, 1, 1], [], []>} : vector<2x128xbf16>, vector<128x128xbf16>, vector<2x128xf32> -> vector<2x128xf32>
    %341 = vector.broadcast %25 : vector<1x128xf32> to vector<2x128xf32>
    %342 = arith.addf %340, %341 : vector<2x128xf32>
    %343 = tpu.bitcast %342 : vector<2x128xf32> -> vector<2x128xi32>
    %c0_i32_93 = arith.constant 0 : i32
    %344 = vector.broadcast %c0_i32_93 : i32 to vector<2x128xi32>
    %345 = arith.cmpi slt, %343, %344 : vector<2x128xi32>
    %c2147483647_i32_94 = arith.constant 2147483647 : i32
    %346 = vector.broadcast %c2147483647_i32_94 : i32 to vector<2x128xi32>
    %347 = arith.xori %343, %346 : vector<2x128xi32>
    %348 = arith.select %345, %347, %343 : vector<2x128xi1>, vector<2x128xi32>
    %c-256_i32_95 = arith.constant -256 : i32
    %349 = vector.broadcast %c-256_i32_95 : i32 to vector<2x128xi32>
    %350 = arith.andi %348, %349 : vector<2x128xi32>
    %351 = arith.ori %350, %30 : vector<2x128xi32>
    %c-2147483648_i32_96 = arith.constant -2147483648 : i32
    %352 = vector.broadcast %c-2147483648_i32_96 : i32 to vector<2x128xi32>
    %353 = arith.select %28, %351, %352 : vector<2x128xi1>, vector<2x128xi32>
    %cst_97 = arith.constant dense<-2147483648> : vector<2xi32>
    %354 = vector.multi_reduction <maxsi>, %353, %cst_97 [1] : vector<2x128xi32> to vector<2xi32>
    %355 = vector.shape_cast %354 : vector<2xi32> to vector<2x1xi32>
    %c255_i32_98 = arith.constant 255 : i32
    %356 = vector.broadcast %c255_i32_98 : i32 to vector<2x1xi32>
    %357 = arith.andi %355, %356 : vector<2x1xi32>
    %c63_i32_99 = arith.constant 63 : i32
    %358 = vector.broadcast %c63_i32_99 : i32 to vector<2x1xi32>
    %359 = arith.subi %358, %357 : vector<2x1xi32>
    %c9_i32 = arith.constant 9 : i32
    %360 = vector.broadcast %c9_i32 : i32 to vector<2x20xi32>
    %361 = arith.cmpi eq, %31, %360 : vector<2x20xi32>
    %362 = vector.shape_cast %359 : vector<2x1xi32> to vector<2x1xi32>
    %363 = vector.broadcast %362 : vector<2x1xi32> to vector<2x20xi32>
    %364 = arith.select %361, %363, %330 : vector<2x20xi1>, vector<2x20xi32>
    %365 = vector.broadcast %359 : vector<2x1xi32> to vector<2x128xi32>
    %366 = arith.cmpi eq, %26, %365 : vector<2x128xi32>
    %367 = arith.extui %366 : vector<2x128xi1> to vector<2x128xi32>
    %368 = arith.sitofp %367 : vector<2x128xi32> to vector<2x128xf32>
    %369 = arith.truncf %368 : vector<2x128xf32> to vector<2x128xbf16>
    %cst_100 = arith.constant dense<0.000000e+00> : vector<2x128xf32>
    %370 = tpu.matmul %369, %23, %cst_100 {dimension_numbers = #tpu.dot_dimension_numbers<[1], [0], [0], [1], [0, 0, 1, 1], [], []>} : vector<2x128xbf16>, vector<128x128xbf16>, vector<2x128xf32> -> vector<2x128xf32>
    %371 = arith.addf %370, %342 : vector<2x128xf32>
    %372 = math.tanh %371 : vector<2x128xf32>
    %373 = arith.truncf %372 : vector<2x128xf32> to vector<2x128xbf16>
    %cst_101 = arith.constant dense<0.000000e+00> : vector<2x128xf32>
    %374 = tpu.matmul %373, %24, %cst_101 {dimension_numbers = #tpu.dot_dimension_numbers<[1], [0], [0], [1], [0, 0, 1, 1], [], []>} : vector<2x128xbf16>, vector<128x128xbf16>, vector<2x128xf32> -> vector<2x128xf32>
    %375 = vector.broadcast %25 : vector<1x128xf32> to vector<2x128xf32>
    %376 = arith.addf %374, %375 : vector<2x128xf32>
    %377 = tpu.bitcast %376 : vector<2x128xf32> -> vector<2x128xi32>
    %c0_i32_102 = arith.constant 0 : i32
    %378 = vector.broadcast %c0_i32_102 : i32 to vector<2x128xi32>
    %379 = arith.cmpi slt, %377, %378 : vector<2x128xi32>
    %c2147483647_i32_103 = arith.constant 2147483647 : i32
    %380 = vector.broadcast %c2147483647_i32_103 : i32 to vector<2x128xi32>
    %381 = arith.xori %377, %380 : vector<2x128xi32>
    %382 = arith.select %379, %381, %377 : vector<2x128xi1>, vector<2x128xi32>
    %c-256_i32_104 = arith.constant -256 : i32
    %383 = vector.broadcast %c-256_i32_104 : i32 to vector<2x128xi32>
    %384 = arith.andi %382, %383 : vector<2x128xi32>
    %385 = arith.ori %384, %30 : vector<2x128xi32>
    %c-2147483648_i32_105 = arith.constant -2147483648 : i32
    %386 = vector.broadcast %c-2147483648_i32_105 : i32 to vector<2x128xi32>
    %387 = arith.select %28, %385, %386 : vector<2x128xi1>, vector<2x128xi32>
    %cst_106 = arith.constant dense<-2147483648> : vector<2xi32>
    %388 = vector.multi_reduction <maxsi>, %387, %cst_106 [1] : vector<2x128xi32> to vector<2xi32>
    %389 = vector.shape_cast %388 : vector<2xi32> to vector<2x1xi32>
    %c255_i32_107 = arith.constant 255 : i32
    %390 = vector.broadcast %c255_i32_107 : i32 to vector<2x1xi32>
    %391 = arith.andi %389, %390 : vector<2x1xi32>
    %c63_i32_108 = arith.constant 63 : i32
    %392 = vector.broadcast %c63_i32_108 : i32 to vector<2x1xi32>
    %393 = arith.subi %392, %391 : vector<2x1xi32>
    %c10_i32 = arith.constant 10 : i32
    %394 = vector.broadcast %c10_i32 : i32 to vector<2x20xi32>
    %395 = arith.cmpi eq, %31, %394 : vector<2x20xi32>
    %396 = vector.shape_cast %393 : vector<2x1xi32> to vector<2x1xi32>
    %397 = vector.broadcast %396 : vector<2x1xi32> to vector<2x20xi32>
    %398 = arith.select %395, %397, %364 : vector<2x20xi1>, vector<2x20xi32>
    %399 = vector.broadcast %393 : vector<2x1xi32> to vector<2x128xi32>
    %400 = arith.cmpi eq, %26, %399 : vector<2x128xi32>
    %401 = arith.extui %400 : vector<2x128xi1> to vector<2x128xi32>
    %402 = arith.sitofp %401 : vector<2x128xi32> to vector<2x128xf32>
    %403 = arith.truncf %402 : vector<2x128xf32> to vector<2x128xbf16>
    %cst_109 = arith.constant dense<0.000000e+00> : vector<2x128xf32>
    %404 = tpu.matmul %403, %23, %cst_109 {dimension_numbers = #tpu.dot_dimension_numbers<[1], [0], [0], [1], [0, 0, 1, 1], [], []>} : vector<2x128xbf16>, vector<128x128xbf16>, vector<2x128xf32> -> vector<2x128xf32>
    %405 = arith.addf %404, %376 : vector<2x128xf32>
    %406 = math.tanh %405 : vector<2x128xf32>
    %407 = arith.truncf %406 : vector<2x128xf32> to vector<2x128xbf16>
    %cst_110 = arith.constant dense<0.000000e+00> : vector<2x128xf32>
    %408 = tpu.matmul %407, %24, %cst_110 {dimension_numbers = #tpu.dot_dimension_numbers<[1], [0], [0], [1], [0, 0, 1, 1], [], []>} : vector<2x128xbf16>, vector<128x128xbf16>, vector<2x128xf32> -> vector<2x128xf32>
    %409 = vector.broadcast %25 : vector<1x128xf32> to vector<2x128xf32>
    %410 = arith.addf %408, %409 : vector<2x128xf32>
    %411 = tpu.bitcast %410 : vector<2x128xf32> -> vector<2x128xi32>
    %c0_i32_111 = arith.constant 0 : i32
    %412 = vector.broadcast %c0_i32_111 : i32 to vector<2x128xi32>
    %413 = arith.cmpi slt, %411, %412 : vector<2x128xi32>
    %c2147483647_i32_112 = arith.constant 2147483647 : i32
    %414 = vector.broadcast %c2147483647_i32_112 : i32 to vector<2x128xi32>
    %415 = arith.xori %411, %414 : vector<2x128xi32>
    %416 = arith.select %413, %415, %411 : vector<2x128xi1>, vector<2x128xi32>
    %c-256_i32_113 = arith.constant -256 : i32
    %417 = vector.broadcast %c-256_i32_113 : i32 to vector<2x128xi32>
    %418 = arith.andi %416, %417 : vector<2x128xi32>
    %419 = arith.ori %418, %30 : vector<2x128xi32>
    %c-2147483648_i32_114 = arith.constant -2147483648 : i32
    %420 = vector.broadcast %c-2147483648_i32_114 : i32 to vector<2x128xi32>
    %421 = arith.select %28, %419, %420 : vector<2x128xi1>, vector<2x128xi32>
    %cst_115 = arith.constant dense<-2147483648> : vector<2xi32>
    %422 = vector.multi_reduction <maxsi>, %421, %cst_115 [1] : vector<2x128xi32> to vector<2xi32>
    %423 = vector.shape_cast %422 : vector<2xi32> to vector<2x1xi32>
    %c255_i32_116 = arith.constant 255 : i32
    %424 = vector.broadcast %c255_i32_116 : i32 to vector<2x1xi32>
    %425 = arith.andi %423, %424 : vector<2x1xi32>
    %c63_i32_117 = arith.constant 63 : i32
    %426 = vector.broadcast %c63_i32_117 : i32 to vector<2x1xi32>
    %427 = arith.subi %426, %425 : vector<2x1xi32>
    %c11_i32 = arith.constant 11 : i32
    %428 = vector.broadcast %c11_i32 : i32 to vector<2x20xi32>
    %429 = arith.cmpi eq, %31, %428 : vector<2x20xi32>
    %430 = vector.shape_cast %427 : vector<2x1xi32> to vector<2x1xi32>
    %431 = vector.broadcast %430 : vector<2x1xi32> to vector<2x20xi32>
    %432 = arith.select %429, %431, %398 : vector<2x20xi1>, vector<2x20xi32>
    %433 = vector.broadcast %427 : vector<2x1xi32> to vector<2x128xi32>
    %434 = arith.cmpi eq, %26, %433 : vector<2x128xi32>
    %435 = arith.extui %434 : vector<2x128xi1> to vector<2x128xi32>
    %436 = arith.sitofp %435 : vector<2x128xi32> to vector<2x128xf32>
    %437 = arith.truncf %436 : vector<2x128xf32> to vector<2x128xbf16>
    %cst_118 = arith.constant dense<0.000000e+00> : vector<2x128xf32>
    %438 = tpu.matmul %437, %23, %cst_118 {dimension_numbers = #tpu.dot_dimension_numbers<[1], [0], [0], [1], [0, 0, 1, 1], [], []>} : vector<2x128xbf16>, vector<128x128xbf16>, vector<2x128xf32> -> vector<2x128xf32>
    %439 = arith.addf %438, %410 : vector<2x128xf32>
    %440 = math.tanh %439 : vector<2x128xf32>
    %441 = arith.truncf %440 : vector<2x128xf32> to vector<2x128xbf16>
    %cst_119 = arith.constant dense<0.000000e+00> : vector<2x128xf32>
    %442 = tpu.matmul %441, %24, %cst_119 {dimension_numbers = #tpu.dot_dimension_numbers<[1], [0], [0], [1], [0, 0, 1, 1], [], []>} : vector<2x128xbf16>, vector<128x128xbf16>, vector<2x128xf32> -> vector<2x128xf32>
    %443 = vector.broadcast %25 : vector<1x128xf32> to vector<2x128xf32>
    %444 = arith.addf %442, %443 : vector<2x128xf32>
    %445 = tpu.bitcast %444 : vector<2x128xf32> -> vector<2x128xi32>
    %c0_i32_120 = arith.constant 0 : i32
    %446 = vector.broadcast %c0_i32_120 : i32 to vector<2x128xi32>
    %447 = arith.cmpi slt, %445, %446 : vector<2x128xi32>
    %c2147483647_i32_121 = arith.constant 2147483647 : i32
    %448 = vector.broadcast %c2147483647_i32_121 : i32 to vector<2x128xi32>
    %449 = arith.xori %445, %448 : vector<2x128xi32>
    %450 = arith.select %447, %449, %445 : vector<2x128xi1>, vector<2x128xi32>
    %c-256_i32_122 = arith.constant -256 : i32
    %451 = vector.broadcast %c-256_i32_122 : i32 to vector<2x128xi32>
    %452 = arith.andi %450, %451 : vector<2x128xi32>
    %453 = arith.ori %452, %30 : vector<2x128xi32>
    %c-2147483648_i32_123 = arith.constant -2147483648 : i32
    %454 = vector.broadcast %c-2147483648_i32_123 : i32 to vector<2x128xi32>
    %455 = arith.select %28, %453, %454 : vector<2x128xi1>, vector<2x128xi32>
    %cst_124 = arith.constant dense<-2147483648> : vector<2xi32>
    %456 = vector.multi_reduction <maxsi>, %455, %cst_124 [1] : vector<2x128xi32> to vector<2xi32>
    %457 = vector.shape_cast %456 : vector<2xi32> to vector<2x1xi32>
    %c255_i32_125 = arith.constant 255 : i32
    %458 = vector.broadcast %c255_i32_125 : i32 to vector<2x1xi32>
    %459 = arith.andi %457, %458 : vector<2x1xi32>
    %c63_i32_126 = arith.constant 63 : i32
    %460 = vector.broadcast %c63_i32_126 : i32 to vector<2x1xi32>
    %461 = arith.subi %460, %459 : vector<2x1xi32>
    %c12_i32 = arith.constant 12 : i32
    %462 = vector.broadcast %c12_i32 : i32 to vector<2x20xi32>
    %463 = arith.cmpi eq, %31, %462 : vector<2x20xi32>
    %464 = vector.shape_cast %461 : vector<2x1xi32> to vector<2x1xi32>
    %465 = vector.broadcast %464 : vector<2x1xi32> to vector<2x20xi32>
    %466 = arith.select %463, %465, %432 : vector<2x20xi1>, vector<2x20xi32>
    %467 = vector.broadcast %461 : vector<2x1xi32> to vector<2x128xi32>
    %468 = arith.cmpi eq, %26, %467 : vector<2x128xi32>
    %469 = arith.extui %468 : vector<2x128xi1> to vector<2x128xi32>
    %470 = arith.sitofp %469 : vector<2x128xi32> to vector<2x128xf32>
    %471 = arith.truncf %470 : vector<2x128xf32> to vector<2x128xbf16>
    %cst_127 = arith.constant dense<0.000000e+00> : vector<2x128xf32>
    %472 = tpu.matmul %471, %23, %cst_127 {dimension_numbers = #tpu.dot_dimension_numbers<[1], [0], [0], [1], [0, 0, 1, 1], [], []>} : vector<2x128xbf16>, vector<128x128xbf16>, vector<2x128xf32> -> vector<2x128xf32>
    %473 = arith.addf %472, %444 : vector<2x128xf32>
    %474 = math.tanh %473 : vector<2x128xf32>
    %475 = arith.truncf %474 : vector<2x128xf32> to vector<2x128xbf16>
    %cst_128 = arith.constant dense<0.000000e+00> : vector<2x128xf32>
    %476 = tpu.matmul %475, %24, %cst_128 {dimension_numbers = #tpu.dot_dimension_numbers<[1], [0], [0], [1], [0, 0, 1, 1], [], []>} : vector<2x128xbf16>, vector<128x128xbf16>, vector<2x128xf32> -> vector<2x128xf32>
    %477 = vector.broadcast %25 : vector<1x128xf32> to vector<2x128xf32>
    %478 = arith.addf %476, %477 : vector<2x128xf32>
    %479 = tpu.bitcast %478 : vector<2x128xf32> -> vector<2x128xi32>
    %c0_i32_129 = arith.constant 0 : i32
    %480 = vector.broadcast %c0_i32_129 : i32 to vector<2x128xi32>
    %481 = arith.cmpi slt, %479, %480 : vector<2x128xi32>
    %c2147483647_i32_130 = arith.constant 2147483647 : i32
    %482 = vector.broadcast %c2147483647_i32_130 : i32 to vector<2x128xi32>
    %483 = arith.xori %479, %482 : vector<2x128xi32>
    %484 = arith.select %481, %483, %479 : vector<2x128xi1>, vector<2x128xi32>
    %c-256_i32_131 = arith.constant -256 : i32
    %485 = vector.broadcast %c-256_i32_131 : i32 to vector<2x128xi32>
    %486 = arith.andi %484, %485 : vector<2x128xi32>
    %487 = arith.ori %486, %30 : vector<2x128xi32>
    %c-2147483648_i32_132 = arith.constant -2147483648 : i32
    %488 = vector.broadcast %c-2147483648_i32_132 : i32 to vector<2x128xi32>
    %489 = arith.select %28, %487, %488 : vector<2x128xi1>, vector<2x128xi32>
    %cst_133 = arith.constant dense<-2147483648> : vector<2xi32>
    %490 = vector.multi_reduction <maxsi>, %489, %cst_133 [1] : vector<2x128xi32> to vector<2xi32>
    %491 = vector.shape_cast %490 : vector<2xi32> to vector<2x1xi32>
    %c255_i32_134 = arith.constant 255 : i32
    %492 = vector.broadcast %c255_i32_134 : i32 to vector<2x1xi32>
    %493 = arith.andi %491, %492 : vector<2x1xi32>
    %c63_i32_135 = arith.constant 63 : i32
    %494 = vector.broadcast %c63_i32_135 : i32 to vector<2x1xi32>
    %495 = arith.subi %494, %493 : vector<2x1xi32>
    %c13_i32 = arith.constant 13 : i32
    %496 = vector.broadcast %c13_i32 : i32 to vector<2x20xi32>
    %497 = arith.cmpi eq, %31, %496 : vector<2x20xi32>
    %498 = vector.shape_cast %495 : vector<2x1xi32> to vector<2x1xi32>
    %499 = vector.broadcast %498 : vector<2x1xi32> to vector<2x20xi32>
    %500 = arith.select %497, %499, %466 : vector<2x20xi1>, vector<2x20xi32>
    %501 = vector.broadcast %495 : vector<2x1xi32> to vector<2x128xi32>
    %502 = arith.cmpi eq, %26, %501 : vector<2x128xi32>
    %503 = arith.extui %502 : vector<2x128xi1> to vector<2x128xi32>
    %504 = arith.sitofp %503 : vector<2x128xi32> to vector<2x128xf32>
    %505 = arith.truncf %504 : vector<2x128xf32> to vector<2x128xbf16>
    %cst_136 = arith.constant dense<0.000000e+00> : vector<2x128xf32>
    %506 = tpu.matmul %505, %23, %cst_136 {dimension_numbers = #tpu.dot_dimension_numbers<[1], [0], [0], [1], [0, 0, 1, 1], [], []>} : vector<2x128xbf16>, vector<128x128xbf16>, vector<2x128xf32> -> vector<2x128xf32>
    %507 = arith.addf %506, %478 : vector<2x128xf32>
    %508 = math.tanh %507 : vector<2x128xf32>
    %509 = arith.truncf %508 : vector<2x128xf32> to vector<2x128xbf16>
    %cst_137 = arith.constant dense<0.000000e+00> : vector<2x128xf32>
    %510 = tpu.matmul %509, %24, %cst_137 {dimension_numbers = #tpu.dot_dimension_numbers<[1], [0], [0], [1], [0, 0, 1, 1], [], []>} : vector<2x128xbf16>, vector<128x128xbf16>, vector<2x128xf32> -> vector<2x128xf32>
    %511 = vector.broadcast %25 : vector<1x128xf32> to vector<2x128xf32>
    %512 = arith.addf %510, %511 : vector<2x128xf32>
    %513 = tpu.bitcast %512 : vector<2x128xf32> -> vector<2x128xi32>
    %c0_i32_138 = arith.constant 0 : i32
    %514 = vector.broadcast %c0_i32_138 : i32 to vector<2x128xi32>
    %515 = arith.cmpi slt, %513, %514 : vector<2x128xi32>
    %c2147483647_i32_139 = arith.constant 2147483647 : i32
    %516 = vector.broadcast %c2147483647_i32_139 : i32 to vector<2x128xi32>
    %517 = arith.xori %513, %516 : vector<2x128xi32>
    %518 = arith.select %515, %517, %513 : vector<2x128xi1>, vector<2x128xi32>
    %c-256_i32_140 = arith.constant -256 : i32
    %519 = vector.broadcast %c-256_i32_140 : i32 to vector<2x128xi32>
    %520 = arith.andi %518, %519 : vector<2x128xi32>
    %521 = arith.ori %520, %30 : vector<2x128xi32>
    %c-2147483648_i32_141 = arith.constant -2147483648 : i32
    %522 = vector.broadcast %c-2147483648_i32_141 : i32 to vector<2x128xi32>
    %523 = arith.select %28, %521, %522 : vector<2x128xi1>, vector<2x128xi32>
    %cst_142 = arith.constant dense<-2147483648> : vector<2xi32>
    %524 = vector.multi_reduction <maxsi>, %523, %cst_142 [1] : vector<2x128xi32> to vector<2xi32>
    %525 = vector.shape_cast %524 : vector<2xi32> to vector<2x1xi32>
    %c255_i32_143 = arith.constant 255 : i32
    %526 = vector.broadcast %c255_i32_143 : i32 to vector<2x1xi32>
    %527 = arith.andi %525, %526 : vector<2x1xi32>
    %c63_i32_144 = arith.constant 63 : i32
    %528 = vector.broadcast %c63_i32_144 : i32 to vector<2x1xi32>
    %529 = arith.subi %528, %527 : vector<2x1xi32>
    %c14_i32 = arith.constant 14 : i32
    %530 = vector.broadcast %c14_i32 : i32 to vector<2x20xi32>
    %531 = arith.cmpi eq, %31, %530 : vector<2x20xi32>
    %532 = vector.shape_cast %529 : vector<2x1xi32> to vector<2x1xi32>
    %533 = vector.broadcast %532 : vector<2x1xi32> to vector<2x20xi32>
    %534 = arith.select %531, %533, %500 : vector<2x20xi1>, vector<2x20xi32>
    %535 = vector.broadcast %529 : vector<2x1xi32> to vector<2x128xi32>
    %536 = arith.cmpi eq, %26, %535 : vector<2x128xi32>
    %537 = arith.extui %536 : vector<2x128xi1> to vector<2x128xi32>
    %538 = arith.sitofp %537 : vector<2x128xi32> to vector<2x128xf32>
    %539 = arith.truncf %538 : vector<2x128xf32> to vector<2x128xbf16>
    %cst_145 = arith.constant dense<0.000000e+00> : vector<2x128xf32>
    %540 = tpu.matmul %539, %23, %cst_145 {dimension_numbers = #tpu.dot_dimension_numbers<[1], [0], [0], [1], [0, 0, 1, 1], [], []>} : vector<2x128xbf16>, vector<128x128xbf16>, vector<2x128xf32> -> vector<2x128xf32>
    %541 = arith.addf %540, %512 : vector<2x128xf32>
    %542 = math.tanh %541 : vector<2x128xf32>
    %543 = arith.truncf %542 : vector<2x128xf32> to vector<2x128xbf16>
    %cst_146 = arith.constant dense<0.000000e+00> : vector<2x128xf32>
    %544 = tpu.matmul %543, %24, %cst_146 {dimension_numbers = #tpu.dot_dimension_numbers<[1], [0], [0], [1], [0, 0, 1, 1], [], []>} : vector<2x128xbf16>, vector<128x128xbf16>, vector<2x128xf32> -> vector<2x128xf32>
    %545 = vector.broadcast %25 : vector<1x128xf32> to vector<2x128xf32>
    %546 = arith.addf %544, %545 : vector<2x128xf32>
    %547 = tpu.bitcast %546 : vector<2x128xf32> -> vector<2x128xi32>
    %c0_i32_147 = arith.constant 0 : i32
    %548 = vector.broadcast %c0_i32_147 : i32 to vector<2x128xi32>
    %549 = arith.cmpi slt, %547, %548 : vector<2x128xi32>
    %c2147483647_i32_148 = arith.constant 2147483647 : i32
    %550 = vector.broadcast %c2147483647_i32_148 : i32 to vector<2x128xi32>
    %551 = arith.xori %547, %550 : vector<2x128xi32>
    %552 = arith.select %549, %551, %547 : vector<2x128xi1>, vector<2x128xi32>
    %c-256_i32_149 = arith.constant -256 : i32
    %553 = vector.broadcast %c-256_i32_149 : i32 to vector<2x128xi32>
    %554 = arith.andi %552, %553 : vector<2x128xi32>
    %555 = arith.ori %554, %30 : vector<2x128xi32>
    %c-2147483648_i32_150 = arith.constant -2147483648 : i32
    %556 = vector.broadcast %c-2147483648_i32_150 : i32 to vector<2x128xi32>
    %557 = arith.select %28, %555, %556 : vector<2x128xi1>, vector<2x128xi32>
    %cst_151 = arith.constant dense<-2147483648> : vector<2xi32>
    %558 = vector.multi_reduction <maxsi>, %557, %cst_151 [1] : vector<2x128xi32> to vector<2xi32>
    %559 = vector.shape_cast %558 : vector<2xi32> to vector<2x1xi32>
    %c255_i32_152 = arith.constant 255 : i32
    %560 = vector.broadcast %c255_i32_152 : i32 to vector<2x1xi32>
    %561 = arith.andi %559, %560 : vector<2x1xi32>
    %c63_i32_153 = arith.constant 63 : i32
    %562 = vector.broadcast %c63_i32_153 : i32 to vector<2x1xi32>
    %563 = arith.subi %562, %561 : vector<2x1xi32>
    %c15_i32 = arith.constant 15 : i32
    %564 = vector.broadcast %c15_i32 : i32 to vector<2x20xi32>
    %565 = arith.cmpi eq, %31, %564 : vector<2x20xi32>
    %566 = vector.shape_cast %563 : vector<2x1xi32> to vector<2x1xi32>
    %567 = vector.broadcast %566 : vector<2x1xi32> to vector<2x20xi32>
    %568 = arith.select %565, %567, %534 : vector<2x20xi1>, vector<2x20xi32>
    %569 = vector.broadcast %563 : vector<2x1xi32> to vector<2x128xi32>
    %570 = arith.cmpi eq, %26, %569 : vector<2x128xi32>
    %571 = arith.extui %570 : vector<2x128xi1> to vector<2x128xi32>
    %572 = arith.sitofp %571 : vector<2x128xi32> to vector<2x128xf32>
    %573 = arith.truncf %572 : vector<2x128xf32> to vector<2x128xbf16>
    %cst_154 = arith.constant dense<0.000000e+00> : vector<2x128xf32>
    %574 = tpu.matmul %573, %23, %cst_154 {dimension_numbers = #tpu.dot_dimension_numbers<[1], [0], [0], [1], [0, 0, 1, 1], [], []>} : vector<2x128xbf16>, vector<128x128xbf16>, vector<2x128xf32> -> vector<2x128xf32>
    %575 = arith.addf %574, %546 : vector<2x128xf32>
    %576 = math.tanh %575 : vector<2x128xf32>
    %577 = arith.truncf %576 : vector<2x128xf32> to vector<2x128xbf16>
    %cst_155 = arith.constant dense<0.000000e+00> : vector<2x128xf32>
    %578 = tpu.matmul %577, %24, %cst_155 {dimension_numbers = #tpu.dot_dimension_numbers<[1], [0], [0], [1], [0, 0, 1, 1], [], []>} : vector<2x128xbf16>, vector<128x128xbf16>, vector<2x128xf32> -> vector<2x128xf32>
    %579 = vector.broadcast %25 : vector<1x128xf32> to vector<2x128xf32>
    %580 = arith.addf %578, %579 : vector<2x128xf32>
    %581 = tpu.bitcast %580 : vector<2x128xf32> -> vector<2x128xi32>
    %c0_i32_156 = arith.constant 0 : i32
    %582 = vector.broadcast %c0_i32_156 : i32 to vector<2x128xi32>
    %583 = arith.cmpi slt, %581, %582 : vector<2x128xi32>
    %c2147483647_i32_157 = arith.constant 2147483647 : i32
    %584 = vector.broadcast %c2147483647_i32_157 : i32 to vector<2x128xi32>
    %585 = arith.xori %581, %584 : vector<2x128xi32>
    %586 = arith.select %583, %585, %581 : vector<2x128xi1>, vector<2x128xi32>
    %c-256_i32_158 = arith.constant -256 : i32
    %587 = vector.broadcast %c-256_i32_158 : i32 to vector<2x128xi32>
    %588 = arith.andi %586, %587 : vector<2x128xi32>
    %589 = arith.ori %588, %30 : vector<2x128xi32>
    %c-2147483648_i32_159 = arith.constant -2147483648 : i32
    %590 = vector.broadcast %c-2147483648_i32_159 : i32 to vector<2x128xi32>
    %591 = arith.select %28, %589, %590 : vector<2x128xi1>, vector<2x128xi32>
    %cst_160 = arith.constant dense<-2147483648> : vector<2xi32>
    %592 = vector.multi_reduction <maxsi>, %591, %cst_160 [1] : vector<2x128xi32> to vector<2xi32>
    %593 = vector.shape_cast %592 : vector<2xi32> to vector<2x1xi32>
    %c255_i32_161 = arith.constant 255 : i32
    %594 = vector.broadcast %c255_i32_161 : i32 to vector<2x1xi32>
    %595 = arith.andi %593, %594 : vector<2x1xi32>
    %c63_i32_162 = arith.constant 63 : i32
    %596 = vector.broadcast %c63_i32_162 : i32 to vector<2x1xi32>
    %597 = arith.subi %596, %595 : vector<2x1xi32>
    %c16_i32 = arith.constant 16 : i32
    %598 = vector.broadcast %c16_i32 : i32 to vector<2x20xi32>
    %599 = arith.cmpi eq, %31, %598 : vector<2x20xi32>
    %600 = vector.shape_cast %597 : vector<2x1xi32> to vector<2x1xi32>
    %601 = vector.broadcast %600 : vector<2x1xi32> to vector<2x20xi32>
    %602 = arith.select %599, %601, %568 : vector<2x20xi1>, vector<2x20xi32>
    %603 = vector.broadcast %597 : vector<2x1xi32> to vector<2x128xi32>
    %604 = arith.cmpi eq, %26, %603 : vector<2x128xi32>
    %605 = arith.extui %604 : vector<2x128xi1> to vector<2x128xi32>
    %606 = arith.sitofp %605 : vector<2x128xi32> to vector<2x128xf32>
    %607 = arith.truncf %606 : vector<2x128xf32> to vector<2x128xbf16>
    %cst_163 = arith.constant dense<0.000000e+00> : vector<2x128xf32>
    %608 = tpu.matmul %607, %23, %cst_163 {dimension_numbers = #tpu.dot_dimension_numbers<[1], [0], [0], [1], [0, 0, 1, 1], [], []>} : vector<2x128xbf16>, vector<128x128xbf16>, vector<2x128xf32> -> vector<2x128xf32>
    %609 = arith.addf %608, %580 : vector<2x128xf32>
    %610 = math.tanh %609 : vector<2x128xf32>
    %611 = arith.truncf %610 : vector<2x128xf32> to vector<2x128xbf16>
    %cst_164 = arith.constant dense<0.000000e+00> : vector<2x128xf32>
    %612 = tpu.matmul %611, %24, %cst_164 {dimension_numbers = #tpu.dot_dimension_numbers<[1], [0], [0], [1], [0, 0, 1, 1], [], []>} : vector<2x128xbf16>, vector<128x128xbf16>, vector<2x128xf32> -> vector<2x128xf32>
    %613 = vector.broadcast %25 : vector<1x128xf32> to vector<2x128xf32>
    %614 = arith.addf %612, %613 : vector<2x128xf32>
    %615 = tpu.bitcast %614 : vector<2x128xf32> -> vector<2x128xi32>
    %c0_i32_165 = arith.constant 0 : i32
    %616 = vector.broadcast %c0_i32_165 : i32 to vector<2x128xi32>
    %617 = arith.cmpi slt, %615, %616 : vector<2x128xi32>
    %c2147483647_i32_166 = arith.constant 2147483647 : i32
    %618 = vector.broadcast %c2147483647_i32_166 : i32 to vector<2x128xi32>
    %619 = arith.xori %615, %618 : vector<2x128xi32>
    %620 = arith.select %617, %619, %615 : vector<2x128xi1>, vector<2x128xi32>
    %c-256_i32_167 = arith.constant -256 : i32
    %621 = vector.broadcast %c-256_i32_167 : i32 to vector<2x128xi32>
    %622 = arith.andi %620, %621 : vector<2x128xi32>
    %623 = arith.ori %622, %30 : vector<2x128xi32>
    %c-2147483648_i32_168 = arith.constant -2147483648 : i32
    %624 = vector.broadcast %c-2147483648_i32_168 : i32 to vector<2x128xi32>
    %625 = arith.select %28, %623, %624 : vector<2x128xi1>, vector<2x128xi32>
    %cst_169 = arith.constant dense<-2147483648> : vector<2xi32>
    %626 = vector.multi_reduction <maxsi>, %625, %cst_169 [1] : vector<2x128xi32> to vector<2xi32>
    %627 = vector.shape_cast %626 : vector<2xi32> to vector<2x1xi32>
    %c255_i32_170 = arith.constant 255 : i32
    %628 = vector.broadcast %c255_i32_170 : i32 to vector<2x1xi32>
    %629 = arith.andi %627, %628 : vector<2x1xi32>
    %c63_i32_171 = arith.constant 63 : i32
    %630 = vector.broadcast %c63_i32_171 : i32 to vector<2x1xi32>
    %631 = arith.subi %630, %629 : vector<2x1xi32>
    %c17_i32 = arith.constant 17 : i32
    %632 = vector.broadcast %c17_i32 : i32 to vector<2x20xi32>
    %633 = arith.cmpi eq, %31, %632 : vector<2x20xi32>
    %634 = vector.shape_cast %631 : vector<2x1xi32> to vector<2x1xi32>
    %635 = vector.broadcast %634 : vector<2x1xi32> to vector<2x20xi32>
    %636 = arith.select %633, %635, %602 : vector<2x20xi1>, vector<2x20xi32>
    %637 = vector.broadcast %631 : vector<2x1xi32> to vector<2x128xi32>
    %638 = arith.cmpi eq, %26, %637 : vector<2x128xi32>
    %639 = arith.extui %638 : vector<2x128xi1> to vector<2x128xi32>
    %640 = arith.sitofp %639 : vector<2x128xi32> to vector<2x128xf32>
    %641 = arith.truncf %640 : vector<2x128xf32> to vector<2x128xbf16>
    %cst_172 = arith.constant dense<0.000000e+00> : vector<2x128xf32>
    %642 = tpu.matmul %641, %23, %cst_172 {dimension_numbers = #tpu.dot_dimension_numbers<[1], [0], [0], [1], [0, 0, 1, 1], [], []>} : vector<2x128xbf16>, vector<128x128xbf16>, vector<2x128xf32> -> vector<2x128xf32>
    %643 = arith.addf %642, %614 : vector<2x128xf32>
    %644 = math.tanh %643 : vector<2x128xf32>
    %645 = arith.truncf %644 : vector<2x128xf32> to vector<2x128xbf16>
    %cst_173 = arith.constant dense<0.000000e+00> : vector<2x128xf32>
    %646 = tpu.matmul %645, %24, %cst_173 {dimension_numbers = #tpu.dot_dimension_numbers<[1], [0], [0], [1], [0, 0, 1, 1], [], []>} : vector<2x128xbf16>, vector<128x128xbf16>, vector<2x128xf32> -> vector<2x128xf32>
    %647 = vector.broadcast %25 : vector<1x128xf32> to vector<2x128xf32>
    %648 = arith.addf %646, %647 : vector<2x128xf32>
    %649 = tpu.bitcast %648 : vector<2x128xf32> -> vector<2x128xi32>
    %c0_i32_174 = arith.constant 0 : i32
    %650 = vector.broadcast %c0_i32_174 : i32 to vector<2x128xi32>
    %651 = arith.cmpi slt, %649, %650 : vector<2x128xi32>
    %c2147483647_i32_175 = arith.constant 2147483647 : i32
    %652 = vector.broadcast %c2147483647_i32_175 : i32 to vector<2x128xi32>
    %653 = arith.xori %649, %652 : vector<2x128xi32>
    %654 = arith.select %651, %653, %649 : vector<2x128xi1>, vector<2x128xi32>
    %c-256_i32_176 = arith.constant -256 : i32
    %655 = vector.broadcast %c-256_i32_176 : i32 to vector<2x128xi32>
    %656 = arith.andi %654, %655 : vector<2x128xi32>
    %657 = arith.ori %656, %30 : vector<2x128xi32>
    %c-2147483648_i32_177 = arith.constant -2147483648 : i32
    %658 = vector.broadcast %c-2147483648_i32_177 : i32 to vector<2x128xi32>
    %659 = arith.select %28, %657, %658 : vector<2x128xi1>, vector<2x128xi32>
    %cst_178 = arith.constant dense<-2147483648> : vector<2xi32>
    %660 = vector.multi_reduction <maxsi>, %659, %cst_178 [1] : vector<2x128xi32> to vector<2xi32>
    %661 = vector.shape_cast %660 : vector<2xi32> to vector<2x1xi32>
    %c255_i32_179 = arith.constant 255 : i32
    %662 = vector.broadcast %c255_i32_179 : i32 to vector<2x1xi32>
    %663 = arith.andi %661, %662 : vector<2x1xi32>
    %c63_i32_180 = arith.constant 63 : i32
    %664 = vector.broadcast %c63_i32_180 : i32 to vector<2x1xi32>
    %665 = arith.subi %664, %663 : vector<2x1xi32>
    %c18_i32 = arith.constant 18 : i32
    %666 = vector.broadcast %c18_i32 : i32 to vector<2x20xi32>
    %667 = arith.cmpi eq, %31, %666 : vector<2x20xi32>
    %668 = vector.shape_cast %665 : vector<2x1xi32> to vector<2x1xi32>
    %669 = vector.broadcast %668 : vector<2x1xi32> to vector<2x20xi32>
    %670 = arith.select %667, %669, %636 : vector<2x20xi1>, vector<2x20xi32>
    %671 = vector.broadcast %665 : vector<2x1xi32> to vector<2x128xi32>
    %672 = arith.cmpi eq, %26, %671 : vector<2x128xi32>
    %673 = arith.extui %672 : vector<2x128xi1> to vector<2x128xi32>
    %674 = arith.sitofp %673 : vector<2x128xi32> to vector<2x128xf32>
    %675 = arith.truncf %674 : vector<2x128xf32> to vector<2x128xbf16>
    %cst_181 = arith.constant dense<0.000000e+00> : vector<2x128xf32>
    %676 = tpu.matmul %675, %23, %cst_181 {dimension_numbers = #tpu.dot_dimension_numbers<[1], [0], [0], [1], [0, 0, 1, 1], [], []>} : vector<2x128xbf16>, vector<128x128xbf16>, vector<2x128xf32> -> vector<2x128xf32>
    %677 = arith.addf %676, %648 : vector<2x128xf32>
    %678 = math.tanh %677 : vector<2x128xf32>
    %679 = arith.truncf %678 : vector<2x128xf32> to vector<2x128xbf16>
    %cst_182 = arith.constant dense<0.000000e+00> : vector<2x128xf32>
    %680 = tpu.matmul %679, %24, %cst_182 {dimension_numbers = #tpu.dot_dimension_numbers<[1], [0], [0], [1], [0, 0, 1, 1], [], []>} : vector<2x128xbf16>, vector<128x128xbf16>, vector<2x128xf32> -> vector<2x128xf32>
    %681 = vector.broadcast %25 : vector<1x128xf32> to vector<2x128xf32>
    %682 = arith.addf %680, %681 : vector<2x128xf32>
    %683 = tpu.bitcast %682 : vector<2x128xf32> -> vector<2x128xi32>
    %c0_i32_183 = arith.constant 0 : i32
    %684 = vector.broadcast %c0_i32_183 : i32 to vector<2x128xi32>
    %685 = arith.cmpi slt, %683, %684 : vector<2x128xi32>
    %c2147483647_i32_184 = arith.constant 2147483647 : i32
    %686 = vector.broadcast %c2147483647_i32_184 : i32 to vector<2x128xi32>
    %687 = arith.xori %683, %686 : vector<2x128xi32>
    %688 = arith.select %685, %687, %683 : vector<2x128xi1>, vector<2x128xi32>
    %c-256_i32_185 = arith.constant -256 : i32
    %689 = vector.broadcast %c-256_i32_185 : i32 to vector<2x128xi32>
    %690 = arith.andi %688, %689 : vector<2x128xi32>
    %691 = arith.ori %690, %30 : vector<2x128xi32>
    %c-2147483648_i32_186 = arith.constant -2147483648 : i32
    %692 = vector.broadcast %c-2147483648_i32_186 : i32 to vector<2x128xi32>
    %693 = arith.select %28, %691, %692 : vector<2x128xi1>, vector<2x128xi32>
    %cst_187 = arith.constant dense<-2147483648> : vector<2xi32>
    %694 = vector.multi_reduction <maxsi>, %693, %cst_187 [1] : vector<2x128xi32> to vector<2xi32>
    %695 = vector.shape_cast %694 : vector<2xi32> to vector<2x1xi32>
    %c255_i32_188 = arith.constant 255 : i32
    %696 = vector.broadcast %c255_i32_188 : i32 to vector<2x1xi32>
    %697 = arith.andi %695, %696 : vector<2x1xi32>
    %c63_i32_189 = arith.constant 63 : i32
    %698 = vector.broadcast %c63_i32_189 : i32 to vector<2x1xi32>
    %699 = arith.subi %698, %697 : vector<2x1xi32>
    %c19_i32 = arith.constant 19 : i32
    %700 = vector.broadcast %c19_i32 : i32 to vector<2x20xi32>
    %701 = arith.cmpi eq, %31, %700 : vector<2x20xi32>
    %702 = vector.shape_cast %699 : vector<2x1xi32> to vector<2x1xi32>
    %703 = vector.broadcast %702 : vector<2x1xi32> to vector<2x20xi32>
    %704 = arith.select %701, %703, %670 : vector<2x20xi1>, vector<2x20xi32>
    %c0_190 = arith.constant 0 : index
    %c0_191 = arith.constant 0 : index
    %705 = vector.load %arg3[%c0_190, %c0_191] : memref<2x20xi32, #tpu.memory_space<vmem>>, vector<2x20xi32>
    tpu.vector_store %arg3[%c0_190, %c0_191], %704 {strides = array<i32>} : memref<2x20xi32, #tpu.memory_space<vmem>>, vector<2x20xi32>,
    return
  }
}

</mosaic_0001>

<bundles_post_ra>
// kernel: image_caption_forward.1
= control target key start
LH: loop header
LB: loop body
LE: loop exit
PB: predicated region body
PF: predicated region fallthrough
CT: control target
= control target key end

     0   :  { %s3366_s0 = inlined_call_operand.vmem [shape: bf16[512,32], index: 0, kind: input, shape index: {}]   ;;  %s3367_s1 = inlined_call_operand.vmem [shape: bf16[416,128], index: 1, kind: input, shape index: {}]   ;;  %s3368_s2 = inlined_call_operand.vmem [shape: f32[8,128], index: 2, kind: input, shape index: {}]   ;;  %s3369_s3 = inlined_call_operand.hbm [shape: s32[2,20], index: 3, kind: output, shape index: {}]  }
   0x1   :  { %v2401_v0 = vld [vmem:[%s3367_s1 + $0x8] sm:$0xff]  ;;  %v2400_v1 = vld [vmem:[%s3367_s1] sm:$0xff] }
   0x2   :  { %359 = vmatpush.bf16.msra.mxu0 %v2401_v0  ;;  %2426 = vmatpush.bf16.msra.mxu2 %v2401_v0 }
   0x3   :  { %8 = vsyncpa [#allocation3], 0  ;;  %2427 = vmatpush.bf16.msra.mxu3 %v2401_v0  ;;  %v2368_v2 = vld [vmem:[%s3366_s0] sm:$0xff]  ;;  %vm256_vm0 = vcmask 261120   ;;  %v2369_v3 = vld [vmem:[%s3366_s0 + $0x8] sm:$0xff]  ;;  %vm669_vm2 = vcmask 1040384  }
   0x4   :  { %v2370_v4 = vld [vmem:[%s3366_s0 + $0x10] sm:$0xff]  ;;  %v2371_v5 = vld [vmem:[%s3366_s0 + $0x18] sm:$0xff]  ;;  %v2372_v6 = vld [vmem:[%s3366_s0 + $0x20] sm:$0xff]  ;;  %vm859_vm5 = vcmask 1041408   ;;  %s2038_s29 = sshll.u32 %s3369_s3, 4  ;;  %s2039_s29 = int_to_ptr.hbm [resolvable:$true] %s2038_s29 }
   0x5   :  { %v2373_v7 = vld [vmem:[%s3366_s0 + $0x28] sm:$0xff]  ;;  %v2374_v8 = vld [vmem:[%s3366_s0 + $0x30] sm:$0xff]  ;;  %v2375_v9 = vld [vmem:[%s3366_s0 + $0x38] sm:$0xff] }
   0x6   :  { %360 = vmatpush.bf16.msra.mxu0 %v2400_v1  ;;  %2428 = vmatpush.bf16.msra.mxu2 %v2400_v1  ;;  %v2376_v10 = vld [vmem:[%s3366_s0 + $0x40] sm:$0xff]  ;;  %v2377_v16 = vld [vmem:[%s3366_s0 + $0x48] sm:$0xff]  ;;  %v2378_v23 = vld [vmem:[%s3366_s0 + $0x50] sm:$0xff] }
   0x7   :  { %2429 = vmatpush.bf16.msra.mxu3 %v2400_v1  ;;  %v2379_v30 = vld [vmem:[%s3366_s0 + $0x58] sm:$0xff]  ;;  %v2380_v37 = vld [vmem:[%s3366_s0 + $0x60] sm:$0xff]  ;;  %v2381_v44 = vld [vmem:[%s3366_s0 + $0x68] sm:$0xff] }
   0x8   :  { %v2382_v51 = vld [vmem:[%s3366_s0 + $0x70] sm:$0xff]  ;;  %v2383_v58 = vld [vmem:[%s3366_s0 + $0x78] sm:$0xff]  ;;  %v2384_v1 = vld [vmem:[%s3366_s0 + $0x80] sm:$0xff] }
   0x9   :  { %2183 = vmatmul.msk.bf16.vlgmr.msra.gmra.mxu0 %vm256_vm0, %v2368_v2 }
  0x19   :  { %2184 = vmatmul.msk.bf16.gmra.mxu0 %vm256_vm0, %v2369_v3 }
  0x29   :  { %2185 = vmatmul.msk.bf16.gmra.mxu0 %vm256_vm0, %v2370_v4 }
  0x39   :  { %2186 = vmatmul.msk.bf16.gmra.mxu0 %vm256_vm0, %v2371_v5 }
  0x49   :  { %2187 = vmatmul.msk.bf16.gmra.mxu0 %vm256_vm0, %v2372_v6 }
  0x59   :  { %2188 = vmatmul.msk.bf16.gmra.mxu0 %vm256_vm0, %v2373_v7 }
  0x69   :  { %2189 = vmatmul.msk.bf16.gmra.mxu0 %vm256_vm0, %v2374_v8  ;;  %v2385_v8 = vld [vmem:[%s3366_s0 + $0x88] sm:$0xff] }
  0x79   :  { %2190 = vmatmul.msk.bf16.gmra.mxu0 %vm256_vm0, %v2375_v9 }
  0x86   :  { %v362_v11 = vpop.f32.mrf.mxu0 }
  0x87   :  { %v522_v13 = vmax.f32 %v362_v11, 0.0 }
  0x89   :  { %2191 = vmatmul.msk.bf16.gmra.mxu0 %vm256_vm0, %v2376_v10 }
  0x8e   :  { %v364_v12 = vpop.f32.mrf.mxu0 }
  0x8f   :  { %v523_v14 = vmax.f32 %v364_v12, 0.0 }
  0x91   :  { %v586_v15 = vadd.f32 %v523_v14, %v522_v13 }
  0x96   :  { %v367_v17 = vpop.f32.mrf.mxu0 }
  0x97   :  { %v524_v18 = vmax.f32 %v367_v17, 0.0 }
  0x99   :  { %v587_v19 = vadd.f32 %v586_v15, %v524_v18  ;;  %2192 = vmatmul.msk.bf16.gmra.mxu0 %vm256_vm0, %v2377_v16  ;;  %v2386_v15 = vld [vmem:[%s3366_s0 + $0x90] sm:$0xff] }
  0x9e   :  { %v369_v20 = vpop.f32.mrf.mxu0 }
  0x9f   :  { %v525_v21 = vmax.f32 %v369_v20, 0.0 }
  0xa1   :  { %v588_v22 = vadd.f32 %v587_v19, %v525_v21 }
  0xa6   :  { %v372_v24 = vpop.f32.mrf.mxu0 }
  0xa7   :  { %v526_v25 = vmax.f32 %v372_v24, 0.0 }
  0xa9   :  { %v589_v26 = vadd.f32 %v588_v22, %v526_v25  ;;  %2193 = vmatmul.msk.bf16.gmra.mxu0 %vm256_vm0, %v2378_v23  ;;  %v2387_v22 = vld [vmem:[%s3366_s0 + $0x98] sm:$0xff] }
  0xae   :  { %v374_v27 = vpop.f32.mrf.mxu0 }
  0xaf   :  { %v527_v28 = vmax.f32 %v374_v27, 0.0 }
  0xb1   :  { %v590_v29 = vadd.f32 %v589_v26, %v527_v28 }
  0xb6   :  { %v377_v31 = vpop.f32.mrf.mxu0 }
  0xb7   :  { %v528_v32 = vmax.f32 %v377_v31, 0.0 }
  0xb9   :  { %v591_v33 = vadd.f32 %v590_v29, %v528_v32  ;;  %2194 = vmatmul.msk.bf16.gmra.mxu0 %vm256_vm0, %v2379_v30  ;;  %v2388_v29 = vld [vmem:[%s3366_s0 + $0xa0] sm:$0xff] }
  0xbe   :  { %v379_v34 = vpop.f32.mrf.mxu0 }
  0xbf   :  { %v529_v35 = vmax.f32 %v379_v34, 0.0 }
  0xc1   :  { %v592_v36 = vadd.f32 %v591_v33, %v529_v35 }
  0xc6   :  { %v382_v38 = vpop.f32.mrf.mxu0 }
  0xc7   :  { %v530_v39 = vmax.f32 %v382_v38, 0.0 }
  0xc9   :  { %v593_v40 = vadd.f32 %v592_v36, %v530_v39  ;;  %2195 = vmatmul.msk.bf16.gmra.mxu0 %vm256_vm0, %v2380_v37  ;;  %v2389_v36 = vld [vmem:[%s3366_s0 + $0xa8] sm:$0xff] }
  0xce   :  { %v384_v41 = vpop.f32.mrf.mxu0 }
  0xcf   :  { %v531_v42 = vmax.f32 %v384_v41, 0.0 }
  0xd1   :  { %v594_v43 = vadd.f32 %v593_v40, %v531_v42 }
  0xd6   :  { %v387_v45 = vpop.f32.mrf.mxu0 }
  0xd7   :  { %v532_v46 = vmax.f32 %v387_v45, 0.0 }
  0xd9   :  { %v595_v47 = vadd.f32 %v594_v43, %v532_v46  ;;  %2196 = vmatmul.msk.bf16.gmra.mxu0 %vm256_vm0, %v2381_v44  ;;  %v2390_v43 = vld [vmem:[%s3366_s0 + $0xb0] sm:$0xff] }
  0xde   :  { %v389_v48 = vpop.f32.mrf.mxu0 }
  0xdf   :  { %v533_v49 = vmax.f32 %v389_v48, 0.0 }
  0xe1   :  { %v596_v50 = vadd.f32 %v595_v47, %v533_v49 }
  0xe6   :  { %v392_v52 = vpop.f32.mrf.mxu0 }
  0xe7   :  { %v534_v53 = vmax.f32 %v392_v52, 0.0 }
  0xe9   :  { %v597_v54 = vadd.f32 %v596_v50, %v534_v53  ;;  %2197 = vmatmul.msk.bf16.gmra.mxu0 %vm256_vm0, %v2382_v51  ;;  %v2391_v50 = vld [vmem:[%s3366_s0 + $0xb8] sm:$0xff] }
  0xee   :  { %v394_v55 = vpop.f32.mrf.mxu0 }
  0xef   :  { %v535_v56 = vmax.f32 %v394_v55, 0.0 }
  0xf1   :  { %v598_v57 = vadd.f32 %v597_v54, %v535_v56 }
  0xf6   :  { %v397_v59 = vpop.f32.mrf.mxu0 }
  0xf7   :  { %v536_v60 = vmax.f32 %v397_v59, 0.0 }
  0xf9   :  { %v599_v61 = vadd.f32 %v598_v57, %v536_v60  ;;  %2198 = vmatmul.msk.bf16.gmra.mxu0 %vm256_vm0, %v2383_v58  ;;  %v2396_v57 = vld [vmem:[%s3366_s0 + $0xe0] sm:$0xff]  ;;  %v2398_v60 = vld [vmem:[%s3366_s0 + $0xf0] sm:$0xff] }
  0xfa   :  { %2211 = vmatmul.msk.bf16.vlgmr.msra.gmra.mxu2 %vm256_vm0, %v2396_v57  ;;  %v2392_v58 = vld [vmem:[%s3366_s0 + $0xc0] sm:$0xff]  ;;  %2213 = vmatmul.msk.bf16.vlgmr.msra.gmra.mxu3 %vm256_vm0, %v2398_v60  ;;  %v2406_v60 = vld [vmem:[%s3367_s1 + $0x30] sm:$0xff] }
  0xfe   :  { %v399_v62 = vpop.f32.mrf.mxu0 }
  0xff   :  { %v537_v63 = vmax.f32 %v399_v62, 0.0 }
 0x101   :  { %v600_v0 = vadd.f32 %v599_v61, %v537_v63 }
 0x106   :  { %v402_v2 = vpop.f32.mrf.mxu0 }
 0x107   :  { %v538_v3 = vmax.f32 %v402_v2, 0.0  ;;  %v2393_v2 = vld [vmem:[%s3366_s0 + $0xc8] sm:$0xff] }
 0x109   :  { %v601_v4 = vadd.f32 %v600_v0, %v538_v3  ;;  %2199 = vmatmul.msk.bf16.gmra.mxu0 %vm256_vm0, %v2384_v1  ;;  %v2397_v1 = vld [vmem:[%s3366_s0 + $0xe8] sm:$0xff] }
 0x10a   :  { %2212 = vmatmul.msk.bf16.gmra.mxu2 %vm256_vm0, %v2397_v1 }
 0x10e   :  { %v404_v5 = vpop.f32.mrf.mxu0 }
 0x10f   :  { %v539_v6 = vmax.f32 %v404_v5, 0.0 }
 0x111   :  { %v602_v7 = vadd.f32 %v601_v4, %v539_v6  ;;  %v2399_v6 = vld [vmem:[%s3366_s0 + $0xf8] sm:$0xff] }
 0x112   :  { %2214 = vmatmul.msk.bf16.gmra.mxu3 %vm256_vm0, %v2399_v6 }
 0x116   :  { %v407_v9 = vpop.f32.mrf.mxu0 }
 0x117   :  { %v540_v10 = vmax.f32 %v407_v9, 0.0 }
 0x119   :  { %v603_v11 = vadd.f32 %v602_v7, %v540_v10  ;;  %2200 = vmatmul.msk.bf16.gmra.mxu0 %vm256_vm0, %v2385_v8  ;;  %v2394_v10 = vld [vmem:[%s3366_s0 + $0xd0] sm:$0xff] }
 0x11e   :  { %v409_v12 = vpop.f32.mrf.mxu0 }
 0x11f   :  { %v541_v13 = vmax.f32 %v409_v12, 0.0 }
 0x121   :  { %v604_v14 = vadd.f32 %v603_v11, %v541_v13 }
 0x126   :  { %v412_v16 = vpop.f32.mrf.mxu0 }
 0x127   :  { %v542_v17 = vmax.f32 %v412_v16, 0.0 }
 0x129   :  { %v605_v18 = vadd.f32 %v604_v14, %v542_v17  ;;  %2201 = vmatmul.msk.bf16.gmra.mxu0 %vm256_vm0, %v2386_v15  ;;  %v2395_v17 = vld [vmem:[%s3366_s0 + $0xd8] sm:$0xff] }
 0x12e   :  { %v414_v19 = vpop.f32.mrf.mxu0 }
 0x12f   :  { %v543_v20 = vmax.f32 %v414_v19, 0.0 }
 0x131   :  { %v606_v21 = vadd.f32 %v605_v18, %v543_v20 }
 0x136   :  { %v417_v23 = vpop.f32.mrf.mxu0 }
 0x137   :  { %v544_v24 = vmax.f32 %v417_v23, 0.0 }
 0x139   :  { %v607_v25 = vadd.f32 %v606_v21, %v544_v24  ;;  %2202 = vmatmul.msk.bf16.gmra.mxu0 %vm256_vm0, %v2387_v22 }
 0x13e   :  { %v419_v26 = vpop.f32.mrf.mxu0 }
 0x13f   :  { %v545_v27 = vmax.f32 %v419_v26, 0.0 }
 0x141   :  { %v608_v28 = vadd.f32 %v607_v25, %v545_v27 }
 0x146   :  { %v422_v30 = vpop.f32.mrf.mxu0 }
 0x147   :  { %v546_v31 = vmax.f32 %v422_v30, 0.0 }
 0x149   :  { %v609_v32 = vadd.f32 %v608_v28, %v546_v31  ;;  %2203 = vmatmul.msk.bf16.gmra.mxu0 %vm256_vm0, %v2388_v29 }
 0x14e   :  { %v424_v33 = vpop.f32.mrf.mxu0 }
 0x14f   :  { %v547_v34 = vmax.f32 %v424_v33, 0.0 }
 0x151   :  { %v610_v35 = vadd.f32 %v609_v32, %v547_v34 }
 0x156   :  { %v427_v37 = vpop.f32.mrf.mxu0 }
 0x157   :  { %v548_v38 = vmax.f32 %v427_v37, 0.0 }
 0x159   :  { %v611_v39 = vadd.f32 %v610_v35, %v548_v38  ;;  %2204 = vmatmul.msk.bf16.gmra.mxu0 %vm256_vm0, %v2389_v36 }
 0x15e   :  { %v429_v40 = vpop.f32.mrf.mxu0 }
 0x15f   :  { %v549_v41 = vmax.f32 %v429_v40, 0.0 }
 0x161   :  { %v612_v42 = vadd.f32 %v611_v39, %v549_v41 }
 0x166   :  { %v432_v44 = vpop.f32.mrf.mxu0 }
 0x167   :  { %v550_v45 = vmax.f32 %v432_v44, 0.0 }
 0x169   :  { %v613_v46 = vadd.f32 %v612_v42, %v550_v45  ;;  %2205 = vmatmul.msk.bf16.gmra.mxu0 %vm256_vm0, %v2390_v43 }
 0x16e   :  { %v434_v47 = vpop.f32.mrf.mxu0 }
 0x16f   :  { %v551_v48 = vmax.f32 %v434_v47, 0.0 }
 0x171   :  { %v614_v49 = vadd.f32 %v613_v46, %v551_v48  ;;  %v2409_v46 = vld [vmem:[%s3367_s1 + $0x48] sm:$0xff] }
 0x172   :  { %738 = vmatpush.bf16.msra.mxu1 %v2409_v46  ;;  %v2728_v46 = vld [vmem:[%s3367_s1 + $0xb0] sm:$0xff] }
 0x176   :  { %v437_v51 = vpop.f32.mrf.mxu0 }
 0x177   :  { %v552_v52 = vmax.f32 %v437_v51, 0.0 }
 0x179   :  { %v615_v53 = vadd.f32 %v614_v49, %v552_v52  ;;  %2206 = vmatmul.msk.bf16.gmra.mxu0 %vm256_vm0, %v2391_v50  ;;  %v2408_v49 = vld [vmem:[%s3367_s1 + $0x40] sm:$0xff]  ;;  %v2407_v52 = vld [vmem:[%s3367_s1 + $0x38] sm:$0xff] }
 0x17a   :  { %739 = vmatpush.bf16.msra.mxu1 %v2408_v49 }
 0x17d   :  { %v502_v48 = vpop.f32.mrf.mxu2  ;;  %v512_v57 = vpop.f32.mrf.mxu3 }
 0x17e   :  { %v439_v54 = vpop.f32.mrf.mxu0  ;;  %740 = vmatpush.bf16.msra.mxu1 %v2407_v52 }
 0x17f   :  { %v553_v55 = vmax.f32 %v439_v54, 0.0 }
 0x181   :  { %v2645_v56 = vadd.f32 %v615_v53, %v553_v55 }
 0x182   :  { %741 = vmatpush.bf16.msra.mxu1 %v2406_v60 }
 0x186   :  { %v442_v59 = vpop.f32.mrf.mxu0 }
 0x187   :  { %v554_v62 = vmax.f32 %v442_v59, 0.0 }
 0x189   :  { %2207 = vmatmul.msk.bf16.gmra.mxu0 %vm256_vm0, %v2392_v58 }
 0x18e   :  { %v444_v61 = vpop.f32.mrf.mxu0 }
 0x18f   :  { %v555_v63 = vmax.f32 %v444_v61, 0.0  ;;  %v504_v61 = vpop.f32.mrf.mxu2 }
 0x191   :  { %v631_v0 = vadd.f32 %v555_v63, %v554_v62 }
 0x196   :  { %v447_v3 = vpop.f32.mrf.mxu0 }
 0x197   :  { %v556_v4 = vmax.f32 %v447_v3, 0.0 }
 0x199   :  { %v632_v5 = vadd.f32 %v631_v0, %v556_v4  ;;  %2208 = vmatmul.msk.bf16.gmra.mxu0 %vm256_vm0, %v2393_v2  ;;  %v2405_v2 = vld [vmem:[%s3367_s1 + $0x28] sm:$0xff] }
 0x19a   :  { %742 = vmatpush.bf16.msra.mxu1 %v2405_v2 }
 0x19e   :  { %v449_v7 = vpop.f32.mrf.mxu0 }
 0x19f   :  { %v557_v8 = vmax.f32 %v449_v7, 0.0 }
 0x1a1   :  { %v633_v9 = vadd.f32 %v632_v5, %v557_v8  ;;  %v2404_v8 = vld [vmem:[%s3367_s1 + $0x20] sm:$0xff] }
 0x1a2   :  { %743 = vmatpush.bf16.msra.mxu1 %v2404_v8  ;;  %v2433_v8 = vld [vmem:[%s3368_s2] ss:$0 sm:$0xff] }
 0x1a6   :  { %v452_v11 = vpop.f32.mrf.mxu0 }
 0x1a7   :  { %v558_v12 = vmax.f32 %v452_v11, 0.0 }
 0x1a9   :  { %v634_v13 = vadd.f32 %v633_v9, %v558_v12  ;;  %2209 = vmatmul.msk.bf16.gmra.mxu0 %vm256_vm0, %v2394_v10  ;;  %v514_v9 = vpop.f32.mrf.mxu3  ;;  %v507_v12 = vpop.f32.mrf.mxu2 }
 0x1ae   :  { %v454_v14 = vpop.f32.mrf.mxu0 }
 0x1af   :  { %v559_v15 = vmax.f32 %v454_v14, 0.0 }
 0x1b1   :  { %v635_v16 = vadd.f32 %v634_v13, %v559_v15  ;;  %v2403_v15 = vld [vmem:[%s3367_s1 + $0x18] sm:$0xff] }
 0x1b2   :  { %744 = vmatpush.bf16.msra.mxu1 %v2403_v15  ;;  %v2767_v15 = vld [vmem:[%s3368_s2 + $0x1] ss:$0 sm:$0xff] }
 0x1b6   :  { %v457_v18 = vpop.f32.mrf.mxu0 }
 0x1b7   :  { %v560_v19 = vmax.f32 %v457_v18, 0.0 }
 0x1b9   :  { %v636_v20 = vadd.f32 %v635_v16, %v560_v19  ;;  %2210 = vmatmul.msk.bf16.gmra.mxu0 %vm256_vm0, %v2395_v17  ;;  %v2402_v17 = vld [vmem:[%s3367_s1 + $0x10] sm:$0xff] }
 0x1ba   :  { %745 = vmatpush.bf16.msra.mxu1 %v2402_v17 }
 0x1be   :  { %v459_v21 = vpop.f32.mrf.mxu0 }
 0x1bf   :  { %v561_v22 = vmax.f32 %v459_v21, 0.0  ;;  %v578_v21 = vmax.f32 %v502_v48, 0.0 }
 0x1c1   :  { %v637_v23 = vadd.f32 %v636_v20, %v561_v22 }
 0x1c6   :  { %v462_v24 = vpop.f32.mrf.mxu0 }
 0x1c7   :  { %v562_v25 = vmax.f32 %v462_v24, 0.0  ;;  %v579_v24 = vmax.f32 %v504_v61, 0.0 }
 0x1c9   :  { %v638_v26 = vadd.f32 %v637_v23, %v562_v25  ;;  %v517_v23 = vpop.f32.mrf.mxu3 }
 0x1ce   :  { %v464_v27 = vpop.f32.mrf.mxu0 }
 0x1cf   :  { %v563_v28 = vmax.f32 %v464_v27, 0.0  ;;  %v509_v27 = vpop.f32.mrf.mxu2 }
 0x1d1   :  { %v639_v29 = vadd.f32 %v638_v26, %v563_v28  ;;  %v2520_v26 = vmov 256.0   ;;  %v2706_v28 = vld [vmem:[%s3367_s1 + $0xc8] sm:$0xff] }
 0x1d2   :  { %2435 = vrcp.f32 %v2520_v26  ;;  %839 = vmatpush.bf16.msrb.mxu2 %v2706_v28  ;;  %946 = vmatpush.bf16.msrb.mxu1 %v2706_v28 }
 0x1d6   :  { %v467_v30 = vpop.f32.mrf.mxu0 }
 0x1d7   :  { %v564_v31 = vmax.f32 %v467_v30, 0.0 }
 0x1d9   :  { %v640_v32 = vadd.f32 %v639_v29, %v564_v31  ;;  %v580_v29 = vmax.f32 %v507_v12, 0.0  ;;  %v2712_v31 = vld [vmem:[%s3367_s1 + $0xc0] sm:$0xff] }
 0x1da   :  { %840 = vmatpush.bf16.msrb.mxu2 %v2712_v31  ;;  %947 = vmatpush.bf16.msrb.mxu1 %v2712_v31 }
 0x1de   :  { %v469_v33 = vpop.f32.mrf.mxu0 }
 0x1df   :  { %v565_v34 = vmax.f32 %v469_v33, 0.0  ;;  %v581_v33 = vmax.f32 %v509_v27, 0.0 }
 0x1e1   :  { %v641_v35 = vadd.f32 %v640_v32, %v565_v34  ;;  %v617_v32 = vrot.slane %v2645_v56, 4 }
 0x1e6   :  { %v472_v36 = vpop.f32.mrf.mxu0 }
 0x1e7   :  { %v566_v37 = vmax.f32 %v472_v36, 0.0  ;;  %v582_v36 = vmax.f32 %v512_v57, 0.0 }
 0x1e9   :  { %v642_v38 = vadd.f32 %v641_v35, %v566_v37  ;;  %v2436_v35 = vpop.eup %2435 }
 0x1ea   :  { %vm628_vm1 = vweird.f32 %v2436_v35 }
 0x1ee   :  { %v474_v39 = vpop.f32.mrf.mxu0 }
 0x1ef   :  { %v567_v50 = vmax.f32 %v474_v39, 0.0  ;;  %v618_v39 = vadd.f32 %v617_v32, %v2645_v56  ;;  %v2794_v32 = vld [vmem:[%s3367_s1 + $0x80] sm:$0xff] }
 0x1f1   :  { %v643_v53 = vadd.f32 %v642_v38, %v567_v50  ;;  %v2720_v38 = vld [vmem:[%s3367_s1 + $0xb8] sm:$0xff] }
 0x1f2   :  { %841 = vmatpush.bf16.msrb.mxu2 %v2720_v38  ;;  %948 = vmatpush.bf16.msrb.mxu1 %v2720_v38 }
 0x1f6   :  { %v477_v40 = vpop.f32.mrf.mxu0  ;;  %842 = vmatpush.bf16.msrb.mxu2 %v2728_v46  ;;  %949 = vmatpush.bf16.msrb.mxu1 %v2728_v46 }
 0x1f7   :  { %v568_v51 = vmax.f32 %v477_v40, 0.0  ;;  %v583_v40 = vmax.f32 %v514_v9, 0.0 }
 0x1f9   :  { %v644_v58 = vadd.f32 %v643_v53, %v568_v51  ;;  %v2735_v51 = vld [vmem:[%s3367_s1 + $0xa8] sm:$0xff] }
 0x1fa   :  { %843 = vmatpush.bf16.msrb.mxu2 %v2735_v51  ;;  %950 = vmatpush.bf16.msrb.mxu1 %v2735_v51 }
 0x1fe   :  { %v479_v41 = vpop.f32.mrf.mxu0 }
 0x1ff   :  { %v569_v54 = vmax.f32 %v479_v41, 0.0 }
 0x201   :  { %v645_v62 = vadd.f32 %v644_v58, %v569_v54 }
 0x206   :  { %v482_v42 = vpop.f32.mrf.mxu0 }
 0x207   :  { %v570_v59 = vmax.f32 %v482_v42, 0.0  ;;  %v519_v42 = vpop.f32.mrf.mxu3 }
 0x208   :  { %v585_v49 = vmax.f32 %v519_v42, 0.0  ;;  %v2836_v42 = vld [vmem:[%s3367_s1 + $0x58] sm:$0xff] }
 0x209   :  { %v646_v0 = vadd.f32 %v645_v62, %v570_v59 }
 0x20e   :  { %v484_v43 = vpop.f32.mrf.mxu0 }
 0x20f   :  { %v571_v63 = vmax.f32 %v484_v43, 0.0  ;;  %v624_v43 = vmul.f32 256.0, %v2436_v35 }
 0x211   :  { %v647_v3 = vadd.f32 %v646_v0, %v571_v63  ;;  %v625_v50 = vsub.f32 1.0, %v624_v43  ;;  %v2844_v43 = vld [vmem:[%s3367_s1 + $0x50] sm:$0xff] }
 0x213   :  { %v626_v54 = vmul.f32 %v2436_v35, %v625_v50 }
 0x215   :  { %v627_v59 = vadd.f32 %v2436_v35, %v626_v54 }
 0x216   :  { %v487_v44 = vpop.f32.mrf.mxu0 }
 0x217   :  { %v572_v1 = vmax.f32 %v487_v44, 0.0  ;;  %v584_v44 = vmax.f32 %v517_v23, 0.0  ;;  %v629_v63 = vsel %vm628_vm1, %v2436_v35, %v627_v59  ;;  %v2818_v35 = vld [vmem:[%s3367_s1 + $0x68] sm:$0xff] }
 0x219   :  { %v648_v6 = vadd.f32 %v647_v3, %v572_v1 }
 0x21e   :  { %v489_v45 = vpop.f32.mrf.mxu0 }
 0x21f   :  { %v573_v4 = vmax.f32 %v489_v45, 0.0 }
 0x221   :  { %v649_v10 = vadd.f32 %v648_v6, %v573_v4  ;;  %v2750_v6 = vld [vmem:[%s3367_s1 + $0x98] sm:$0xff] }
 0x226   :  { %v492_v47 = vpop.f32.mrf.mxu0 }
 0x227   :  { %v574_v7 = vmax.f32 %v492_v47, 0.0  ;;  %v619_v47 = vrot.slane %v618_v39, 2 }
 0x229   :  { %v650_v13 = vadd.f32 %v649_v10, %v574_v7  ;;  %v620_v52 = vadd.f32 %v619_v47, %v618_v39  ;;  %v2757_v7 = vld [vmem:[%s3367_s1 + $0x90] sm:$0xff] }
 0x22b   :  { %v621_v57 = vrot.slane %v620_v52, 1 }
 0x22d   :  { %v622_v62 = vadd.f32 %v621_v57, %v620_v52  ;;  %v2521_v52 = vmov 1.0|1.0  }
 0x22e   :  { %v494_v55 = vpop.f32.mrf.mxu0 }
 0x22f   :  { %v575_v11 = vmax.f32 %v494_v55, 0.0  ;;  %v630_v1 = vmul.f32 %v629_v63, %v622_v62 }
 0x231   :  { %v651_v16 = vadd.f32 %v650_v13, %v575_v11 }
 0x236   :  { %v497_v5 = vpop.f32.mrf.mxu0 }
 0x237   :  { %v576_v14 = vmax.f32 %v497_v5, 0.0  ;;  %v2743_v5 = vld [vmem:[%s3367_s1 + $0xa0] sm:$0xff] }
 0x238   :  { %844 = vmatpush.bf16.msrb.mxu2 %v2743_v5  ;;  %951 = vmatpush.bf16.msrb.mxu1 %v2743_v5 }
 0x239   :  { %v652_v19 = vadd.f32 %v651_v16, %v576_v14  ;;  %v785_v14 = vlaneseq }
 0x23b   :  { %v2769_v17 = vand.u32 127, %v785_v14 }
 0x23c   :  { %845 = vmatpush.bf16.msrb.mxu2 %v2750_v6  ;;  %952 = vmatpush.bf16.msrb.mxu1 %v2750_v6 }
 0x23d   :  { %vm787_vm4 = vcmp.ge.s32.totalorder %v2769_v17, 64  ;;  %vm877_vm11 = vcmp.eq.s32.totalorder %v2769_v17, 0  ;;  %vm983_vm12 = vcmp.eq.s32.totalorder %v2769_v17, 1  ;;  %vm1041_vm1 = vcmp.eq.s32.totalorder %v2769_v17, 2 }
 0x23e   :  { %v499_v18 = vpop.f32.mrf.mxu0 }
 0x23f   :  { %v577_v20 = vmax.f32 %v499_v18, 0.0 }
 0x240   :  { %846 = vmatpush.bf16.msrb.mxu2 %v2757_v7  ;;  %953 = vmatpush.bf16.msrb.mxu1 %v2757_v7 }
 0x241   :  { %v653_v22 = vadd.f32 %v652_v19, %v577_v20  ;;  %v2777_v20 = vsub.s32 127, %v2769_v17 }
 0x243   :  { %v654_v25 = vadd.f32 %v653_v22, %v578_v21 }
 0x245   :  { %v655_v30 = vadd.f32 %v654_v25, %v579_v24 }
 0x247   :  { %v656_v34 = vadd.f32 %v655_v30, %v580_v29  ;;  %v2788_v30 = vld [vmem:[%s3367_s1 + $0x88] sm:$0xff] }
 0x248   :  { %931 = vmatpush.bf16.msrb.mxu3 %v2788_v30  ;;  %989 = vmatpush.bf16.msra.mxu2 %v2788_v30 }
 0x249   :  { %v657_v37 = vadd.f32 %v656_v34, %v581_v33  ;;  %v2802_v33 = vld [vmem:[%s3367_s1 + $0x78] sm:$0xff]  ;;  %v2810_v34 = vld [vmem:[%s3367_s1 + $0x70] sm:$0xff] }
 0x24b   :  { %v658_v41 = vadd.f32 %v657_v37, %v582_v36  ;;  %v2826_v36 = vld [vmem:[%s3367_s1 + $0x60] sm:$0xff] }
 0x24c   :  { %932 = vmatpush.bf16.msrb.mxu3 %v2794_v32  ;;  %990 = vmatpush.bf16.msra.mxu2 %v2794_v32 }
 0x24d   :  { %v659_v45 = vadd.f32 %v658_v41, %v583_v40 }
 0x24f   :  { %v660_v48 = vadd.f32 %v659_v45, %v584_v44 }
 0x250   :  { %933 = vmatpush.bf16.msrb.mxu3 %v2802_v33  ;;  %991 = vmatpush.bf16.msra.mxu2 %v2802_v33 }
 0x251   :  { %v661_v56 = vadd.f32 %v660_v48, %v585_v49 }
 0x253   :  { %v662_v53 = vrot.slane %v661_v56, 4 }
 0x254   :  { %934 = vmatpush.bf16.msrb.mxu3 %v2810_v34  ;;  %992 = vmatpush.bf16.msra.mxu2 %v2810_v34 }
 0x255   :  { %v663_v55 = vadd.f32 %v662_v53, %v661_v56 }
 0x257   :  { %v664_v58 = vrot.slane %v663_v55, 2 }
 0x258   :  { %935 = vmatpush.bf16.msrb.mxu3 %v2818_v35  ;;  %993 = vmatpush.bf16.msra.mxu2 %v2818_v35 }
 0x259   :  { %v665_v60 = vadd.f32 %v664_v58, %v663_v55 }
 0x25b   :  { %v666_v61 = vrot.slane %v665_v60, 1 }
 0x25c   :  { %936 = vmatpush.bf16.msrb.mxu3 %v2826_v36  ;;  %994 = vmatpush.bf16.msra.mxu2 %v2826_v36 }
 0x25d   :  { %v667_v0 = vadd.f32 %v666_v61, %v665_v60 }
 0x25f   :  { %v668_v2 = vmul.f32 %v667_v0, %v629_v63 }
 0x260   :  { %937 = vmatpush.bf16.msrb.mxu3 %v2836_v42  ;;  %995 = vmatpush.bf16.msra.mxu2 %v2836_v42 }
 0x261   :  { %v670_v3 = vsel %vm669_vm2, %v630_v1, %v668_v2 }
 0x262   :  { %v671_v4 = vpack.c.bf16 %v670_v3, %v670_v3 }
 0x264   :  { %746 = vmatmul.bf16.vlgmr.msra.gmra.mxu1 %v671_v4  ;;  %938 = vmatpush.bf16.msrb.mxu3 %v2844_v43 }
 0x265   :  { %1047 = vmatpush.bf16.msra.mxu1 %v2788_v30  ;;  %996 = vmatpush.bf16.msra.mxu2 %v2844_v43 }
 0x268   :  { %1004 = vmatpush.bf16.msra.mxu3 %v2706_v28 }
 0x269   :  { %1048 = vmatpush.bf16.msra.mxu1 %v2794_v32 }
 0x26c   :  { %1005 = vmatpush.bf16.msra.mxu3 %v2712_v31 }
 0x26d   :  { %1049 = vmatpush.bf16.msra.mxu1 %v2802_v33 }
 0x270   :  { %1006 = vmatpush.bf16.msra.mxu3 %v2720_v38 }
 0x271   :  { %1050 = vmatpush.bf16.msra.mxu1 %v2810_v34 }
 0x274   :  { %1007 = vmatpush.bf16.msra.mxu3 %v2728_v46 }
 0x275   :  { %1051 = vmatpush.bf16.msra.mxu1 %v2818_v35 }
 0x278   :  { %1008 = vmatpush.bf16.msra.mxu3 %v2735_v51 }
 0x279   :  { %1052 = vmatpush.bf16.msra.mxu1 %v2826_v36 }
 0x27c   :  { %1009 = vmatpush.bf16.msra.mxu3 %v2743_v5 }
 0x27d   :  { %1053 = vmatpush.bf16.msra.mxu1 %v2836_v42 }
 0x280   :  { %1010 = vmatpush.bf16.msra.mxu3 %v2750_v6 }
 0x281   :  { %1054 = vmatpush.bf16.msra.mxu1 %v2844_v43 }
 0x284   :  { %1011 = vmatpush.bf16.msra.mxu3 %v2757_v7 }
 0x2e1   :  { %v747_v9 = vpop.f32.mrf.mxu1 }
 0x2e2   :  { %v748_v10 = vadd.f32 %v2433_v8, %v747_v9 }
 0x2e4   :  { %2437 = vtanh.f32 %v748_v10 }
 0x2e9   :  { %v749_v11 = vpop.f32.mrf.mxu1 }
 0x2ea   :  { %v2438_v12 = vpop.eup %2437 }
 0x2eb   :  { %v789_v13 = vpack.c.bf16 %v2438_v12, %v2438_v12 }
 0x2ed   :  { %847 = vmatmul.bf16.vlgmr.msrb.gmra.mxu2 %v789_v13 }
 0x2ee   :  { %1062 = vmatpush.bf16.msrb.mxu2 %v2706_v28 }
 0x2f2   :  { %1063 = vmatpush.bf16.msrb.mxu2 %v2712_v31 }
 0x2f6   :  { %1064 = vmatpush.bf16.msrb.mxu2 %v2720_v38 }
 0x2fa   :  { %1065 = vmatpush.bf16.msrb.mxu2 %v2728_v46 }
 0x2fe   :  { %1066 = vmatpush.bf16.msrb.mxu2 %v2735_v51 }
 0x302   :  { %1067 = vmatpush.bf16.msrb.mxu2 %v2743_v5 }
 0x306   :  { %1068 = vmatpush.bf16.msrb.mxu2 %v2750_v6 }
 0x30a   :  { %1069 = vmatpush.bf16.msrb.mxu2 %v2757_v7 }
 0x370   :  { %v848_v16 = vpop.f32.mrf.mxu2 }
 0x371   :  { %v2772_v18 = vadd.f32 %v2767_v15, %v848_v16 }
 0x373   :  { %vm853_vm3 = vcmp.lt.s32.totalorder %v2772_v18, 0  ;;  %v854_v19 = vxor.u32 2147483647, %v2772_v18 }
 0x375   :  { %v855_v21 = vsel %vm853_vm3, %v854_v19, %v2772_v18 }
 0x376   :  { %v856_v22 = vand.u32 4294967040, %v855_v21 }
 0x378   :  { %v850_v23 = vpop.f32.mrf.mxu2  ;;  %v857_v24 = vor.u32 %v856_v22, %v2777_v20 }
 0x37a   :  { %v858_v25 = vsel %vm787_vm4, %v857_v24, 2147483648 }
 0x37b   :  { %v860_v26 = vsel %vm859_vm5, %v858_v25, 2147483648 }
 0x37c   :  { %v862_v27 = vshra.s32 %v860_v26, 16  ;;  %v861_v37 = vand.u32 65535, %v860_v26 }
 0x37e   :  { %v864_v29 = vcvt.s32.f32 %v862_v27  ;;  %v863_v40 = vcvt.s32.f32 %v861_v37 }
 0x380   :  { %865 = vmax.xlane.f32.xlu0 %v864_v29 }
 0x3f3   :  { %v866_v39 = vpop.xlane.xlu0 %865 }
 0x3f4   :  { %vm867_vm6 = vcmp.eq.f32.partialorder %v864_v29, %v866_v39  ;;  %v872_v44 = vcvt.f32.s32 %v866_v39 }
 0x3f5   :  { %v868_v41 = vsel %vm867_vm6, %v863_v40, -inf }
 0x3f6   :  { %869 = vmax.xlane.f32.xlu0 %v868_v41  ;;  %v873_v47 = vshll.u32 %v872_v44, 16 }
 0x469   :  { %v870_v45 = vpop.xlane.xlu0 %869 }
 0x46a   :  { %v871_v48 = vcvt.f32.s32 %v870_v45 }
 0x46c   :  { %v874_v49 = vadd.s32 %v873_v47, %v871_v48 }
 0x46e   :  { %v875_v50 = vand.u32 255, %v874_v49 }
 0x470   :  { %v876_v56 = vsub.s32 63, %v875_v50 }
 0x472   :  { %vm879_vm7 = vcmp.eq.s32.totalorder %v2769_v17, %v876_v56  ;;  %v878_v23 = vsel %vm877_vm11, %v876_v56, 0 }
 0x473   :  { %vm2312_vm8 = vmpackc.low %vm879_vm7, %vm879_vm7 }
 0x474   :  { %2313 = vmatmul.msk.bf16.vlgmr.msrb.gmra.mxu3 %vm2312_vm8, %v2521_v52  ;;  %vm1099_vm8 = vcmp.eq.s32.totalorder %v2769_v17, 3 }
 0x475   :  { %1105 = vmatpush.bf16.msrb.mxu3 %v2788_v30 }
 0x479   :  { %1106 = vmatpush.bf16.msrb.mxu3 %v2794_v32 }
 0x47d   :  { %1107 = vmatpush.bf16.msrb.mxu3 %v2802_v33 }
 0x481   :  { %1108 = vmatpush.bf16.msrb.mxu3 %v2810_v34 }
 0x485   :  { %1109 = vmatpush.bf16.msrb.mxu3 %v2818_v35 }
 0x489   :  { %1110 = vmatpush.bf16.msrb.mxu3 %v2826_v36 }
 0x48d   :  { %1111 = vmatpush.bf16.msrb.mxu3 %v2836_v42 }
 0x491   :  { %1112 = vmatpush.bf16.msrb.mxu3 %v2844_v43 }
 0x4f7   :  { %v940_v53 = vpop.f32.mrf.mxu3 }
 0x4f8   :  { %v941_v54 = vadd.f32 %v940_v53, %v2772_v18 }
 0x4fa   :  { %2439 = vtanh.f32 %v941_v54 }
 0x4ff   :  { %v942_v55 = vpop.f32.mrf.mxu3 }
 0x500   :  { %v2440_v57 = vpop.eup %2439 }
 0x501   :  { %v945_v58 = vpack.c.bf16 %v2440_v57, %v2440_v57 }
 0x503   :  { %954 = vmatmul.bf16.vlgmr.msrb.gmra.mxu1 %v945_v58 }
 0x504   :  { %1120 = vmatpush.bf16.msrb.mxu1 %v2706_v28 }
 0x508   :  { %1121 = vmatpush.bf16.msrb.mxu1 %v2712_v31 }
 0x50c   :  { %1122 = vmatpush.bf16.msrb.mxu1 %v2720_v38 }
 0x510   :  { %1123 = vmatpush.bf16.msrb.mxu1 %v2728_v46 }
 0x514   :  { %1124 = vmatpush.bf16.msrb.mxu1 %v2735_v51 }
 0x518   :  { %1125 = vmatpush.bf16.msrb.mxu1 %v2743_v5 }
 0x51c   :  { %1126 = vmatpush.bf16.msrb.mxu1 %v2750_v6 }
 0x520   :  { %1127 = vmatpush.bf16.msrb.mxu1 %v2757_v7 }
 0x580   :  { %v955_v59 = vpop.f32.mrf.mxu1 }
 0x581   :  { %v956_v60 = vadd.f32 %v2767_v15, %v955_v59 }
 0x583   :  { %vm960_vm9 = vcmp.lt.s32.totalorder %v956_v60, 0  ;;  %v961_v61 = vxor.u32 2147483647, %v956_v60 }
 0x585   :  { %v962_v62 = vsel %vm960_vm9, %v961_v61, %v956_v60 }
 0x586   :  { %v963_v63 = vand.u32 4294967040, %v962_v62 }
 0x588   :  { %v957_v0 = vpop.f32.mrf.mxu1  ;;  %v964_v1 = vor.u32 %v963_v63, %v2777_v20 }
 0x58a   :  { %v965_v2 = vsel %vm787_vm4, %v964_v1, 2147483648 }
 0x58b   :  { %v966_v3 = vsel %vm859_vm5, %v965_v2, 2147483648 }
 0x58c   :  { %v968_v4 = vshra.s32 %v966_v3, 16  ;;  %v967_v9 = vand.u32 65535, %v966_v3 }
 0x58e   :  { %v970_v8 = vcvt.s32.f32 %v968_v4  ;;  %v969_v11 = vcvt.s32.f32 %v967_v9 }
 0x590   :  { %971 = vmax.xlane.f32.xlu1 %v970_v8 }
 0x603   :  { %v972_v10 = vpop.xlane.xlu1 %971 }
 0x604   :  { %vm973_vm10 = vcmp.eq.f32.partialorder %v970_v8, %v972_v10  ;;  %v978_v13 = vcvt.f32.s32 %v972_v10 }
 0x605   :  { %v974_v12 = vsel %vm973_vm10, %v969_v11, -inf }
 0x606   :  { %975 = vmax.xlane.f32.xlu1 %v974_v12  ;;  %v979_v16 = vshll.u32 %v978_v13, 16 }
 0x679   :  { %v976_v14 = vpop.xlane.xlu1 %975 }
 0x67a   :  { %v977_v18 = vcvt.f32.s32 %v976_v14 }
 0x67c   :  { %v980_v19 = vadd.s32 %v979_v16, %v977_v18 }
 0x67e   :  { %v981_v21 = vand.u32 255, %v980_v19 }
 0x680   :  { %v982_v22 = vsub.s32 63, %v981_v21 }
 0x682   :  { %v984_v24 = vsel %vm983_vm12, %v982_v22, %v878_v23  ;;  %vm985_vm13 = vcmp.eq.s32.totalorder %v2769_v17, %v982_v22 }
 0x683   :  { %vm2315_vm14 = vmpackc.low %vm985_vm13, %vm985_vm13  ;;  %vm1157_vm13 = vcmp.eq.s32.totalorder %v2769_v17, 4 }
 0x684   :  { %2316 = vmatmul.msk.bf16.vlgmr.msra.gmra.mxu2 %vm2315_vm14, %v2521_v52 }
 0x685   :  { %1163 = vmatpush.bf16.msra.mxu2 %v2788_v30 }
 0x689   :  { %1164 = vmatpush.bf16.msra.mxu2 %v2794_v32 }
 0x68d   :  { %1165 = vmatpush.bf16.msra.mxu2 %v2802_v33 }
 0x691   :  { %1166 = vmatpush.bf16.msra.mxu2 %v2810_v34 }
 0x695   :  { %1167 = vmatpush.bf16.msra.mxu2 %v2818_v35 }
 0x699   :  { %1168 = vmatpush.bf16.msra.mxu2 %v2826_v36 }
 0x69d   :  { %1169 = vmatpush.bf16.msra.mxu2 %v2836_v42 }
 0x6a1   :  { %1170 = vmatpush.bf16.msra.mxu2 %v2844_v43 }
 0x707   :  { %v998_v25 = vpop.f32.mrf.mxu2 }
 0x708   :  { %v999_v26 = vadd.f32 %v998_v25, %v956_v60 }
 0x70a   :  { %2441 = vtanh.f32 %v999_v26 }
 0x70f   :  { %v1000_v27 = vpop.f32.mrf.mxu2 }
 0x710   :  { %v2442_v29 = vpop.eup %2441 }
 0x711   :  { %v1003_v37 = vpack.c.bf16 %v2442_v29, %v2442_v29 }
 0x713   :  { %1012 = vmatmul.bf16.vlgmr.msra.gmra.mxu3 %v1003_v37 }
 0x714   :  { %1178 = vmatpush.bf16.msra.mxu3 %v2706_v28 }
 0x718   :  { %1179 = vmatpush.bf16.msra.mxu3 %v2712_v31 }
 0x71c   :  { %1180 = vmatpush.bf16.msra.mxu3 %v2720_v38 }
 0x720   :  { %1181 = vmatpush.bf16.msra.mxu3 %v2728_v46 }
 0x724   :  { %1182 = vmatpush.bf16.msra.mxu3 %v2735_v51 }
 0x728   :  { %1183 = vmatpush.bf16.msra.mxu3 %v2743_v5 }
 0x72c   :  { %1184 = vmatpush.bf16.msra.mxu3 %v2750_v6 }
 0x730   :  { %1185 = vmatpush.bf16.msra.mxu3 %v2757_v7 }
 0x796   :  { %v1013_v39 = vpop.f32.mrf.mxu3 }
 0x797   :  { %v1014_v40 = vadd.f32 %v2767_v15, %v1013_v39 }
 0x799   :  { %vm1018_vm15 = vcmp.lt.s32.totalorder %v1014_v40, 0  ;;  %v1019_v41 = vxor.u32 2147483647, %v1014_v40 }
 0x79b   :  { %v1020_v44 = vsel %vm1018_vm15, %v1019_v41, %v1014_v40 }
 0x79c   :  { %v1021_v45 = vand.u32 4294967040, %v1020_v44 }
 0x79e   :  { %v1015_v47 = vpop.f32.mrf.mxu3  ;;  %v1022_v48 = vor.u32 %v1021_v45, %v2777_v20 }
 0x7a0   :  { %v1023_v49 = vsel %vm787_vm4, %v1022_v48, 2147483648 }
 0x7a1   :  { %v1024_v50 = vsel %vm859_vm5, %v1023_v49, 2147483648 }
 0x7a2   :  { %v1026_v56 = vshra.s32 %v1024_v50, 16  ;;  %v1025_v54 = vand.u32 65535, %v1024_v50 }
 0x7a4   :  { %v1028_v53 = vcvt.s32.f32 %v1026_v56  ;;  %v1027_v57 = vcvt.s32.f32 %v1025_v54 }
 0x7a6   :  { %1029 = vmax.xlane.f32.xlu2 %v1028_v53 }
 0x819   :  { %v1030_v55 = vpop.xlane.xlu2 %1029 }
 0x81a   :  { %vm1031_vm0 = vcmp.eq.f32.partialorder %v1028_v53, %v1030_v55  ;;  %v1036_v59 = vcvt.f32.s32 %v1030_v55 }
 0x81b   :  { %v1032_v58 = vsel %vm1031_vm0, %v1027_v57, -inf }
 0x81c   :  { %1033 = vmax.xlane.f32.xlu2 %v1032_v58  ;;  %v1037_v61 = vshll.u32 %v1036_v59, 16 }
 0x88f   :  { %v1034_v60 = vpop.xlane.xlu2 %1033 }
 0x890   :  { %v1035_v62 = vcvt.f32.s32 %v1034_v60 }
 0x892   :  { %v1038_v63 = vadd.s32 %v1037_v61, %v1035_v62 }
 0x894   :  { %v1039_v0 = vand.u32 255, %v1038_v63 }
 0x896   :  { %v1040_v1 = vsub.s32 63, %v1039_v0 }
 0x898   :  { %v1042_v2 = vsel %vm1041_vm1, %v1040_v1, %v984_v24  ;;  %vm1043_vm2 = vcmp.eq.s32.totalorder %v2769_v17, %v1040_v1 }
 0x899   :  { %vm2318_vm3 = vmpackc.low %vm1043_vm2, %vm1043_vm2  ;;  %vm1215_vm2 = vcmp.eq.s32.totalorder %v2769_v17, 5 }
 0x89a   :  { %2319 = vmatmul.msk.bf16.vlgmr.msra.gmra.mxu1 %vm2318_vm3, %v2521_v52 }
 0x89b   :  { %1221 = vmatpush.bf16.msra.mxu1 %v2788_v30 }
 0x89f   :  { %1222 = vmatpush.bf16.msra.mxu1 %v2794_v32 }
 0x8a3   :  { %1223 = vmatpush.bf16.msra.mxu1 %v2802_v33 }
 0x8a7   :  { %1224 = vmatpush.bf16.msra.mxu1 %v2810_v34 }
 0x8ab   :  { %1225 = vmatpush.bf16.msra.mxu1 %v2818_v35 }
 0x8af   :  { %1226 = vmatpush.bf16.msra.mxu1 %v2826_v36 }
 0x8b3   :  { %1227 = vmatpush.bf16.msra.mxu1 %v2836_v42 }
 0x8b7   :  { %1228 = vmatpush.bf16.msra.mxu1 %v2844_v43 }
 0x917   :  { %v1056_v3 = vpop.f32.mrf.mxu1 }
 0x918   :  { %v1057_v4 = vadd.f32 %v1056_v3, %v1014_v40 }
 0x91a   :  { %2443 = vtanh.f32 %v1057_v4 }
 0x91f   :  { %v1058_v8 = vpop.f32.mrf.mxu1 }
 0x920   :  { %v2444_v9 = vpop.eup %2443 }
 0x921   :  { %v1061_v10 = vpack.c.bf16 %v2444_v9, %v2444_v9 }
 0x923   :  { %1070 = vmatmul.bf16.vlgmr.msrb.gmra.mxu2 %v1061_v10 }
 0x924   :  { %1236 = vmatpush.bf16.msrb.mxu2 %v2706_v28 }
 0x928   :  { %1237 = vmatpush.bf16.msrb.mxu2 %v2712_v31 }
 0x92c   :  { %1238 = vmatpush.bf16.msrb.mxu2 %v2720_v38 }
 0x930   :  { %1239 = vmatpush.bf16.msrb.mxu2 %v2728_v46 }
 0x934   :  { %1240 = vmatpush.bf16.msrb.mxu2 %v2735_v51 }
 0x938   :  { %1241 = vmatpush.bf16.msrb.mxu2 %v2743_v5 }
 0x93c   :  { %1242 = vmatpush.bf16.msrb.mxu2 %v2750_v6 }
 0x940   :  { %1243 = vmatpush.bf16.msrb.mxu2 %v2757_v7 }
 0x9a6   :  { %v1071_v11 = vpop.f32.mrf.mxu2 }
 0x9a7   :  { %v1072_v12 = vadd.f32 %v2767_v15, %v1071_v11 }
 0x9a9   :  { %vm1076_vm6 = vcmp.lt.s32.totalorder %v1072_v12, 0  ;;  %v1077_v13 = vxor.u32 2147483647, %v1072_v12 }
 0x9ab   :  { %v1078_v14 = vsel %vm1076_vm6, %v1077_v13, %v1072_v12 }
 0x9ac   :  { %v1079_v16 = vand.u32 4294967040, %v1078_v14 }
 0x9ae   :  { %v1073_v18 = vpop.f32.mrf.mxu2  ;;  %v1080_v19 = vor.u32 %v1079_v16, %v2777_v20 }
 0x9b0   :  { %v1081_v21 = vsel %vm787_vm4, %v1080_v19, 2147483648 }
 0x9b1   :  { %v1082_v22 = vsel %vm859_vm5, %v1081_v21, 2147483648 }
 0x9b2   :  { %v1084_v23 = vshra.s32 %v1082_v22, 16  ;;  %v1083_v25 = vand.u32 65535, %v1082_v22 }
 0x9b4   :  { %v1086_v24 = vcvt.s32.f32 %v1084_v23  ;;  %v1085_v27 = vcvt.s32.f32 %v1083_v25 }
 0x9b6   :  { %1087 = vmax.xlane.f32.xlu0 %v1086_v24 }
 0xa29   :  { %v1088_v26 = vpop.xlane.xlu0 %1087 }
 0xa2a   :  { %vm1089_vm7 = vcmp.eq.f32.partialorder %v1086_v24, %v1088_v26  ;;  %v1094_v37 = vcvt.f32.s32 %v1088_v26 }
 0xa2b   :  { %v1090_v29 = vsel %vm1089_vm7, %v1085_v27, -inf }
 0xa2c   :  { %1091 = vmax.xlane.f32.xlu1 %v1090_v29  ;;  %v1095_v40 = vshll.u32 %v1094_v37, 16 }
 0xa9f   :  { %v1092_v39 = vpop.xlane.xlu1 %1091 }
 0xaa0   :  { %v1093_v41 = vcvt.f32.s32 %v1092_v39 }
 0xaa2   :  { %v1096_v44 = vadd.s32 %v1095_v40, %v1093_v41 }
 0xaa4   :  { %v1097_v45 = vand.u32 255, %v1096_v44 }
 0xaa6   :  { %v1098_v47 = vsub.s32 63, %v1097_v45 }
 0xaa8   :  { %v1100_v48 = vsel %vm1099_vm8, %v1098_v47, %v1042_v2  ;;  %vm1101_vm9 = vcmp.eq.s32.totalorder %v2769_v17, %v1098_v47 }
 0xaa9   :  { %vm2321_vm10 = vmpackc.low %vm1101_vm9, %vm1101_vm9  ;;  %vm1273_vm9 = vcmp.eq.s32.totalorder %v2769_v17, 6 }
 0xaaa   :  { %2322 = vmatmul.msk.bf16.vlgmr.msrb.gmra.mxu3 %vm2321_vm10, %v2521_v52 }
 0xaab   :  { %1279 = vmatpush.bf16.msrb.mxu3 %v2788_v30 }
 0xaaf   :  { %1280 = vmatpush.bf16.msrb.mxu3 %v2794_v32 }
 0xab3   :  { %1281 = vmatpush.bf16.msrb.mxu3 %v2802_v33 }
 0xab7   :  { %1282 = vmatpush.bf16.msrb.mxu3 %v2810_v34 }
 0xabb   :  { %1283 = vmatpush.bf16.msrb.mxu3 %v2818_v35 }
 0xabf   :  { %1284 = vmatpush.bf16.msrb.mxu3 %v2826_v36 }
 0xac3   :  { %1285 = vmatpush.bf16.msrb.mxu3 %v2836_v42 }
 0xac7   :  { %1286 = vmatpush.bf16.msrb.mxu3 %v2844_v43 }
 0xb2d   :  { %v1114_v49 = vpop.f32.mrf.mxu3 }
 0xb2e   :  { %v1115_v50 = vadd.f32 %v1114_v49, %v1072_v12 }
 0xb30   :  { %2445 = vtanh.f32 %v1115_v50 }
 0xb35   :  { %v1116_v56 = vpop.f32.mrf.mxu3 }
 0xb36   :  { %v2446_v53 = vpop.eup %2445 }
 0xb37   :  { %v1119_v54 = vpack.c.bf16 %v2446_v53, %v2446_v53 }
 0xb39   :  { %1128 = vmatmul.bf16.vlgmr.msrb.gmra.mxu1 %v1119_v54 }
 0xb3a   :  { %1294 = vmatpush.bf16.msrb.mxu1 %v2706_v28 }
 0xb3e   :  { %1295 = vmatpush.bf16.msrb.mxu1 %v2712_v31 }
 0xb42   :  { %1296 = vmatpush.bf16.msrb.mxu1 %v2720_v38 }
 0xb46   :  { %1297 = vmatpush.bf16.msrb.mxu1 %v2728_v46 }
 0xb4a   :  { %1298 = vmatpush.bf16.msrb.mxu1 %v2735_v51 }
 0xb4e   :  { %1299 = vmatpush.bf16.msrb.mxu1 %v2743_v5 }
 0xb52   :  { %1300 = vmatpush.bf16.msrb.mxu1 %v2750_v6 }
 0xb56   :  { %1301 = vmatpush.bf16.msrb.mxu1 %v2757_v7 }
 0xbb6   :  { %v1129_v55 = vpop.f32.mrf.mxu1 }
 0xbb7   :  { %v1130_v57 = vadd.f32 %v2767_v15, %v1129_v55 }
 0xbb9   :  { %vm1134_vm11 = vcmp.lt.s32.totalorder %v1130_v57, 0  ;;  %v1135_v58 = vxor.u32 2147483647, %v1130_v57 }
 0xbbb   :  { %v1136_v59 = vsel %vm1134_vm11, %v1135_v58, %v1130_v57 }
 0xbbc   :  { %v1137_v60 = vand.u32 4294967040, %v1136_v59 }
 0xbbe   :  { %v1131_v61 = vpop.f32.mrf.mxu1  ;;  %v1138_v62 = vor.u32 %v1137_v60, %v2777_v20 }
 0xbc0   :  { %v1139_v63 = vsel %vm787_vm4, %v1138_v62, 2147483648 }
 0xbc1   :  { %v1140_v0 = vsel %vm859_vm5, %v1139_v63, 2147483648 }
 0xbc2   :  { %v1142_v1 = vshra.s32 %v1140_v0, 16  ;;  %v1141_v3 = vand.u32 65535, %v1140_v0 }
 0xbc4   :  { %v1144_v2 = vcvt.s32.f32 %v1142_v1  ;;  %v1143_v8 = vcvt.s32.f32 %v1141_v3 }
 0xbc6   :  { %1145 = vmax.xlane.f32.xlu2 %v1144_v2 }
 0xc39   :  { %v1146_v4 = vpop.xlane.xlu2 %1145 }
 0xc3a   :  { %vm1147_vm12 = vcmp.eq.f32.partialorder %v1144_v2, %v1146_v4  ;;  %v1152_v10 = vcvt.f32.s32 %v1146_v4 }
 0xc3b   :  { %v1148_v9 = vsel %vm1147_vm12, %v1143_v8, -inf }
 0xc3c   :  { %1149 = vmax.xlane.f32.xlu0 %v1148_v9  ;;  %v1153_v12 = vshll.u32 %v1152_v10, 16 }
 0xcaf   :  { %v1150_v11 = vpop.xlane.xlu0 %1149 }
 0xcb0   :  { %v1151_v13 = vcvt.f32.s32 %v1150_v11 }
 0xcb2   :  { %v1154_v14 = vadd.s32 %v1153_v12, %v1151_v13 }
 0xcb4   :  { %v1155_v16 = vand.u32 255, %v1154_v14 }
 0xcb6   :  { %v1156_v18 = vsub.s32 63, %v1155_v16 }
 0xcb8   :  { %v1158_v19 = vsel %vm1157_vm13, %v1156_v18, %v1100_v48  ;;  %vm1159_vm14 = vcmp.eq.s32.totalorder %v2769_v17, %v1156_v18 }
 0xcb9   :  { %vm2324_vm15 = vmpackc.low %vm1159_vm14, %vm1159_vm14  ;;  %vm1331_vm14 = vcmp.eq.s32.totalorder %v2769_v17, 7 }
 0xcba   :  { %2325 = vmatmul.msk.bf16.vlgmr.msra.gmra.mxu2 %vm2324_vm15, %v2521_v52 }
 0xcbb   :  { %1337 = vmatpush.bf16.msra.mxu2 %v2788_v30 }
 0xcbf   :  { %1338 = vmatpush.bf16.msra.mxu2 %v2794_v32 }
 0xcc3   :  { %1339 = vmatpush.bf16.msra.mxu2 %v2802_v33 }
 0xcc7   :  { %1340 = vmatpush.bf16.msra.mxu2 %v2810_v34 }
 0xccb   :  { %1341 = vmatpush.bf16.msra.mxu2 %v2818_v35 }
 0xccf   :  { %1342 = vmatpush.bf16.msra.mxu2 %v2826_v36 }
 0xcd3   :  { %1343 = vmatpush.bf16.msra.mxu2 %v2836_v42 }
 0xcd7   :  { %1344 = vmatpush.bf16.msra.mxu2 %v2844_v43 }
 0xd3d   :  { %v1172_v21 = vpop.f32.mrf.mxu2 }
 0xd3e   :  { %v1173_v22 = vadd.f32 %v1172_v21, %v1130_v57 }
 0xd40   :  { %2447 = vtanh.f32 %v1173_v22 }
 0xd45   :  { %v1174_v23 = vpop.f32.mrf.mxu2 }
 0xd46   :  { %v2448_v24 = vpop.eup %2447 }
 0xd47   :  { %v1177_v25 = vpack.c.bf16 %v2448_v24, %v2448_v24 }
 0xd49   :  { %1186 = vmatmul.bf16.vlgmr.msra.gmra.mxu3 %v1177_v25 }
 0xd4a   :  { %1352 = vmatpush.bf16.msra.mxu3 %v2706_v28 }
 0xd4e   :  { %1353 = vmatpush.bf16.msra.mxu3 %v2712_v31 }
 0xd52   :  { %1354 = vmatpush.bf16.msra.mxu3 %v2720_v38 }
 0xd56   :  { %1355 = vmatpush.bf16.msra.mxu3 %v2728_v46 }
 0xd5a   :  { %1356 = vmatpush.bf16.msra.mxu3 %v2735_v51 }
 0xd5e   :  { %1357 = vmatpush.bf16.msra.mxu3 %v2743_v5 }
 0xd62   :  { %1358 = vmatpush.bf16.msra.mxu3 %v2750_v6 }
 0xd66   :  { %1359 = vmatpush.bf16.msra.mxu3 %v2757_v7 }
 0xdcc   :  { %v1187_v26 = vpop.f32.mrf.mxu3 }
 0xdcd   :  { %v1188_v27 = vadd.f32 %v2767_v15, %v1187_v26 }
 0xdcf   :  { %vm1192_vm0 = vcmp.lt.s32.totalorder %v1188_v27, 0  ;;  %v1193_v29 = vxor.u32 2147483647, %v1188_v27 }
 0xdd1   :  { %v1194_v37 = vsel %vm1192_vm0, %v1193_v29, %v1188_v27 }
 0xdd2   :  { %v1195_v39 = vand.u32 4294967040, %v1194_v37 }
 0xdd4   :  { %v1189_v40 = vpop.f32.mrf.mxu3  ;;  %v1196_v41 = vor.u32 %v1195_v39, %v2777_v20 }
 0xdd6   :  { %v1197_v44 = vsel %vm787_vm4, %v1196_v41, 2147483648 }
 0xdd7   :  { %v1198_v45 = vsel %vm859_vm5, %v1197_v44, 2147483648 }
 0xdd8   :  { %v1200_v47 = vshra.s32 %v1198_v45, 16  ;;  %v1199_v49 = vand.u32 65535, %v1198_v45 }
 0xdda   :  { %v1202_v48 = vcvt.s32.f32 %v1200_v47  ;;  %v1201_v56 = vcvt.s32.f32 %v1199_v49 }
 0xddc   :  { %1203 = vmax.xlane.f32.xlu1 %v1202_v48 }
 0xe4f   :  { %v1204_v50 = vpop.xlane.xlu1 %1203 }
 0xe50   :  { %vm1205_vm1 = vcmp.eq.f32.partialorder %v1202_v48, %v1204_v50  ;;  %v1210_v54 = vcvt.f32.s32 %v1204_v50 }
 0xe51   :  { %v1206_v53 = vsel %vm1205_vm1, %v1201_v56, -inf }
 0xe52   :  { %1207 = vmax.xlane.f32.xlu2 %v1206_v53  ;;  %v1211_v57 = vshll.u32 %v1210_v54, 16 }
 0xec5   :  { %v1208_v55 = vpop.xlane.xlu2 %1207 }
 0xec6   :  { %v1209_v58 = vcvt.f32.s32 %v1208_v55 }
 0xec8   :  { %v1212_v59 = vadd.s32 %v1211_v57, %v1209_v58 }
 0xeca   :  { %v1213_v60 = vand.u32 255, %v1212_v59 }
 0xecc   :  { %v1214_v61 = vsub.s32 63, %v1213_v60 }
 0xece   :  { %v1216_v62 = vsel %vm1215_vm2, %v1214_v61, %v1158_v19  ;;  %vm1217_vm3 = vcmp.eq.s32.totalorder %v2769_v17, %v1214_v61 }
 0xecf   :  { %vm2327_vm6 = vmpackc.low %vm1217_vm3, %vm1217_vm3  ;;  %vm1389_vm3 = vcmp.eq.s32.totalorder %v2769_v17, 8 }
 0xed0   :  { %2328 = vmatmul.msk.bf16.vlgmr.msra.gmra.mxu1 %vm2327_vm6, %v2521_v52 }
 0xed1   :  { %1395 = vmatpush.bf16.msra.mxu1 %v2788_v30 }
 0xed5   :  { %1396 = vmatpush.bf16.msra.mxu1 %v2794_v32 }
 0xed9   :  { %1397 = vmatpush.bf16.msra.mxu1 %v2802_v33 }
 0xedd   :  { %1398 = vmatpush.bf16.msra.mxu1 %v2810_v34 }
 0xee1   :  { %1399 = vmatpush.bf16.msra.mxu1 %v2818_v35 }
 0xee5   :  { %1400 = vmatpush.bf16.msra.mxu1 %v2826_v36 }
 0xee9   :  { %1401 = vmatpush.bf16.msra.mxu1 %v2836_v42 }
 0xeed   :  { %1402 = vmatpush.bf16.msra.mxu1 %v2844_v43 }
 0xf4d   :  { %v1230_v63 = vpop.f32.mrf.mxu1 }
 0xf4e   :  { %v1231_v0 = vadd.f32 %v1230_v63, %v1188_v27 }
 0xf50   :  { %2449 = vtanh.f32 %v1231_v0 }
 0xf55   :  { %v1232_v1 = vpop.f32.mrf.mxu1 }
 0xf56   :  { %v2450_v2 = vpop.eup %2449 }
 0xf57   :  { %v1235_v3 = vpack.c.bf16 %v2450_v2, %v2450_v2 }
 0xf59   :  { %1244 = vmatmul.bf16.vlgmr.msrb.gmra.mxu2 %v1235_v3 }
 0xf5a   :  { %1410 = vmatpush.bf16.msrb.mxu2 %v2706_v28 }
 0xf5e   :  { %1411 = vmatpush.bf16.msrb.mxu2 %v2712_v31 }
 0xf62   :  { %1412 = vmatpush.bf16.msrb.mxu2 %v2720_v38 }
 0xf66   :  { %1413 = vmatpush.bf16.msrb.mxu2 %v2728_v46 }
 0xf6a   :  { %1414 = vmatpush.bf16.msrb.mxu2 %v2735_v51 }
 0xf6e   :  { %1415 = vmatpush.bf16.msrb.mxu2 %v2743_v5 }
 0xf72   :  { %1416 = vmatpush.bf16.msrb.mxu2 %v2750_v6 }
 0xf76   :  { %1417 = vmatpush.bf16.msrb.mxu2 %v2757_v7 }
 0xfdc   :  { %v1245_v4 = vpop.f32.mrf.mxu2 }
 0xfdd   :  { %v1246_v8 = vadd.f32 %v2767_v15, %v1245_v4 }
 0xfdf   :  { %vm1250_vm7 = vcmp.lt.s32.totalorder %v1246_v8, 0  ;;  %v1251_v9 = vxor.u32 2147483647, %v1246_v8 }
 0xfe1   :  { %v1252_v10 = vsel %vm1250_vm7, %v1251_v9, %v1246_v8 }
 0xfe2   :  { %v1253_v11 = vand.u32 4294967040, %v1252_v10 }
 0xfe4   :  { %v1247_v12 = vpop.f32.mrf.mxu2  ;;  %v1254_v13 = vor.u32 %v1253_v11, %v2777_v20 }
 0xfe6   :  { %v1255_v14 = vsel %vm787_vm4, %v1254_v13, 2147483648 }
 0xfe7   :  { %v1256_v16 = vsel %vm859_vm5, %v1255_v14, 2147483648  ;;  %v3048_v14 = vld [vmem:[%s3367_s1 + $0xc8] sm:$0xff] }
 0xfe8   :  { %v1258_v18 = vshra.s32 %v1256_v16, 16  ;;  %v1257_v21 = vand.u32 65535, %v1256_v16  ;;  %v3054_v16 = vld [vmem:[%s3367_s1 + $0xc0] sm:$0xff] }
 0xfea   :  { %v1260_v19 = vcvt.s32.f32 %v1258_v18  ;;  %v1259_v23 = vcvt.s32.f32 %v1257_v21  ;;  %v3060_v18 = vld [vmem:[%s3367_s1 + $0xb8] sm:$0xff]  ;;  %v3072_v21 = vld [vmem:[%s3367_s1 + $0xa8] sm:$0xff] }
 0xfec   :  { %1261 = vmax.xlane.f32.xlu0 %v1260_v19 }
0x105f   :  { %v1262_v22 = vpop.xlane.xlu0 %1261 }
0x1060   :  { %vm1263_vm8 = vcmp.eq.f32.partialorder %v1260_v19, %v1262_v22  ;;  %v1268_v25 = vcvt.f32.s32 %v1262_v22  ;;  %v3066_v19 = vld [vmem:[%s3367_s1 + $0xb0] sm:$0xff] }
0x1061   :  { %v1264_v24 = vsel %vm1263_vm8, %v1259_v23, -inf }
0x1062   :  { %1265 = vmax.xlane.f32.xlu1 %v1264_v24  ;;  %v1269_v27 = vshll.u32 %v1268_v25, 16 }
0x10d5   :  { %v1266_v26 = vpop.xlane.xlu1 %1265 }
0x10d6   :  { %v1267_v29 = vcvt.f32.s32 %v1266_v26 }
0x10d8   :  { %v1270_v37 = vadd.s32 %v1269_v27, %v1267_v29 }
0x10da   :  { %v1271_v39 = vand.u32 255, %v1270_v37 }
0x10dc   :  { %v1272_v40 = vsub.s32 63, %v1271_v39 }
0x10de   :  { %v1274_v41 = vsel %vm1273_vm9, %v1272_v40, %v1216_v62  ;;  %vm1275_vm10 = vcmp.eq.s32.totalorder %v2769_v17, %v1272_v40 }
0x10df   :  { %vm2330_vm11 = vmpackc.low %vm1275_vm10, %vm1275_vm10  ;;  %vm1447_vm10 = vcmp.eq.s32.totalorder %v2769_v17, 9 }
0x10e0   :  { %2331 = vmatmul.msk.bf16.vlgmr.msrb.gmra.mxu3 %vm2330_vm11, %v2521_v52 }
0x10e1   :  { %1453 = vmatpush.bf16.msrb.mxu3 %v2788_v30 }
0x10e5   :  { %1454 = vmatpush.bf16.msrb.mxu3 %v2794_v32 }
0x10e9   :  { %1455 = vmatpush.bf16.msrb.mxu3 %v2802_v33 }
0x10ed   :  { %1456 = vmatpush.bf16.msrb.mxu3 %v2810_v34 }
0x10f1   :  { %1457 = vmatpush.bf16.msrb.mxu3 %v2818_v35 }
0x10f5   :  { %1458 = vmatpush.bf16.msrb.mxu3 %v2826_v36 }
0x10f9   :  { %1459 = vmatpush.bf16.msrb.mxu3 %v2836_v42 }
0x10fd   :  { %1460 = vmatpush.bf16.msrb.mxu3 %v2844_v43 }
0x1163   :  { %v1288_v44 = vpop.f32.mrf.mxu3 }
0x1164   :  { %v1289_v45 = vadd.f32 %v1288_v44, %v1246_v8 }
0x1166   :  { %2451 = vtanh.f32 %v1289_v45 }
0x116b   :  { %v1290_v47 = vpop.f32.mrf.mxu3 }
0x116c   :  { %v2452_v48 = vpop.eup %2451 }
0x116d   :  { %v1293_v49 = vpack.c.bf16 %v2452_v48, %v2452_v48 }
0x116f   :  { %1302 = vmatmul.bf16.vlgmr.msrb.gmra.mxu1 %v1293_v49 }
0x1170   :  { %1468 = vmatpush.bf16.msrb.mxu1 %v2706_v28 }
0x1174   :  { %1469 = vmatpush.bf16.msrb.mxu1 %v2712_v31 }
0x1178   :  { %1470 = vmatpush.bf16.msrb.mxu1 %v2720_v38 }
0x117c   :  { %1471 = vmatpush.bf16.msrb.mxu1 %v2728_v46 }
0x1180   :  { %1472 = vmatpush.bf16.msrb.mxu1 %v2735_v51 }
0x1184   :  { %1473 = vmatpush.bf16.msrb.mxu1 %v2743_v5 }
0x1188   :  { %1474 = vmatpush.bf16.msrb.mxu1 %v2750_v6 }
0x118c   :  { %1475 = vmatpush.bf16.msrb.mxu1 %v2757_v7 }
0x11ec   :  { %v1303_v50 = vpop.f32.mrf.mxu1 }
0x11ed   :  { %v1304_v56 = vadd.f32 %v2767_v15, %v1303_v50 }
0x11ef   :  { %vm1308_vm12 = vcmp.lt.s32.totalorder %v1304_v56, 0  ;;  %v1309_v53 = vxor.u32 2147483647, %v1304_v56 }
0x11f1   :  { %v1310_v28 = vsel %vm1308_vm12, %v1309_v53, %v1304_v56 }
0x11f2   :  { %v1311_v54 = vand.u32 4294967040, %v1310_v28 }
0x11f4   :  { %v1305_v31 = vpop.f32.mrf.mxu1  ;;  %v1312_v38 = vor.u32 %v1311_v54, %v2777_v20 }
0x11f6   :  { %v1313_v46 = vsel %vm787_vm4, %v1312_v38, 2147483648 }
0x11f7   :  { %v1314_v51 = vsel %vm859_vm5, %v1313_v46, 2147483648 }
0x11f8   :  { %v1316_v55 = vshra.s32 %v1314_v51, 16  ;;  %v1315_v58 = vand.u32 65535, %v1314_v51 }
0x11fa   :  { %v1318_v57 = vcvt.s32.f32 %v1316_v55  ;;  %v1317_v60 = vcvt.s32.f32 %v1315_v58 }
0x11fc   :  { %1319 = vmax.xlane.f32.xlu2 %v1318_v57 }
0x126f   :  { %v1320_v59 = vpop.xlane.xlu2 %1319 }
0x1270   :  { %vm1321_vm13 = vcmp.eq.f32.partialorder %v1318_v57, %v1320_v59  ;;  %v1326_v62 = vcvt.f32.s32 %v1320_v59 }
0x1271   :  { %v1322_v61 = vsel %vm1321_vm13, %v1317_v60, -inf }
0x1272   :  { %1323 = vmax.xlane.f32.xlu0 %v1322_v61  ;;  %v1327_v0 = vshll.u32 %v1326_v62, 16 }
0x12e5   :  { %v1324_v63 = vpop.xlane.xlu0 %1323 }
0x12e6   :  { %v1325_v1 = vcvt.f32.s32 %v1324_v63 }
0x12e8   :  { %v1328_v2 = vadd.s32 %v1327_v0, %v1325_v1 }
0x12ea   :  { %v1329_v3 = vand.u32 255, %v1328_v2 }
0x12ec   :  { %v1330_v4 = vsub.s32 63, %v1329_v3 }
0x12ee   :  { %v1332_v8 = vsel %vm1331_vm14, %v1330_v4, %v1274_v41  ;;  %vm1333_vm15 = vcmp.eq.s32.totalorder %v2769_v17, %v1330_v4 }
0x12ef   :  { %vm2333_vm0 = vmpackc.low %vm1333_vm15, %vm1333_vm15  ;;  %vm1505_vm15 = vcmp.eq.s32.totalorder %v2769_v17, 10 }
0x12f0   :  { %2334 = vmatmul.msk.bf16.vlgmr.msra.gmra.mxu2 %vm2333_vm0, %v2521_v52 }
0x12f1   :  { %1511 = vmatpush.bf16.msra.mxu2 %v2788_v30 }
0x12f5   :  { %1512 = vmatpush.bf16.msra.mxu2 %v2794_v32 }
0x12f9   :  { %1513 = vmatpush.bf16.msra.mxu2 %v2802_v33 }
0x12fd   :  { %1514 = vmatpush.bf16.msra.mxu2 %v2810_v34 }
0x1301   :  { %1515 = vmatpush.bf16.msra.mxu2 %v2818_v35 }
0x1305   :  { %1516 = vmatpush.bf16.msra.mxu2 %v2826_v36 }
0x1309   :  { %1517 = vmatpush.bf16.msra.mxu2 %v2836_v42 }
0x130d   :  { %1518 = vmatpush.bf16.msra.mxu2 %v2844_v43 }
0x1373   :  { %v1346_v9 = vpop.f32.mrf.mxu2 }
0x1374   :  { %v1347_v10 = vadd.f32 %v1346_v9, %v1304_v56 }
0x1376   :  { %2453 = vtanh.f32 %v1347_v10 }
0x137b   :  { %v1348_v11 = vpop.f32.mrf.mxu2 }
0x137c   :  { %v2454_v12 = vpop.eup %2453 }
0x137d   :  { %v1351_v13 = vpack.c.bf16 %v2454_v12, %v2454_v12 }
0x137f   :  { %1360 = vmatmul.bf16.vlgmr.msra.gmra.mxu3 %v1351_v13  ;;  %v3135_v13 = vld [vmem:[%s3367_s1 + $0x88] sm:$0xff] }
0x1380   :  { %1526 = vmatpush.bf16.msra.mxu3 %v3048_v14 }
0x1384   :  { %1527 = vmatpush.bf16.msra.mxu3 %v3054_v16 }
0x1388   :  { %1528 = vmatpush.bf16.msra.mxu3 %v3060_v18 }
0x138c   :  { %1529 = vmatpush.bf16.msra.mxu3 %v3066_v19 }
0x1390   :  { %1530 = vmatpush.bf16.msra.mxu3 %v3072_v21 }
0x1394   :  { %1531 = vmatpush.bf16.msra.mxu3 %v2743_v5 }
0x1398   :  { %1532 = vmatpush.bf16.msra.mxu3 %v2750_v6 }
0x139c   :  { %1533 = vmatpush.bf16.msra.mxu3 %v2757_v7 }
0x1402   :  { %v1361_v22 = vpop.f32.mrf.mxu3 }
0x1403   :  { %v1362_v23 = vadd.f32 %v2767_v15, %v1361_v22  ;;  %v3141_v22 = vld [vmem:[%s3367_s1 + $0x80] sm:$0xff] }
0x1405   :  { %vm1366_vm1 = vcmp.lt.s32.totalorder %v1362_v23, 0  ;;  %v1367_v24 = vxor.u32 2147483647, %v1362_v23 }
0x1407   :  { %v1368_v25 = vsel %vm1366_vm1, %v1367_v24, %v1362_v23  ;;  %v3153_v24 = vld [vmem:[%s3367_s1 + $0x70] sm:$0xff] }
0x1408   :  { %v1369_v26 = vand.u32 4294967040, %v1368_v25  ;;  %v3159_v25 = vld [vmem:[%s3367_s1 + $0x68] sm:$0xff] }
0x140a   :  { %v1363_v27 = vpop.f32.mrf.mxu3  ;;  %v1370_v29 = vor.u32 %v1369_v26, %v2777_v20  ;;  %v3165_v26 = vld [vmem:[%s3367_s1 + $0x60] sm:$0xff] }
0x140b   :  { %v3171_v27 = vld [vmem:[%s3367_s1 + $0x58] sm:$0xff] }
0x140c   :  { %v1371_v37 = vsel %vm787_vm4, %v1370_v29, 2147483648  ;;  %v3177_v29 = vld [vmem:[%s3367_s1 + $0x50] sm:$0xff] }
0x140d   :  { %v1372_v39 = vsel %vm859_vm5, %v1371_v37, 2147483648 }
0x140e   :  { %v1374_v5 = vshra.s32 %v1372_v39, 16  ;;  %v1373_v6 = vand.u32 65535, %v1372_v39 }
0x1410   :  { %v1376_v40 = vcvt.s32.f32 %v1374_v5  ;;  %v1375_v41 = vcvt.s32.f32 %v1373_v6 }
0x1412   :  { %1377 = vmax.xlane.f32.xlu1 %v1376_v40 }
0x1485   :  { %v1378_v7 = vpop.xlane.xlu1 %1377 }
0x1486   :  { %vm1379_vm2 = vcmp.eq.f32.partialorder %v1376_v40, %v1378_v7  ;;  %v1384_v44 = vcvt.f32.s32 %v1378_v7 }
0x1487   :  { %v1380_v15 = vsel %vm1379_vm2, %v1375_v41, -inf }
0x1488   :  { %1381 = vmax.xlane.f32.xlu2 %v1380_v15  ;;  %v1385_v47 = vshll.u32 %v1384_v44, 16 }
0x14fb   :  { %v1382_v45 = vpop.xlane.xlu2 %1381 }
0x14fc   :  { %v1383_v48 = vcvt.f32.s32 %v1382_v45 }
0x14fe   :  { %v1386_v49 = vadd.s32 %v1385_v47, %v1383_v48 }
0x1500   :  { %v1387_v50 = vand.u32 255, %v1386_v49 }
0x1502   :  { %v1388_v56 = vsub.s32 63, %v1387_v50 }
0x1504   :  { %v1390_v53 = vsel %vm1389_vm3, %v1388_v56, %v1332_v8  ;;  %vm1391_vm6 = vcmp.eq.s32.totalorder %v2769_v17, %v1388_v56 }
0x1505   :  { %vm2336_vm7 = vmpackc.low %vm1391_vm6, %vm1391_vm6  ;;  %vm1563_vm6 = vcmp.eq.s32.totalorder %v2769_v17, 11 }
0x1506   :  { %2337 = vmatmul.msk.bf16.vlgmr.msra.gmra.mxu1 %vm2336_vm7, %v2521_v52 }
0x1507   :  { %1569 = vmatpush.bf16.msra.mxu1 %v2788_v30 }
0x150b   :  { %1570 = vmatpush.bf16.msra.mxu1 %v2794_v32  ;;  %v3102_v32 = vld [vmem:[%s3367_s1 + $0xa0] sm:$0xff] }
0x150f   :  { %1571 = vmatpush.bf16.msra.mxu1 %v2802_v33  ;;  %v3108_v33 = vld [vmem:[%s3367_s1 + $0x98] sm:$0xff] }
0x1513   :  { %1572 = vmatpush.bf16.msra.mxu1 %v2810_v34  ;;  %v3114_v34 = vld [vmem:[%s3367_s1 + $0x90] sm:$0xff] }
0x1517   :  { %1573 = vmatpush.bf16.msra.mxu1 %v2818_v35 }
0x151b   :  { %1574 = vmatpush.bf16.msra.mxu1 %v2826_v36  ;;  %v3120_v36 = vld [vmem:[%s3368_s2 + $0x1] ss:$0 sm:$0xff] }
0x151f   :  { %1575 = vmatpush.bf16.msra.mxu1 %v2836_v42 }
0x1523   :  { %1576 = vmatpush.bf16.msra.mxu1 %v2844_v43 }
0x1583   :  { %v1404_v28 = vpop.f32.mrf.mxu1 }
0x1584   :  { %v1405_v54 = vadd.f32 %v1404_v28, %v1362_v23  ;;  %v3147_v23 = vld [vmem:[%s3367_s1 + $0x78] sm:$0xff]  ;;  %s2522_s1 = smov [#allocation2]  }
0x1585   :  { %s2036_s26 = sshll.u32 %s2522_s1, 4  ;;  %s2037_s26 = int_to_ptr.vmem [resolvable:$true] %s2036_s26 }
0x1586   :  { %2455 = vtanh.f32 %v1405_v54 }
0x158b   :  { %v1406_v31 = vpop.f32.mrf.mxu1 }
0x158c   :  { %v2456_v38 = vpop.eup %2455 }
0x158d   :  { %v1409_v30 = vpack.c.bf16 %v2456_v38, %v2456_v38 }
0x158f   :  { %1418 = vmatmul.bf16.vlgmr.msrb.gmra.mxu2 %v1409_v30 }
0x1590   :  { %1584 = vmatpush.bf16.msrb.mxu2 %v3048_v14 }
0x1594   :  { %1585 = vmatpush.bf16.msrb.mxu2 %v3054_v16 }
0x1598   :  { %1586 = vmatpush.bf16.msrb.mxu2 %v3060_v18 }
0x159c   :  { %1587 = vmatpush.bf16.msrb.mxu2 %v3066_v19 }
0x15a0   :  { %1588 = vmatpush.bf16.msrb.mxu2 %v3072_v21 }
0x15a4   :  { %1589 = vmatpush.bf16.msrb.mxu2 %v3102_v32 }
0x15a8   :  { %1590 = vmatpush.bf16.msrb.mxu2 %v3108_v33 }
0x15ac   :  { %1591 = vmatpush.bf16.msrb.mxu2 %v3114_v34 }
0x1612   :  { %v1419_v35 = vpop.f32.mrf.mxu2 }
0x1613   :  { %v1420_v42 = vadd.f32 %v3120_v36, %v1419_v35 }
0x1615   :  { %vm1424_vm8 = vcmp.lt.s32.totalorder %v1420_v42, 0  ;;  %v1425_v43 = vxor.u32 2147483647, %v1420_v42 }
0x1617   :  { %v1426_v46 = vsel %vm1424_vm8, %v1425_v43, %v1420_v42 }
0x1618   :  { %v1427_v51 = vand.u32 4294967040, %v1426_v46 }
0x161a   :  { %v1421_v55 = vpop.f32.mrf.mxu2  ;;  %v1428_v57 = vor.u32 %v1427_v51, %v2777_v20 }
0x161c   :  { %v1429_v58 = vsel %vm787_vm4, %v1428_v57, 2147483648 }
0x161d   :  { %v1430_v59 = vsel %vm859_vm5, %v1429_v58, 2147483648 }
0x161e   :  { %v1432_v60 = vshra.s32 %v1430_v59, 16  ;;  %v1431_v62 = vand.u32 65535, %v1430_v59 }
0x1620   :  { %v1434_v61 = vcvt.s32.f32 %v1432_v60  ;;  %v1433_v0 = vcvt.s32.f32 %v1431_v62 }
0x1622   :  { %1435 = vmax.xlane.f32.xlu0 %v1434_v61 }
0x1695   :  { %v1436_v63 = vpop.xlane.xlu0 %1435 }
0x1696   :  { %vm1437_vm9 = vcmp.eq.f32.partialorder %v1434_v61, %v1436_v63  ;;  %v1442_v2 = vcvt.f32.s32 %v1436_v63 }
0x1697   :  { %v1438_v1 = vsel %vm1437_vm9, %v1433_v0, -inf }
0x1698   :  { %1439 = vmax.xlane.f32.xlu1 %v1438_v1  ;;  %v1443_v4 = vshll.u32 %v1442_v2, 16 }
0x170b   :  { %v1440_v3 = vpop.xlane.xlu1 %1439 }
0x170c   :  { %v1441_v8 = vcvt.f32.s32 %v1440_v3 }
0x170e   :  { %v1444_v9 = vadd.s32 %v1443_v4, %v1441_v8 }
0x1710   :  { %v1445_v10 = vand.u32 255, %v1444_v9 }
0x1712   :  { %v1446_v11 = vsub.s32 63, %v1445_v10 }
0x1714   :  { %v3128_v12 = vsel %vm1447_vm10, %v1446_v11, %v1390_v53  ;;  %vm1449_vm11 = vcmp.eq.s32.totalorder %v2769_v17, %v1446_v11 }
0x1715   :  { %vm2339_vm12 = vmpackc.low %vm1449_vm11, %vm1449_vm11  ;;  %vm1621_vm11 = vcmp.eq.s32.totalorder %v2769_v17, 12 }
0x1716   :  { %2340 = vmatmul.msk.bf16.vlgmr.msrb.gmra.mxu3 %vm2339_vm12, %v2521_v52 }
0x1717   :  { %1627 = vmatpush.bf16.msrb.mxu3 %v3135_v13 }
0x171b   :  { %1628 = vmatpush.bf16.msrb.mxu3 %v3141_v22 }
0x171f   :  { %1629 = vmatpush.bf16.msrb.mxu3 %v3147_v23 }
0x1723   :  { %1630 = vmatpush.bf16.msrb.mxu3 %v3153_v24 }
0x1727   :  { %1631 = vmatpush.bf16.msrb.mxu3 %v3159_v25 }
0x172b   :  { %1632 = vmatpush.bf16.msrb.mxu3 %v3165_v26 }
0x172f   :  { %1633 = vmatpush.bf16.msrb.mxu3 %v3171_v27 }
0x1733   :  { %1634 = vmatpush.bf16.msrb.mxu3 %v3177_v29 }
0x1799   :  { %v1462_v37 = vpop.f32.mrf.mxu3 }
0x179a   :  { %v1463_v39 = vadd.f32 %v1462_v37, %v1420_v42 }
0x179c   :  { %2457 = vtanh.f32 %v1463_v39 }
0x17a1   :  { %v1464_v5 = vpop.f32.mrf.mxu3 }
0x17a2   :  { %v2458_v40 = vpop.eup %2457 }
0x17a3   :  { %v1467_v6 = vpack.c.bf16 %v2458_v40, %v2458_v40 }
0x17a5   :  { %1476 = vmatmul.bf16.vlgmr.msrb.gmra.mxu1 %v1467_v6 }
0x17a6   :  { %1642 = vmatpush.bf16.msrb.mxu1 %v3048_v14 }
0x17aa   :  { %1643 = vmatpush.bf16.msrb.mxu1 %v3054_v16 }
0x17ae   :  { %1644 = vmatpush.bf16.msrb.mxu1 %v3060_v18 }
0x17b2   :  { %1645 = vmatpush.bf16.msrb.mxu1 %v3066_v19 }
0x17b6   :  { %1646 = vmatpush.bf16.msrb.mxu1 %v3072_v21 }
0x17ba   :  { %1647 = vmatpush.bf16.msrb.mxu1 %v3102_v32 }
0x17be   :  { %1648 = vmatpush.bf16.msrb.mxu1 %v3108_v33 }
0x17c2   :  { %1649 = vmatpush.bf16.msrb.mxu1 %v3114_v34 }
0x1822   :  { %v1477_v7 = vpop.f32.mrf.mxu1 }
0x1823   :  { %v1478_v41 = vadd.f32 %v3120_v36, %v1477_v7 }
0x1825   :  { %vm1482_vm13 = vcmp.lt.s32.totalorder %v1478_v41, 0  ;;  %v1483_v15 = vxor.u32 2147483647, %v1478_v41 }
0x1827   :  { %v1484_v44 = vsel %vm1482_vm13, %v1483_v15, %v1478_v41 }
0x1828   :  { %v1485_v45 = vand.u32 4294967040, %v1484_v44 }
0x182a   :  { %v1479_v47 = vpop.f32.mrf.mxu1  ;;  %v1486_v48 = vor.u32 %v1485_v45, %v2777_v20 }
0x182c   :  { %v1487_v49 = vsel %vm787_vm4, %v1486_v48, 2147483648 }
0x182d   :  { %v1488_v50 = vsel %vm859_vm5, %v1487_v49, 2147483648 }
0x182e   :  { %v1490_v56 = vshra.s32 %v1488_v50, 16  ;;  %v1489_v28 = vand.u32 65535, %v1488_v50 }
0x1830   :  { %v1492_v53 = vcvt.s32.f32 %v1490_v56  ;;  %v1491_v31 = vcvt.s32.f32 %v1489_v28 }
0x1832   :  { %1493 = vmax.xlane.f32.xlu2 %v1492_v53 }
0x18a5   :  { %v1494_v54 = vpop.xlane.xlu2 %1493 }
0x18a6   :  { %vm1495_vm14 = vcmp.eq.f32.partialorder %v1492_v53, %v1494_v54  ;;  %v1500_v30 = vcvt.f32.s32 %v1494_v54 }
0x18a7   :  { %v1496_v38 = vsel %vm1495_vm14, %v1491_v31, -inf }
0x18a8   :  { %1497 = vmax.xlane.f32.xlu0 %v1496_v38  ;;  %v1501_v42 = vshll.u32 %v1500_v30, 16 }
0x191b   :  { %v1498_v35 = vpop.xlane.xlu0 %1497 }
0x191c   :  { %v1499_v43 = vcvt.f32.s32 %v1498_v35 }
0x191e   :  { %v1502_v46 = vadd.s32 %v1501_v42, %v1499_v43 }
0x1920   :  { %v1503_v51 = vand.u32 255, %v1502_v46 }
0x1922   :  { %v1504_v55 = vsub.s32 63, %v1503_v51 }
0x1924   :  { %v1506_v57 = vsel %vm1505_vm15, %v1504_v55, %v3128_v12  ;;  %vm1507_vm0 = vcmp.eq.s32.totalorder %v2769_v17, %v1504_v55 }
0x1925   :  { %vm2342_vm1 = vmpackc.low %vm1507_vm0, %vm1507_vm0  ;;  %vm1679_vm0 = vcmp.eq.s32.totalorder %v2769_v17, 13 }
0x1926   :  { %2343 = vmatmul.msk.bf16.vlgmr.msra.gmra.mxu2 %vm2342_vm1, %v2521_v52 }
0x1927   :  { %1685 = vmatpush.bf16.msra.mxu2 %v3135_v13 }
0x192b   :  { %1686 = vmatpush.bf16.msra.mxu2 %v3141_v22 }
0x192f   :  { %1687 = vmatpush.bf16.msra.mxu2 %v3147_v23 }
0x1933   :  { %1688 = vmatpush.bf16.msra.mxu2 %v3153_v24 }
0x1937   :  { %1689 = vmatpush.bf16.msra.mxu2 %v3159_v25 }
0x193b   :  { %1690 = vmatpush.bf16.msra.mxu2 %v3165_v26 }
0x193f   :  { %1691 = vmatpush.bf16.msra.mxu2 %v3171_v27 }
0x1943   :  { %1692 = vmatpush.bf16.msra.mxu2 %v3177_v29 }
0x19a9   :  { %v1520_v58 = vpop.f32.mrf.mxu2 }
0x19aa   :  { %v1521_v59 = vadd.f32 %v1520_v58, %v1478_v41 }
0x19ac   :  { %2459 = vtanh.f32 %v1521_v59 }
0x19b1   :  { %v1522_v60 = vpop.f32.mrf.mxu2 }
0x19b2   :  { %v2460_v61 = vpop.eup %2459 }
0x19b3   :  { %v1525_v62 = vpack.c.bf16 %v2460_v61, %v2460_v61 }
0x19b5   :  { %1534 = vmatmul.bf16.vlgmr.msra.gmra.mxu3 %v1525_v62 }
0x19b6   :  { %1700 = vmatpush.bf16.msra.mxu3 %v3048_v14 }
0x19ba   :  { %1701 = vmatpush.bf16.msra.mxu3 %v3054_v16 }
0x19be   :  { %1702 = vmatpush.bf16.msra.mxu3 %v3060_v18 }
0x19c2   :  { %1703 = vmatpush.bf16.msra.mxu3 %v3066_v19 }
0x19c6   :  { %1704 = vmatpush.bf16.msra.mxu3 %v3072_v21 }
0x19ca   :  { %1705 = vmatpush.bf16.msra.mxu3 %v3102_v32 }
0x19ce   :  { %1706 = vmatpush.bf16.msra.mxu3 %v3108_v33 }
0x19d2   :  { %1707 = vmatpush.bf16.msra.mxu3 %v3114_v34 }
0x1a38   :  { %v1535_v63 = vpop.f32.mrf.mxu3 }
0x1a39   :  { %v1536_v0 = vadd.f32 %v3120_v36, %v1535_v63 }
0x1a3b   :  { %vm1540_vm2 = vcmp.lt.s32.totalorder %v1536_v0, 0  ;;  %v1541_v1 = vxor.u32 2147483647, %v1536_v0 }
0x1a3d   :  { %v1542_v2 = vsel %vm1540_vm2, %v1541_v1, %v1536_v0 }
0x1a3e   :  { %v1543_v3 = vand.u32 4294967040, %v1542_v2 }
0x1a40   :  { %v1537_v4 = vpop.f32.mrf.mxu3  ;;  %v1544_v8 = vor.u32 %v1543_v3, %v2777_v20 }
0x1a42   :  { %v1545_v9 = vsel %vm787_vm4, %v1544_v8, 2147483648 }
0x1a43   :  { %v1546_v10 = vsel %vm859_vm5, %v1545_v9, 2147483648 }
0x1a44   :  { %v1548_v11 = vshra.s32 %v1546_v10, 16  ;;  %v1547_v37 = vand.u32 65535, %v1546_v10 }
0x1a46   :  { %v1550_v12 = vcvt.s32.f32 %v1548_v11  ;;  %v1549_v5 = vcvt.s32.f32 %v1547_v37 }
0x1a48   :  { %1551 = vmax.xlane.f32.xlu1 %v1550_v12 }
0x1abb   :  { %v1552_v39 = vpop.xlane.xlu1 %1551 }
0x1abc   :  { %vm1553_vm3 = vcmp.eq.f32.partialorder %v1550_v12, %v1552_v39  ;;  %v1558_v6 = vcvt.f32.s32 %v1552_v39 }
0x1abd   :  { %v1554_v40 = vsel %vm1553_vm3, %v1549_v5, -inf }
0x1abe   :  { %1555 = vmax.xlane.f32.xlu2 %v1554_v40  ;;  %v1559_v41 = vshll.u32 %v1558_v6, 16 }
0x1b31   :  { %v1556_v7 = vpop.xlane.xlu2 %1555 }
0x1b32   :  { %v1557_v15 = vcvt.f32.s32 %v1556_v7 }
0x1b34   :  { %v1560_v44 = vadd.s32 %v1559_v41, %v1557_v15 }
0x1b36   :  { %v1561_v45 = vand.u32 255, %v1560_v44 }
0x1b38   :  { %v1562_v47 = vsub.s32 63, %v1561_v45 }
0x1b3a   :  { %v1564_v48 = vsel %vm1563_vm6, %v1562_v47, %v1506_v57  ;;  %vm1565_vm7 = vcmp.eq.s32.totalorder %v2769_v17, %v1562_v47 }
0x1b3b   :  { %vm2345_vm8 = vmpackc.low %vm1565_vm7, %vm1565_vm7  ;;  %vm1737_vm7 = vcmp.eq.s32.totalorder %v2769_v17, 14 }
0x1b3c   :  { %2346 = vmatmul.msk.bf16.vlgmr.msra.gmra.mxu1 %vm2345_vm8, %v2521_v52 }
0x1b3d   :  { %1743 = vmatpush.bf16.msra.mxu1 %v3135_v13 }
0x1b41   :  { %1744 = vmatpush.bf16.msra.mxu1 %v3141_v22 }
0x1b45   :  { %1745 = vmatpush.bf16.msra.mxu1 %v3147_v23 }
0x1b49   :  { %1746 = vmatpush.bf16.msra.mxu1 %v3153_v24 }
0x1b4d   :  { %1747 = vmatpush.bf16.msra.mxu1 %v3159_v25 }
0x1b51   :  { %1748 = vmatpush.bf16.msra.mxu1 %v3165_v26 }
0x1b55   :  { %1749 = vmatpush.bf16.msra.mxu1 %v3171_v27 }
0x1b59   :  { %1750 = vmatpush.bf16.msra.mxu1 %v3177_v29 }
0x1bb9   :  { %v1578_v49 = vpop.f32.mrf.mxu1 }
0x1bba   :  { %v1579_v50 = vadd.f32 %v1578_v49, %v1536_v0 }
0x1bbc   :  { %2461 = vtanh.f32 %v1579_v50 }
0x1bc1   :  { %v1580_v56 = vpop.f32.mrf.mxu1 }
0x1bc2   :  { %v2462_v53 = vpop.eup %2461 }
0x1bc3   :  { %v1583_v28 = vpack.c.bf16 %v2462_v53, %v2462_v53 }
0x1bc5   :  { %1592 = vmatmul.bf16.vlgmr.msrb.gmra.mxu2 %v1583_v28 }
0x1bc6   :  { %1758 = vmatpush.bf16.msrb.mxu2 %v3048_v14 }
0x1bca   :  { %1759 = vmatpush.bf16.msrb.mxu2 %v3054_v16 }
0x1bce   :  { %1760 = vmatpush.bf16.msrb.mxu2 %v3060_v18 }
0x1bd2   :  { %1761 = vmatpush.bf16.msrb.mxu2 %v3066_v19 }
0x1bd6   :  { %1762 = vmatpush.bf16.msrb.mxu2 %v3072_v21 }
0x1bda   :  { %1763 = vmatpush.bf16.msrb.mxu2 %v3102_v32 }
0x1bde   :  { %1764 = vmatpush.bf16.msrb.mxu2 %v3108_v33 }
0x1be2   :  { %1765 = vmatpush.bf16.msrb.mxu2 %v3114_v34 }
0x1c48   :  { %v1593_v54 = vpop.f32.mrf.mxu2 }
0x1c49   :  { %v1594_v31 = vadd.f32 %v3120_v36, %v1593_v54 }
0x1c4b   :  { %vm1598_vm9 = vcmp.lt.s32.totalorder %v1594_v31, 0  ;;  %v1599_v38 = vxor.u32 2147483647, %v1594_v31 }
0x1c4d   :  { %v1600_v30 = vsel %vm1598_vm9, %v1599_v38, %v1594_v31 }
0x1c4e   :  { %v1601_v35 = vand.u32 4294967040, %v1600_v30 }
0x1c50   :  { %v1595_v42 = vpop.f32.mrf.mxu2  ;;  %v1602_v43 = vor.u32 %v1601_v35, %v2777_v20 }
0x1c52   :  { %v1603_v46 = vsel %vm787_vm4, %v1602_v43, 2147483648 }
0x1c53   :  { %v1604_v51 = vsel %vm859_vm5, %v1603_v46, 2147483648 }
0x1c54   :  { %v1606_v55 = vshra.s32 %v1604_v51, 16  ;;  %v1605_v58 = vand.u32 65535, %v1604_v51 }
0x1c56   :  { %v1608_v57 = vcvt.s32.f32 %v1606_v55  ;;  %v1607_v60 = vcvt.s32.f32 %v1605_v58 }
0x1c58   :  { %1609 = vmax.xlane.f32.xlu0 %v1608_v57 }
0x1ccb   :  { %v1610_v59 = vpop.xlane.xlu0 %1609 }
0x1ccc   :  { %vm1611_vm10 = vcmp.eq.f32.partialorder %v1608_v57, %v1610_v59  ;;  %v1616_v62 = vcvt.f32.s32 %v1610_v59 }
0x1ccd   :  { %v1612_v61 = vsel %vm1611_vm10, %v1607_v60, -inf }
0x1cce   :  { %1613 = vmax.xlane.f32.xlu1 %v1612_v61  ;;  %v1617_v0 = vshll.u32 %v1616_v62, 16 }
0x1d41   :  { %v1614_v63 = vpop.xlane.xlu1 %1613 }
0x1d42   :  { %v1615_v1 = vcvt.f32.s32 %v1614_v63 }
0x1d44   :  { %v1618_v2 = vadd.s32 %v1617_v0, %v1615_v1 }
0x1d46   :  { %v1619_v3 = vand.u32 255, %v1618_v2 }
0x1d48   :  { %v1620_v4 = vsub.s32 63, %v1619_v3 }
0x1d4a   :  { %v1622_v8 = vsel %vm1621_vm11, %v1620_v4, %v1564_v48  ;;  %vm1623_vm12 = vcmp.eq.s32.totalorder %v2769_v17, %v1620_v4 }
0x1d4b   :  { %vm2348_vm13 = vmpackc.low %vm1623_vm12, %vm1623_vm12  ;;  %vm1795_vm12 = vcmp.eq.s32.totalorder %v2769_v17, 15 }
0x1d4c   :  { %2349 = vmatmul.msk.bf16.vlgmr.msrb.gmra.mxu3 %vm2348_vm13, %v2521_v52 }
0x1d4d   :  { %1801 = vmatpush.bf16.msrb.mxu3 %v3135_v13 }
0x1d51   :  { %1802 = vmatpush.bf16.msrb.mxu3 %v3141_v22 }
0x1d55   :  { %1803 = vmatpush.bf16.msrb.mxu3 %v3147_v23 }
0x1d59   :  { %1804 = vmatpush.bf16.msrb.mxu3 %v3153_v24 }
0x1d5d   :  { %1805 = vmatpush.bf16.msrb.mxu3 %v3159_v25 }
0x1d61   :  { %1806 = vmatpush.bf16.msrb.mxu3 %v3165_v26 }
0x1d65   :  { %1807 = vmatpush.bf16.msrb.mxu3 %v3171_v27 }
0x1d69   :  { %1808 = vmatpush.bf16.msrb.mxu3 %v3177_v29 }
0x1dcf   :  { %v1636_v9 = vpop.f32.mrf.mxu3 }
0x1dd0   :  { %v1637_v10 = vadd.f32 %v1636_v9, %v1594_v31 }
0x1dd2   :  { %2463 = vtanh.f32 %v1637_v10 }
0x1dd7   :  { %v1638_v11 = vpop.f32.mrf.mxu3 }
0x1dd8   :  { %v2464_v12 = vpop.eup %2463 }
0x1dd9   :  { %v1641_v37 = vpack.c.bf16 %v2464_v12, %v2464_v12 }
0x1ddb   :  { %1650 = vmatmul.bf16.vlgmr.msrb.gmra.mxu1 %v1641_v37 }
0x1ddc   :  { %1816 = vmatpush.bf16.msrb.mxu1 %v3048_v14 }
0x1de0   :  { %1817 = vmatpush.bf16.msrb.mxu1 %v3054_v16 }
0x1de4   :  { %1818 = vmatpush.bf16.msrb.mxu1 %v3060_v18 }
0x1de8   :  { %1819 = vmatpush.bf16.msrb.mxu1 %v3066_v19 }
0x1dec   :  { %1820 = vmatpush.bf16.msrb.mxu1 %v3072_v21 }
0x1df0   :  { %1821 = vmatpush.bf16.msrb.mxu1 %v3102_v32 }
0x1df4   :  { %1822 = vmatpush.bf16.msrb.mxu1 %v3108_v33 }
0x1df8   :  { %1823 = vmatpush.bf16.msrb.mxu1 %v3114_v34 }
0x1e58   :  { %v1651_v39 = vpop.f32.mrf.mxu1 }
0x1e59   :  { %v1652_v5 = vadd.f32 %v3120_v36, %v1651_v39 }
0x1e5b   :  { %vm1656_vm14 = vcmp.lt.s32.totalorder %v1652_v5, 0  ;;  %v1657_v40 = vxor.u32 2147483647, %v1652_v5 }
0x1e5d   :  { %v1658_v6 = vsel %vm1656_vm14, %v1657_v40, %v1652_v5 }
0x1e5e   :  { %v1659_v7 = vand.u32 4294967040, %v1658_v6 }
0x1e60   :  { %v1653_v41 = vpop.f32.mrf.mxu1  ;;  %v1660_v15 = vor.u32 %v1659_v7, %v2777_v20 }
0x1e62   :  { %v1661_v44 = vsel %vm787_vm4, %v1660_v15, 2147483648 }
0x1e63   :  { %v1662_v45 = vsel %vm859_vm5, %v1661_v44, 2147483648 }
0x1e64   :  { %v1664_v47 = vshra.s32 %v1662_v45, 16  ;;  %v1663_v49 = vand.u32 65535, %v1662_v45 }
0x1e66   :  { %v1666_v48 = vcvt.s32.f32 %v1664_v47  ;;  %v1665_v56 = vcvt.s32.f32 %v1663_v49 }
0x1e68   :  { %1667 = vmax.xlane.f32.xlu2 %v1666_v48 }
0x1edb   :  { %v1668_v50 = vpop.xlane.xlu2 %1667 }
0x1edc   :  { %vm1669_vm15 = vcmp.eq.f32.partialorder %v1666_v48, %v1668_v50  ;;  %v1674_v28 = vcvt.f32.s32 %v1668_v50 }
0x1edd   :  { %v1670_v53 = vsel %vm1669_vm15, %v1665_v56, -inf }
0x1ede   :  { %1671 = vmax.xlane.f32.xlu0 %v1670_v53  ;;  %v1675_v31 = vshll.u32 %v1674_v28, 16 }
0x1f51   :  { %v1672_v54 = vpop.xlane.xlu0 %1671 }
0x1f52   :  { %v1673_v38 = vcvt.f32.s32 %v1672_v54 }
0x1f54   :  { %v1676_v30 = vadd.s32 %v1675_v31, %v1673_v38 }
0x1f56   :  { %v1677_v35 = vand.u32 255, %v1676_v30 }
0x1f58   :  { %v1678_v42 = vsub.s32 63, %v1677_v35 }
0x1f5a   :  { %v1680_v43 = vsel %vm1679_vm0, %v1678_v42, %v1622_v8  ;;  %vm1681_vm1 = vcmp.eq.s32.totalorder %v2769_v17, %v1678_v42 }
0x1f5b   :  { %vm2351_vm2 = vmpackc.low %vm1681_vm1, %vm1681_vm1  ;;  %vm1853_vm1 = vcmp.eq.s32.totalorder %v2769_v17, 16 }
0x1f5c   :  { %2352 = vmatmul.msk.bf16.vlgmr.msra.gmra.mxu2 %vm2351_vm2, %v2521_v52 }
0x1f5d   :  { %1859 = vmatpush.bf16.msra.mxu2 %v3135_v13 }
0x1f61   :  { %1860 = vmatpush.bf16.msra.mxu2 %v3141_v22 }
0x1f65   :  { %1861 = vmatpush.bf16.msra.mxu2 %v3147_v23 }
0x1f69   :  { %1862 = vmatpush.bf16.msra.mxu2 %v3153_v24 }
0x1f6d   :  { %1863 = vmatpush.bf16.msra.mxu2 %v3159_v25 }
0x1f71   :  { %1864 = vmatpush.bf16.msra.mxu2 %v3165_v26 }
0x1f75   :  { %1865 = vmatpush.bf16.msra.mxu2 %v3171_v27 }
0x1f79   :  { %1866 = vmatpush.bf16.msra.mxu2 %v3177_v29 }
0x1fdf   :  { %v1694_v46 = vpop.f32.mrf.mxu2 }
0x1fe0   :  { %v1695_v51 = vadd.f32 %v1694_v46, %v1652_v5 }
0x1fe2   :  { %2465 = vtanh.f32 %v1695_v51 }
0x1fe7   :  { %v1696_v55 = vpop.f32.mrf.mxu2 }
0x1fe8   :  { %v2466_v57 = vpop.eup %2465 }
0x1fe9   :  { %v1699_v58 = vpack.c.bf16 %v2466_v57, %v2466_v57 }
0x1feb   :  { %1708 = vmatmul.bf16.vlgmr.msra.gmra.mxu3 %v1699_v58 }
0x1fec   :  { %1874 = vmatpush.bf16.msra.mxu3 %v3048_v14 }
0x1ff0   :  { %1875 = vmatpush.bf16.msra.mxu3 %v3054_v16 }
0x1ff4   :  { %1876 = vmatpush.bf16.msra.mxu3 %v3060_v18 }
0x1ff8   :  { %1877 = vmatpush.bf16.msra.mxu3 %v3066_v19 }
0x1ffc   :  { %1878 = vmatpush.bf16.msra.mxu3 %v3072_v21 }
0x2000   :  { %1879 = vmatpush.bf16.msra.mxu3 %v3102_v32 }
0x2004   :  { %1880 = vmatpush.bf16.msra.mxu3 %v3108_v33 }
0x2008   :  { %1881 = vmatpush.bf16.msra.mxu3 %v3114_v34 }
0x206e   :  { %v1709_v59 = vpop.f32.mrf.mxu3 }
0x206f   :  { %v1710_v60 = vadd.f32 %v3120_v36, %v1709_v59 }
0x2071   :  { %vm1714_vm3 = vcmp.lt.s32.totalorder %v1710_v60, 0  ;;  %v1715_v61 = vxor.u32 2147483647, %v1710_v60 }
0x2073   :  { %v1716_v62 = vsel %vm1714_vm3, %v1715_v61, %v1710_v60 }
0x2074   :  { %v1717_v63 = vand.u32 4294967040, %v1716_v62 }
0x2076   :  { %v1711_v0 = vpop.f32.mrf.mxu3  ;;  %v1718_v1 = vor.u32 %v1717_v63, %v2777_v20 }
0x2078   :  { %v1719_v2 = vsel %vm787_vm4, %v1718_v1, 2147483648 }
0x2079   :  { %v1720_v3 = vsel %vm859_vm5, %v1719_v2, 2147483648 }
0x207a   :  { %v1722_v4 = vshra.s32 %v1720_v3, 16  ;;  %v1721_v9 = vand.u32 65535, %v1720_v3 }
0x207c   :  { %v1724_v8 = vcvt.s32.f32 %v1722_v4  ;;  %v1723_v11 = vcvt.s32.f32 %v1721_v9 }
0x207e   :  { %1725 = vmax.xlane.f32.xlu1 %v1724_v8 }
0x20f1   :  { %v1726_v10 = vpop.xlane.xlu1 %1725 }
0x20f2   :  { %vm1727_vm6 = vcmp.eq.f32.partialorder %v1724_v8, %v1726_v10  ;;  %v1732_v37 = vcvt.f32.s32 %v1726_v10 }
0x20f3   :  { %v1728_v12 = vsel %vm1727_vm6, %v1723_v11, -inf }
0x20f4   :  { %1729 = vmax.xlane.f32.xlu2 %v1728_v12  ;;  %v1733_v5 = vshll.u32 %v1732_v37, 16 }
0x2167   :  { %v1730_v39 = vpop.xlane.xlu2 %1729 }
0x2168   :  { %v1731_v40 = vcvt.f32.s32 %v1730_v39 }
0x216a   :  { %v1734_v6 = vadd.s32 %v1733_v5, %v1731_v40 }
0x216c   :  { %v1735_v7 = vand.u32 255, %v1734_v6 }
0x216e   :  { %v1736_v41 = vsub.s32 63, %v1735_v7 }
0x2170   :  { %v1738_v15 = vsel %vm1737_vm7, %v1736_v41, %v1680_v43  ;;  %vm1739_vm8 = vcmp.eq.s32.totalorder %v2769_v17, %v1736_v41 }
0x2171   :  { %vm2354_vm9 = vmpackc.low %vm1739_vm8, %vm1739_vm8  ;;  %vm1911_vm8 = vcmp.eq.s32.totalorder %v2769_v17, 17 }
0x2172   :  { %2355 = vmatmul.msk.bf16.vlgmr.msra.gmra.mxu1 %vm2354_vm9, %v2521_v52 }
0x2173   :  { %1917 = vmatpush.bf16.msra.mxu1 %v3135_v13 }
0x2177   :  { %1918 = vmatpush.bf16.msra.mxu1 %v3141_v22 }
0x217b   :  { %1919 = vmatpush.bf16.msra.mxu1 %v3147_v23 }
0x217f   :  { %1920 = vmatpush.bf16.msra.mxu1 %v3153_v24 }
0x2183   :  { %1921 = vmatpush.bf16.msra.mxu1 %v3159_v25 }
0x2187   :  { %1922 = vmatpush.bf16.msra.mxu1 %v3165_v26 }
0x218b   :  { %1923 = vmatpush.bf16.msra.mxu1 %v3171_v27 }
0x218f   :  { %1924 = vmatpush.bf16.msra.mxu1 %v3177_v29 }
0x21ef   :  { %v1752_v44 = vpop.f32.mrf.mxu1 }
0x21f0   :  { %v1753_v45 = vadd.f32 %v1752_v44, %v1710_v60 }
0x21f2   :  { %2467 = vtanh.f32 %v1753_v45 }
0x21f7   :  { %v1754_v47 = vpop.f32.mrf.mxu1 }
0x21f8   :  { %v2468_v48 = vpop.eup %2467 }
0x21f9   :  { %v1757_v49 = vpack.c.bf16 %v2468_v48, %v2468_v48 }
0x21fb   :  { %1766 = vmatmul.bf16.vlgmr.msrb.gmra.mxu2 %v1757_v49 }
0x21fc   :  { %1932 = vmatpush.bf16.msrb.mxu2 %v3048_v14 }
0x2200   :  { %1933 = vmatpush.bf16.msrb.mxu2 %v3054_v16 }
0x2204   :  { %1934 = vmatpush.bf16.msrb.mxu2 %v3060_v18 }
0x2208   :  { %1935 = vmatpush.bf16.msrb.mxu2 %v3066_v19 }
0x220c   :  { %1936 = vmatpush.bf16.msrb.mxu2 %v3072_v21 }
0x2210   :  { %1937 = vmatpush.bf16.msrb.mxu2 %v3102_v32 }
0x2214   :  { %1938 = vmatpush.bf16.msrb.mxu2 %v3108_v33 }
0x2218   :  { %1939 = vmatpush.bf16.msrb.mxu2 %v3114_v34 }
0x227e   :  { %v1767_v50 = vpop.f32.mrf.mxu2 }
0x227f   :  { %v1768_v56 = vadd.f32 %v3120_v36, %v1767_v50 }
0x2281   :  { %vm1772_vm10 = vcmp.lt.s32.totalorder %v1768_v56, 0  ;;  %v1773_v53 = vxor.u32 2147483647, %v1768_v56 }
0x2283   :  { %v1774_v28 = vsel %vm1772_vm10, %v1773_v53, %v1768_v56 }
0x2284   :  { %v1775_v54 = vand.u32 4294967040, %v1774_v28 }
0x2286   :  { %v1769_v31 = vpop.f32.mrf.mxu2  ;;  %v1776_v38 = vor.u32 %v1775_v54, %v2777_v20 }
0x2288   :  { %v1777_v30 = vsel %vm787_vm4, %v1776_v38, 2147483648 }
0x2289   :  { %v1778_v35 = vsel %vm859_vm5, %v1777_v30, 2147483648 }
0x228a   :  { %v1780_v42 = vshra.s32 %v1778_v35, 16  ;;  %v1779_v46 = vand.u32 65535, %v1778_v35 }
0x228c   :  { %v1782_v43 = vcvt.s32.f32 %v1780_v42  ;;  %v1781_v55 = vcvt.s32.f32 %v1779_v46 }
0x228e   :  { %1783 = vmax.xlane.f32.xlu0 %v1782_v43 }
0x2301   :  { %v1784_v51 = vpop.xlane.xlu0 %1783 }
0x2302   :  { %vm1785_vm11 = vcmp.eq.f32.partialorder %v1782_v43, %v1784_v51  ;;  %v1790_v58 = vcvt.f32.s32 %v1784_v51 }
0x2303   :  { %v1786_v57 = vsel %vm1785_vm11, %v1781_v55, -inf }
0x2304   :  { %1787 = vmax.xlane.f32.xlu1 %v1786_v57  ;;  %v1791_v60 = vshll.u32 %v1790_v58, 16 }
0x2377   :  { %v1788_v59 = vpop.xlane.xlu1 %1787 }
0x2378   :  { %v1789_v61 = vcvt.f32.s32 %v1788_v59 }
0x237a   :  { %v1792_v62 = vadd.s32 %v1791_v60, %v1789_v61 }
0x237c   :  { %v1793_v63 = vand.u32 255, %v1792_v62 }
0x237e   :  { %v1794_v0 = vsub.s32 63, %v1793_v63 }
0x2380   :  { %v1796_v1 = vsel %vm1795_vm12, %v1794_v0, %v1738_v15  ;;  %vm1797_vm13 = vcmp.eq.s32.totalorder %v2769_v17, %v1794_v0 }
0x2381   :  { %vm2357_vm14 = vmpackc.low %vm1797_vm13, %vm1797_vm13  ;;  %vm1969_vm13 = vcmp.eq.s32.totalorder %v2769_v17, 18 }
0x2382   :  { %2358 = vmatmul.msk.bf16.vlgmr.msrb.gmra.mxu3 %vm2357_vm14, %v2521_v52 }
0x2383   :  { %1975 = vmatpush.bf16.msrb.mxu3 %v3135_v13 }
0x2387   :  { %1976 = vmatpush.bf16.msrb.mxu3 %v3141_v22 }
0x238b   :  { %1977 = vmatpush.bf16.msrb.mxu3 %v3147_v23 }
0x238f   :  { %1978 = vmatpush.bf16.msrb.mxu3 %v3153_v24 }
0x2393   :  { %1979 = vmatpush.bf16.msrb.mxu3 %v3159_v25 }
0x2397   :  { %1980 = vmatpush.bf16.msrb.mxu3 %v3165_v26 }
0x239b   :  { %1981 = vmatpush.bf16.msrb.mxu3 %v3171_v27 }
0x239f   :  { %1982 = vmatpush.bf16.msrb.mxu3 %v3177_v29 }
0x2405   :  { %v1810_v2 = vpop.f32.mrf.mxu3 }
0x2406   :  { %v1811_v3 = vadd.f32 %v1810_v2, %v1768_v56 }
0x2408   :  { %2469 = vtanh.f32 %v1811_v3 }
0x240d   :  { %v1812_v4 = vpop.f32.mrf.mxu3 }
0x240e   :  { %v2470_v8 = vpop.eup %2469 }
0x240f   :  { %v1815_v13 = vpack.c.bf16 %v2470_v8, %v2470_v8 }
0x2411   :  { %1824 = vmatmul.bf16.vlgmr.msrb.gmra.mxu1 %v1815_v13 }
0x2412   :  { %1990 = vmatpush.bf16.msrb.mxu1 %v3048_v14 }
0x2416   :  { %1991 = vmatpush.bf16.msrb.mxu1 %v3054_v16 }
0x241a   :  { %1992 = vmatpush.bf16.msrb.mxu1 %v3060_v18 }
0x241e   :  { %1993 = vmatpush.bf16.msrb.mxu1 %v3066_v19 }
0x2422   :  { %1994 = vmatpush.bf16.msrb.mxu1 %v3072_v21 }
0x2426   :  { %1995 = vmatpush.bf16.msrb.mxu1 %v3102_v32 }
0x242a   :  { %1996 = vmatpush.bf16.msrb.mxu1 %v3108_v33 }
0x242e   :  { %1997 = vmatpush.bf16.msrb.mxu1 %v3114_v34 }
0x248e   :  { %v1825_v22 = vpop.f32.mrf.mxu1 }
0x248f   :  { %v1826_v23 = vadd.f32 %v3120_v36, %v1825_v22 }
0x2491   :  { %vm1830_vm15 = vcmp.lt.s32.totalorder %v1826_v23, 0  ;;  %v1831_v24 = vxor.u32 2147483647, %v1826_v23 }
0x2493   :  { %v1832_v14 = vsel %vm1830_vm15, %v1831_v24, %v1826_v23 }
0x2494   :  { %v1833_v25 = vand.u32 4294967040, %v1832_v14 }
0x2496   :  { %v1827_v16 = vpop.f32.mrf.mxu1  ;;  %v1834_v18 = vor.u32 %v1833_v25, %v2777_v20 }
0x2498   :  { %v1835_v19 = vsel %vm787_vm4, %v1834_v18, 2147483648 }
0x2499   :  { %v1836_v21 = vsel %vm859_vm5, %v1835_v19, 2147483648 }
0x249a   :  { %v1838_v32 = vshra.s32 %v1836_v21, 16  ;;  %v1837_v33 = vand.u32 65535, %v1836_v21 }
0x249c   :  { %v1840_v26 = vcvt.s32.f32 %v1838_v32  ;;  %v1839_v27 = vcvt.s32.f32 %v1837_v33 }
0x249e   :  { %1841 = vmax.xlane.f32.xlu2 %v1840_v26 }
0x2511   :  { %v1842_v34 = vpop.xlane.xlu2 %1841 }
0x2512   :  { %vm1843_vm0 = vcmp.eq.f32.partialorder %v1840_v26, %v1842_v34  ;;  %v1848_v9 = vcvt.f32.s32 %v1842_v34 }
0x2513   :  { %v1844_v29 = vsel %vm1843_vm0, %v1839_v27, -inf }
0x2514   :  { %1845 = vmax.xlane.f32.xlu0 %v1844_v29  ;;  %v1849_v11 = vshll.u32 %v1848_v9, 16 }
0x2587   :  { %v1846_v10 = vpop.xlane.xlu0 %1845 }
0x2588   :  { %v1847_v12 = vcvt.f32.s32 %v1846_v10 }
0x258a   :  { %v1850_v37 = vadd.s32 %v1849_v11, %v1847_v12 }
0x258c   :  { %v1851_v39 = vand.u32 255, %v1850_v37 }
0x258e   :  { %v1852_v5 = vsub.s32 63, %v1851_v39 }
0x2590   :  { %v1854_v40 = vsel %vm1853_vm1, %v1852_v5, %v1796_v1  ;;  %vm1855_vm2 = vcmp.eq.s32.totalorder %v2769_v17, %v1852_v5 }
0x2591   :  { %vm2360_vm3 = vmpackc.low %vm1855_vm2, %vm1855_vm2 }
0x2592   :  { %2361 = vmatmul.msk.bf16.vlgmr.msra.gmra.mxu2 %vm2360_vm3, %v2521_v52 }
0x2615   :  { %v1868_v6 = vpop.f32.mrf.mxu2 }
0x2616   :  { %v1869_v7 = vadd.f32 %v1868_v6, %v1826_v23 }
0x2618   :  { %2471 = vtanh.f32 %v1869_v7 }
0x261d   :  { %v1870_v41 = vpop.f32.mrf.mxu2 }
0x261e   :  { %v2472_v15 = vpop.eup %2471 }
0x261f   :  { %v1873_v44 = vpack.c.bf16 %v2472_v15, %v2472_v15 }
0x2621   :  { %1882 = vmatmul.bf16.vlgmr.msra.gmra.mxu3 %v1873_v44 }
0x26a4   :  { %v1883_v45 = vpop.f32.mrf.mxu3 }
0x26a5   :  { %v1884_v47 = vadd.f32 %v3120_v36, %v1883_v45 }
0x26a7   :  { %vm1888_vm6 = vcmp.lt.s32.totalorder %v1884_v47, 0  ;;  %v1889_v48 = vxor.u32 2147483647, %v1884_v47 }
0x26a9   :  { %v1890_v49 = vsel %vm1888_vm6, %v1889_v48, %v1884_v47 }
0x26aa   :  { %v1891_v50 = vand.u32 4294967040, %v1890_v49 }
0x26ac   :  { %v1885_v56 = vpop.f32.mrf.mxu3  ;;  %v1892_v53 = vor.u32 %v1891_v50, %v2777_v20 }
0x26ae   :  { %v1893_v28 = vsel %vm787_vm4, %v1892_v53, 2147483648 }
0x26af   :  { %v1894_v54 = vsel %vm859_vm5, %v1893_v28, 2147483648 }
0x26b0   :  { %v1896_v31 = vshra.s32 %v1894_v54, 16  ;;  %v1895_v30 = vand.u32 65535, %v1894_v54 }
0x26b2   :  { %v1898_v38 = vcvt.s32.f32 %v1896_v31  ;;  %v1897_v42 = vcvt.s32.f32 %v1895_v30 }
0x26b4   :  { %1899 = vmax.xlane.f32.xlu1 %v1898_v38 }
0x2727   :  { %v1900_v35 = vpop.xlane.xlu1 %1899 }
0x2728   :  { %vm1901_vm7 = vcmp.eq.f32.partialorder %v1898_v38, %v1900_v35  ;;  %v1906_v46 = vcvt.f32.s32 %v1900_v35 }
0x2729   :  { %v1902_v43 = vsel %vm1901_vm7, %v1897_v42, -inf }
0x272a   :  { %1903 = vmax.xlane.f32.xlu2 %v1902_v43  ;;  %v1907_v55 = vshll.u32 %v1906_v46, 16 }
0x279d   :  { %v1904_v51 = vpop.xlane.xlu2 %1903 }
0x279e   :  { %v1905_v57 = vcvt.f32.s32 %v1904_v51 }
0x27a0   :  { %v1908_v58 = vadd.s32 %v1907_v55, %v1905_v57 }
0x27a2   :  { %v1909_v59 = vand.u32 255, %v1908_v58 }
0x27a4   :  { %v1910_v60 = vsub.s32 63, %v1909_v59 }
0x27a6   :  { %v1912_v61 = vsel %vm1911_vm8, %v1910_v60, %v1854_v40  ;;  %vm1913_vm9 = vcmp.eq.s32.totalorder %v2769_v17, %v1910_v60 }
0x27a7   :  { %vm2363_vm10 = vmpackc.low %vm1913_vm9, %vm1913_vm9 }
0x27a8   :  { %2364 = vmatmul.msk.bf16.vlgmr.msra.gmra.mxu1 %vm2363_vm10, %v2521_v52 }
0x2825   :  { %v1926_v62 = vpop.f32.mrf.mxu1 }
0x2826   :  { %v1927_v63 = vadd.f32 %v1926_v62, %v1884_v47 }
0x2828   :  { %2473 = vtanh.f32 %v1927_v63 }
0x282d   :  { %v1928_v0 = vpop.f32.mrf.mxu1 }
0x282e   :  { %v2474_v1 = vpop.eup %2473 }
0x282f   :  { %v1931_v2 = vpack.c.bf16 %v2474_v1, %v2474_v1 }
0x2831   :  { %1940 = vmatmul.bf16.vlgmr.msrb.gmra.mxu2 %v1931_v2 }
0x28b4   :  { %v1941_v3 = vpop.f32.mrf.mxu2 }
0x28b5   :  { %v1942_v4 = vadd.f32 %v3120_v36, %v1941_v3 }
0x28b7   :  { %vm1946_vm11 = vcmp.lt.s32.totalorder %v1942_v4, 0  ;;  %v1947_v8 = vxor.u32 2147483647, %v1942_v4 }
0x28b9   :  { %v1948_v13 = vsel %vm1946_vm11, %v1947_v8, %v1942_v4 }
0x28ba   :  { %v1949_v22 = vand.u32 4294967040, %v1948_v13 }
0x28bc   :  { %v1943_v23 = vpop.f32.mrf.mxu2  ;;  %v1950_v24 = vor.u32 %v1949_v22, %v2777_v20 }
0x28be   :  { %v1951_v14 = vsel %vm787_vm4, %v1950_v24, 2147483648 }
0x28bf   :  { %v1952_v25 = vsel %vm859_vm5, %v1951_v14, 2147483648 }
0x28c0   :  { %v1954_v16 = vshra.s32 %v1952_v25, 16  ;;  %v1953_v19 = vand.u32 65535, %v1952_v25 }
0x28c2   :  { %v1956_v18 = vcvt.s32.f32 %v1954_v16  ;;  %v1955_v32 = vcvt.s32.f32 %v1953_v19 }
0x28c4   :  { %1957 = vmax.xlane.f32.xlu0 %v1956_v18 }
0x2937   :  { %v1958_v21 = vpop.xlane.xlu0 %1957 }
0x2938   :  { %vm1959_vm12 = vcmp.eq.f32.partialorder %v1956_v18, %v1958_v21  ;;  %v1964_v33 = vcvt.f32.s32 %v1958_v21 }
0x2939   :  { %v1960_v26 = vsel %vm1959_vm12, %v1955_v32, -inf }
0x293a   :  { %1961 = vmax.xlane.f32.xlu1 %v1960_v26  ;;  %v1965_v27 = vshll.u32 %v1964_v33, 16 }
0x29ad   :  { %v1962_v34 = vpop.xlane.xlu1 %1961 }
0x29ae   :  { %v1963_v29 = vcvt.f32.s32 %v1962_v34 }
0x29b0   :  { %v1966_v9 = vadd.s32 %v1965_v27, %v1963_v29 }
0x29b2   :  { %v1967_v10 = vand.u32 255, %v1966_v9 }
0x29b4   :  { %v1968_v11 = vsub.s32 63, %v1967_v10 }
0x29b6   :  { %vm1971_vm14 = vcmp.eq.s32.totalorder %v2769_v17, %v1968_v11  ;;  %v1970_v12 = vsel %vm1969_vm13, %v1968_v11, %v1912_v61 }
0x29b7   :  { %vm2366_vm15 = vmpackc.low %vm1971_vm14, %vm1971_vm14 }
0x29b8   :  { %2367 = vmatmul.msk.bf16.vlgmr.msrb.gmra.mxu3 %vm2366_vm15, %v2521_v52 }
0x2a3b   :  { %v1984_v37 = vpop.f32.mrf.mxu3 }
0x2a3c   :  { %v1985_v39 = vadd.f32 %v1984_v37, %v1942_v4 }
0x2a3e   :  { %2475 = vtanh.f32 %v1985_v39 }
0x2a43   :  { %v1986_v5 = vpop.f32.mrf.mxu3 }
0x2a44   :  { %v2476_v40 = vpop.eup %2475 }
0x2a45   :  { %v1989_v6 = vpack.c.bf16 %v2476_v40, %v2476_v40 }
0x2a47   :  { %1998 = vmatmul.bf16.vlgmr.msrb.gmra.mxu1 %v1989_v6 }
0x2ac4   :  { %v1999_v7 = vpop.f32.mrf.mxu1 }
0x2ac5   :  { %v2000_v41 = vadd.f32 %v3120_v36, %v1999_v7 }
0x2ac7   :  { %vm2004_vm0 = vcmp.lt.s32.totalorder %v2000_v41, 0  ;;  %v2005_v15 = vxor.u32 2147483647, %v2000_v41 }
0x2ac9   :  { %v2006_v44 = vsel %vm2004_vm0, %v2005_v15, %v2000_v41 }
0x2aca   :  { %v2007_v45 = vand.u32 4294967040, %v2006_v44 }
0x2acc   :  { %v2001_v47 = vpop.f32.mrf.mxu1  ;;  %v2008_v48 = vor.u32 %v2007_v45, %v2777_v20 }
0x2ace   :  { %v2009_v52 = vsel %vm787_vm4, %v2008_v48, 2147483648  ;;  %vm2027_vm4 = vcmp.eq.s32.totalorder %v2769_v17, 19 }
0x2acf   :  { %v2010_v49 = vsel %vm859_vm5, %v2009_v52, 2147483648  ;;  %vm2029_vm5 = vcmask 156672  }
0x2ad0   :  { %v2012_v50 = vshra.s32 %v2010_v49, 16  ;;  %v2011_v53 = vand.u32 65535, %v2010_v49 }
0x2ad2   :  { %v2014_v56 = vcvt.s32.f32 %v2012_v50  ;;  %v2013_v54 = vcvt.s32.f32 %v2011_v53 }
0x2ad4   :  { %2015 = vmax.xlane.f32.xlu2 %v2014_v56 }
0x2b47   :  { %v2016_v28 = vpop.xlane.xlu2 %2015 }
0x2b48   :  { %vm2017_vm1 = vcmp.eq.f32.partialorder %v2014_v56, %v2016_v28  ;;  %v2022_v31 = vcvt.f32.s32 %v2016_v28 }
0x2b49   :  { %v2018_v36 = vsel %vm2017_vm1, %v2013_v54, -inf }
0x2b4a   :  { %2019 = vmax.xlane.f32.xlu0 %v2018_v36  ;;  %v2023_v30 = vshll.u32 %v2022_v31, 16 }
0x2bbd   :  { %v2020_v38 = vpop.xlane.xlu0 %2019 }
0x2bbe   :  { %v2021_v35 = vcvt.f32.s32 %v2020_v38 }
0x2bc0   :  { %v2024_v42 = vadd.s32 %v2023_v30, %v2021_v35 }
0x2bc2   :  { %v2025_v20 = vand.u32 255, %v2024_v42 }
0x2bc4   :  { %v2026_v43 = vsub.s32 63, %v2025_v20 }
0x2bc6   :  { %v2028_v46 = vsel %vm2027_vm4, %v2026_v43, %v1970_v12 }
0x2bc7   :  { %2030 = vst.msk [vmem:[#allocation2] sm:$0x3] %vm2029_vm5, %v2028_v46 }
0x2bc8   :  { %2041 = dma.vmem_to_hbm [thread:$0]  %s2037_s26, 32, %s2039_s29, [#allocation3]  }
0x2bc9   :  { %2518 = dma.done.wait [#allocation3], 32  }
0x2bca   :  { %2519 = vsyncadd [#allocation3], 4294967264 }
0x2bcb   :  { %2046 = vsyncpa [#allocation3], 1 }

</bundles_post_ra>
